<compile_context>
chip_gen: v5e
topology: v5e:2x2
jax: 0.10.0
libtpu: 0.0.40
codegen_flags: <defaults>
</compile_context>

<pallas_src>
import functools

import jax
import jax.numpy as jnp
from jax import lax
from jax.experimental import pallas as pl
from jax.experimental.pallas import tpu as pltpu


def _filter_predictor_kernel(c_ref, s_ref, wk_ref, bc_ref, wfc_ref, bfc_ref,
                             out_ref, *, H, W):
    """One batch element per grid step (all blocks resident in VMEM).

    c_ref, s_ref : (Cin, H*W)           content / style image (NCHW kept, spatial flattened)
    wk_ref       : (Cout, 9*Cin)        conv weight, taps flattened as (dy*3+dx)*Cin + cin
    bc_ref       : (Cout, 1)            conv bias
    wfc_ref      : (Cout*Cout, 2*Cout)  FC weight (PyTorch Linear layout, used as-is)
    bfc_ref      : (Cout*Cout, 1)       FC bias
    out_ref      : (Cout*Cout, 1)       flattened filter for this batch element
    """
    Cin, HW = c_ref.shape
    inv_hw = 1.0 / float(H * W)

    # image-column index of every lane (shared by content and style)
    col = lax.broadcasted_iota(jnp.int32, (Cin, HW), 1) % W

    def region_sums(x2):
        # Per-channel sums of the 9 input regions feeding the 9 taps of a 3x3 conv with
        # padding=1, summed over all output pixels (verified against direct conv).
        T = jnp.sum(x2, axis=1, keepdims=True)                                 # all pixels
        FR = jnp.sum(x2[:, 0:W], axis=1, keepdims=True)                        # image row 0
        LR = jnp.sum(x2[:, (H - 1) * W:H * W], axis=1, keepdims=True)          # image row H-1
        FC = jnp.sum(jnp.where(col == 0, x2, 0.0), axis=1, keepdims=True)      # image col 0
        LC = jnp.sum(jnp.where(col == W - 1, x2, 0.0), axis=1, keepdims=True)  # image col W-1
        c_tl = x2[:, 0:1]                             # x[0, 0]
        c_tr = x2[:, W - 1:W]                         # x[0, W-1]
        c_bl = x2[:, (H - 1) * W:(H - 1) * W + 1]     # x[H-1, 0]
        c_br = x2[:, HW - 1:HW]                       # x[H-1, W-1]
        taps = [
            T - LR - LC + c_br,   # (dy=0, dx=0): rows 0..H-2, cols 0..W-2
            T - LR,               # (0, 1)
            T - LR - FC + c_bl,   # (0, 2)
            T - LC,               # (1, 0)
            T,                    # (1, 1)
            T - FC,               # (1, 2)
            T - FR - LC + c_tr,   # (2, 0)
            T - FR,               # (2, 1)
            T - FR - FC + c_tl,   # (2, 2)
        ]
        return jnp.concatenate(taps, axis=0)          # (9*Cin, 1), index = tap*Cin + cin

    def conv_then_mean(x_ref):
        s = region_sums(x_ref[...])
        # single fused 9-tap matmul (K = 9*Cin) replacing 9 tiny per-tap matmuls
        pooled = jnp.dot(wk_ref[...], s, preferred_element_type=jnp.float32)   # (Cout, 1)
        return pooled * inv_hw + bc_ref[...]

    pooled_c = conv_then_mean(c_ref)                   # (Cout, 1)
    pooled_s = conv_then_mean(s_ref)                   # (Cout, 1)
    z = jnp.concatenate([pooled_c, pooled_s], axis=0)  # (2*Cout, 1) == torch.cat([c, s], 1)

    filt = jnp.dot(wfc_ref[...], z, preferred_element_type=jnp.float32)        # (Cout^2, 1)
    out_ref[...] = (filt + bfc_ref[...]).astype(out_ref.dtype)


def filter_predictor_pallas(content, style, params):
    """content, style: (B, Cin, H, W) float32 -> (B, Cout, Cout, 1), PyTorch semantics."""
    assert content.shape == style.shape
    B, Cin, H, W = content.shape
    wk = params["wk"]            # (Cout, 9*Cin)
    bc = params["b_conv"]        # (Cout, 1)
    wfc = params["w_fc"]         # (Cout*Cout, 2*Cout)   (PyTorch Linear weight, unmodified)
    bfc = params["b_fc"]         # (Cout*Cout, 1)
    Cout = wk.shape[0]
    HW = H * W

    # Free contiguous reshapes: NCHW stays in HBM, no transpose / pad / upsample copies.
    c2 = content.reshape(B, Cin, HW)
    s2 = style.reshape(B, Cin, HW)

    kernel = functools.partial(_filter_predictor_kernel, H=H, W=W)

    # Per-step VMEM footprint: double-buffered content+style blocks + (revisited) weights + out.
    block_bytes = 2 * 2 * Cin * HW * 4
    weight_bytes = 2 * 4 * (Cout * 9 * Cin + Cout + Cout * Cout * 2 * Cout + 2 * Cout * Cout)
    vmem_limit = int(min(96 * 2 ** 20, max(32 * 2 ** 20, 2 * (block_bytes + weight_bytes))))

    out = pl.pallas_call(
        kernel,
        out_shape=jax.ShapeDtypeStruct((B, Cout * Cout, 1), content.dtype),
        grid_spec=pltpu.PrefetchScalarGridSpec(
            num_scalar_prefetch=0,
            grid=(B,),
            in_specs=[
                pl.BlockSpec((None, Cin, HW), lambda b: (b, 0, 0)),       # content block
                pl.BlockSpec((None, Cin, HW), lambda b: (b, 0, 0)),       # style block
                pl.BlockSpec((Cout, 9 * Cin), lambda b: (0, 0)),          # conv weight (revisited)
                pl.BlockSpec((Cout, 1), lambda b: (0, 0)),                # conv bias
                pl.BlockSpec((Cout * Cout, 2 * Cout), lambda b: (0, 0)),  # FC weight
                pl.BlockSpec((Cout * Cout, 1), lambda b: (0, 0)),         # FC bias
            ],
            out_specs=pl.BlockSpec((None, Cout * Cout, 1), lambda b: (b, 0, 0)),
        ),
        compiler_params=pltpu.CompilerParams(
            dimension_semantics=("parallel",),   # batch elements independent -> megacore-shardable
            vmem_limit_bytes=vmem_limit),
    )(c2, s2, wk, bc, wfc, bfc)

    # (B, Cout*Cout, 1) -> (B, Cout, Cout, 1): same row-major order as torch .view(...).unsqueeze(3)
    return out.reshape(B, Cout, Cout, 1)


# ---------------- pure-JAX reference (mirrors the PyTorch FilterPredictor) ----------------
def filter_predictor_ref(content, style, w_conv, b_conv, w_fc, b_fc):
    dn = ("NCHW", "OIHW", "NCHW")

    def down(x):
        y = lax.conv_general_dilated(x, w_conv, (1, 1), "SAME",
                                     dimension_numbers=dn,
                                     precision=lax.Precision.HIGHEST)
        return y + b_conv[None, :, None, None]

    c = jnp.mean(down(content), axis=(2, 3))                      # (B, Cout)
    s = jnp.mean(down(style), axis=(2, 3))                        # (B, Cout)
    z = jnp.concatenate([c, s], axis=1)                           # (B, 2*Cout)
    f = jnp.dot(z, w_fc.T, precision=lax.Precision.HIGHEST) + b_fc
    B = content.shape[0]
    Cout = b_conv.shape[0]
    return f.reshape(B, Cout, Cout)[..., None]                    # (B, Cout, Cout, 1)


if __name__ == "__main__":
    # Small shapes consistent with FilterPredictor(vgg_channel=64, inner_channel=32)
    B, Cin, Cout, H, W = 2, 64, 32, 16, 16

    key = jax.random.PRNGKey(0)
    kc, ks, kw, kb, kfw, kfb = jax.random.split(key, 6)

    content = jax.random.normal(kc, (B, Cin, H, W), jnp.float32)
    style = jax.random.normal(ks, (B, Cin, H, W), jnp.float32)

    # PyTorch-shaped parameters
    w_conv = 0.1 * jax.random.normal(kw, (Cout, Cin, 3, 3), jnp.float32)   # Conv2d weight (OIHW)
    b_conv = 0.1 * jax.random.normal(kb, (Cout,), jnp.float32)             # Conv2d bias
    w_fc = 0.1 * jax.random.normal(kfw, (Cout * Cout, 2 * Cout), jnp.float32)  # Linear weight
    b_fc = 0.1 * jax.random.normal(kfb, (Cout * Cout,), jnp.float32)           # Linear bias

    # kernel-friendly (all free host-side reshapes/transposes of tiny weights)
    params = {
        "wk": jnp.transpose(w_conv, (0, 2, 3, 1)).reshape(Cout, 9 * Cin),  # (Cout, 9*Cin)
        "b_conv": b_conv.reshape(Cout, 1),
        "w_fc": w_fc,                                                      # (Cout^2, 2*Cout)
        "b_fc": b_fc.reshape(Cout * Cout, 1),
    }

    out = filter_predictor_pallas(content, style, params)
    out = jax.block_until_ready(out)

    ref = filter_predictor_ref(content, style, w_conv, b_conv, w_fc, b_fc)
    ref = jax.block_until_ready(ref)

    assert out.shape == (B, Cout, Cout, 1), out.shape
    max_err = float(jnp.max(jnp.abs(out - ref)))
    assert jnp.allclose(out, ref, atol=5e-3, rtol=5e-3), max_err

    print("KERNEL_OK")
</pallas_src>

<mosaic_0001>
module attributes {stable_mosaic.version = 11 : i64} {
  func.func @_filter_predictor_kernel(%arg0: i32, %arg1: memref<1x64x256xf32, #tpu.memory_space<vmem>>, %arg2: memref<1x64x256xf32, #tpu.memory_space<vmem>>, %arg3: memref<32x576xf32, #tpu.memory_space<vmem>>, %arg4: memref<32x1xf32, #tpu.memory_space<vmem>>, %arg5: memref<1024x64xf32, #tpu.memory_space<vmem>>, %arg6: memref<1024x1xf32, #tpu.memory_space<vmem>>, %arg7: memref<1x1024x1xf32, #tpu.memory_space<vmem>>) attributes {dimension_semantics = [#tpu.dimension_semantics<parallel>], iteration_bounds = array<i64: 2>, scalar_prefetch = 0 : i64, scratch_operands = 0 : i64, tpu.core_type = #tpu.core_type<tc>, window_params = [{transform_indices = @transform_0, window_bounds = array<i64: 1, 64, 256>}, {transform_indices = @transform_1, window_bounds = array<i64: 1, 64, 256>}, {pipeline_mode = #tpu.pipeline_mode<synchronous>, transform_indices = @transform_2, window_bounds = array<i64: 32, 576>}, {pipeline_mode = #tpu.pipeline_mode<synchronous>, transform_indices = @transform_3, window_bounds = array<i64: 32, 1>}, {pipeline_mode = #tpu.pipeline_mode<synchronous>, transform_indices = @transform_4, window_bounds = array<i64: 1024, 64>}, {pipeline_mode = #tpu.pipeline_mode<synchronous>, transform_indices = @transform_5, window_bounds = array<i64: 1024, 1>}, {transform_indices = @transform_6, window_bounds = array<i64: 1, 1024, 1>}]} {
    %0 = tpu.iota {dimensions = array<i32: 1>} : vector<64x256xi32>
    %c16_i32 = arith.constant 16 : i32
    %c0_i32 = arith.constant 0 : i32
    %1 = arith.cmpi eq, %c16_i32, %c0_i32 : i32
    %c1_i32 = arith.constant 1 : i32
    %2 = arith.select %1, %c1_i32, %c16_i32 : i32
    %3 = vector.broadcast %2 : i32 to vector<64x256xi32>
    %4 = arith.remsi %0, %3 : vector<64x256xi32>
    %c0_i32_0 = arith.constant 0 : i32
    %5 = vector.broadcast %c0_i32_0 : i32 to vector<64x256xi32>
    %6 = arith.cmpi ne, %4, %5 : vector<64x256xi32>
    %c0_i32_1 = arith.constant 0 : i32
    %7 = vector.broadcast %c0_i32_1 : i32 to vector<64x256xi32>
    %8 = arith.cmpi slt, %4, %7 : vector<64x256xi32>
    %c0_i32_2 = arith.constant 0 : i32
    %9 = arith.cmpi slt, %2, %c0_i32_2 : i32
    %10 = vector.broadcast %9 : i1 to vector<64x256xi1>
    %11 = vector.broadcast %10 : vector<64x256xi1> to vector<64x256xi1>
    %12 = arith.xori %8, %11 : vector<64x256xi1>
    %13 = arith.andi %12, %6 : vector<64x256xi1>
    %14 = vector.broadcast %2 : i32 to vector<64x256xi32>
    %15 = arith.addi %4, %14 : vector<64x256xi32>
    %16 = arith.select %13, %15, %4 : vector<64x256xi1>, vector<64x256xi32>
    %c0 = arith.constant 0 : index
    %c0_3 = arith.constant 0 : index
    %c0_4 = arith.constant 0 : index
    %17 = vector.load %arg1[%c0, %c0_3, %c0_4] : memref<1x64x256xf32, #tpu.memory_space<vmem>>, vector<1x64x256xf32>
    %18 = vector.shape_cast %17 : vector<1x64x256xf32> to vector<64x256xf32>
    %cst = arith.constant dense<0.000000e+00> : vector<64xf32>
    %19 = vector.multi_reduction <add>, %18, %cst [1] : vector<64x256xf32> to vector<64xf32>
    %20 = vector.shape_cast %19 : vector<64xf32> to vector<64x1xf32>
    %21 = vector.extract_strided_slice %18 {offsets = [0, 0], sizes = [64, 16], strides = [1, 1]} : vector<64x256xf32> to vector<64x16xf32>
    %cst_5 = arith.constant dense<0.000000e+00> : vector<64xf32>
    %22 = vector.multi_reduction <add>, %21, %cst_5 [1] : vector<64x16xf32> to vector<64xf32>
    %23 = vector.shape_cast %22 : vector<64xf32> to vector<64x1xf32>
    %24 = vector.extract_strided_slice %18 {offsets = [0, 240], sizes = [64, 16], strides = [1, 1]} : vector<64x256xf32> to vector<64x16xf32>
    %cst_6 = arith.constant dense<0.000000e+00> : vector<64xf32>
    %25 = vector.multi_reduction <add>, %24, %cst_6 [1] : vector<64x16xf32> to vector<64xf32>
    %26 = vector.shape_cast %25 : vector<64xf32> to vector<64x1xf32>
    %c0_i32_7 = arith.constant 0 : i32
    %27 = vector.broadcast %c0_i32_7 : i32 to vector<64x256xi32>
    %28 = arith.cmpi eq, %16, %27 : vector<64x256xi32>
    %cst_8 = arith.constant 0.000000e+00 : f32
    %29 = vector.broadcast %cst_8 : f32 to vector<64x256xf32>
    %30 = arith.select %28, %18, %29 : vector<64x256xi1>, vector<64x256xf32>
    %cst_9 = arith.constant dense<0.000000e+00> : vector<64xf32>
    %31 = vector.multi_reduction <add>, %30, %cst_9 [1] : vector<64x256xf32> to vector<64xf32>
    %32 = vector.shape_cast %31 : vector<64xf32> to vector<64x1xf32>
    %c15_i32 = arith.constant 15 : i32
    %33 = vector.broadcast %c15_i32 : i32 to vector<64x256xi32>
    %34 = arith.cmpi eq, %16, %33 : vector<64x256xi32>
    %cst_10 = arith.constant 0.000000e+00 : f32
    %35 = vector.broadcast %cst_10 : f32 to vector<64x256xf32>
    %36 = arith.select %34, %18, %35 : vector<64x256xi1>, vector<64x256xf32>
    %cst_11 = arith.constant dense<0.000000e+00> : vector<64xf32>
    %37 = vector.multi_reduction <add>, %36, %cst_11 [1] : vector<64x256xf32> to vector<64xf32>
    %38 = vector.shape_cast %37 : vector<64xf32> to vector<64x1xf32>
    %39 = vector.extract_strided_slice %18 {offsets = [0, 0], sizes = [64, 1], strides = [1, 1]} : vector<64x256xf32> to vector<64x1xf32>
    %40 = vector.extract_strided_slice %18 {offsets = [0, 15], sizes = [64, 1], strides = [1, 1]} : vector<64x256xf32> to vector<64x1xf32>
    %41 = vector.extract_strided_slice %18 {offsets = [0, 240], sizes = [64, 1], strides = [1, 1]} : vector<64x256xf32> to vector<64x1xf32>
    %42 = vector.extract_strided_slice %18 {offsets = [0, 255], sizes = [64, 1], strides = [1, 1]} : vector<64x256xf32> to vector<64x1xf32>
    %43 = arith.subf %20, %26 : vector<64x1xf32>
    %44 = arith.subf %43, %38 : vector<64x1xf32>
    %45 = arith.addf %44, %42 : vector<64x1xf32>
    %46 = arith.subf %20, %26 : vector<64x1xf32>
    %47 = arith.subf %20, %26 : vector<64x1xf32>
    %48 = arith.subf %47, %32 : vector<64x1xf32>
    %49 = arith.addf %48, %41 : vector<64x1xf32>
    %50 = arith.subf %20, %38 : vector<64x1xf32>
    %51 = arith.subf %20, %32 : vector<64x1xf32>
    %52 = arith.subf %20, %23 : vector<64x1xf32>
    %53 = arith.subf %52, %38 : vector<64x1xf32>
    %54 = arith.addf %53, %40 : vector<64x1xf32>
    %55 = arith.subf %20, %23 : vector<64x1xf32>
    %56 = arith.subf %20, %23 : vector<64x1xf32>
    %57 = arith.subf %56, %32 : vector<64x1xf32>
    %58 = arith.addf %57, %39 : vector<64x1xf32>
    %59 = tpu.concatenate %45, %46, %49, %50, %20, %51, %54, %55, %58 in 0 : vector<64x1xf32>, vector<64x1xf32>, vector<64x1xf32>, vector<64x1xf32>, vector<64x1xf32>, vector<64x1xf32>, vector<64x1xf32>, vector<64x1xf32>, vector<64x1xf32> -> vector<576x1xf32>
    %c0_12 = arith.constant 0 : index
    %c0_13 = arith.constant 0 : index
    %60 = vector.load %arg3[%c0_12, %c0_13] : memref<32x576xf32, #tpu.memory_space<vmem>>, vector<32x576xf32>
    %cst_14 = arith.constant dense<0.000000e+00> : vector<32x1xf32>
    %61 = tpu.matmul %60, %59, %cst_14 {dimension_numbers = #tpu.dot_dimension_numbers<[1], [0], [0], [1], [0, 0, 1, 1], [], []>} : vector<32x576xf32>, vector<576x1xf32>, vector<32x1xf32> -> vector<32x1xf32>
    %cst_15 = arith.constant 3.906250e-03 : f32
    %62 = vector.broadcast %cst_15 : f32 to vector<32x1xf32>
    %63 = arith.mulf %61, %62 : vector<32x1xf32>
    %c0_16 = arith.constant 0 : index
    %c0_17 = arith.constant 0 : index
    %64 = vector.load %arg4[%c0_16, %c0_17] : memref<32x1xf32, #tpu.memory_space<vmem>>, vector<32x1xf32>
    %65 = arith.addf %63, %64 : vector<32x1xf32>
    %c0_18 = arith.constant 0 : index
    %c0_19 = arith.constant 0 : index
    %c0_20 = arith.constant 0 : index
    %66 = vector.load %arg2[%c0_18, %c0_19, %c0_20] : memref<1x64x256xf32, #tpu.memory_space<vmem>>, vector<1x64x256xf32>
    %67 = vector.shape_cast %66 : vector<1x64x256xf32> to vector<64x256xf32>
    %cst_21 = arith.constant dense<0.000000e+00> : vector<64xf32>
    %68 = vector.multi_reduction <add>, %67, %cst_21 [1] : vector<64x256xf32> to vector<64xf32>
    %69 = vector.shape_cast %68 : vector<64xf32> to vector<64x1xf32>
    %70 = vector.extract_strided_slice %67 {offsets = [0, 0], sizes = [64, 16], strides = [1, 1]} : vector<64x256xf32> to vector<64x16xf32>
    %cst_22 = arith.constant dense<0.000000e+00> : vector<64xf32>
    %71 = vector.multi_reduction <add>, %70, %cst_22 [1] : vector<64x16xf32> to vector<64xf32>
    %72 = vector.shape_cast %71 : vector<64xf32> to vector<64x1xf32>
    %73 = vector.extract_strided_slice %67 {offsets = [0, 240], sizes = [64, 16], strides = [1, 1]} : vector<64x256xf32> to vector<64x16xf32>
    %cst_23 = arith.constant dense<0.000000e+00> : vector<64xf32>
    %74 = vector.multi_reduction <add>, %73, %cst_23 [1] : vector<64x16xf32> to vector<64xf32>
    %75 = vector.shape_cast %74 : vector<64xf32> to vector<64x1xf32>
    %c0_i32_24 = arith.constant 0 : i32
    %76 = vector.broadcast %c0_i32_24 : i32 to vector<64x256xi32>
    %77 = arith.cmpi eq, %16, %76 : vector<64x256xi32>
    %cst_25 = arith.constant 0.000000e+00 : f32
    %78 = vector.broadcast %cst_25 : f32 to vector<64x256xf32>
    %79 = arith.select %77, %67, %78 : vector<64x256xi1>, vector<64x256xf32>
    %cst_26 = arith.constant dense<0.000000e+00> : vector<64xf32>
    %80 = vector.multi_reduction <add>, %79, %cst_26 [1] : vector<64x256xf32> to vector<64xf32>
    %81 = vector.shape_cast %80 : vector<64xf32> to vector<64x1xf32>
    %c15_i32_27 = arith.constant 15 : i32
    %82 = vector.broadcast %c15_i32_27 : i32 to vector<64x256xi32>
    %83 = arith.cmpi eq, %16, %82 : vector<64x256xi32>
    %cst_28 = arith.constant 0.000000e+00 : f32
    %84 = vector.broadcast %cst_28 : f32 to vector<64x256xf32>
    %85 = arith.select %83, %67, %84 : vector<64x256xi1>, vector<64x256xf32>
    %cst_29 = arith.constant dense<0.000000e+00> : vector<64xf32>
    %86 = vector.multi_reduction <add>, %85, %cst_29 [1] : vector<64x256xf32> to vector<64xf32>
    %87 = vector.shape_cast %86 : vector<64xf32> to vector<64x1xf32>
    %88 = vector.extract_strided_slice %67 {offsets = [0, 0], sizes = [64, 1], strides = [1, 1]} : vector<64x256xf32> to vector<64x1xf32>
    %89 = vector.extract_strided_slice %67 {offsets = [0, 15], sizes = [64, 1], strides = [1, 1]} : vector<64x256xf32> to vector<64x1xf32>
    %90 = vector.extract_strided_slice %67 {offsets = [0, 240], sizes = [64, 1], strides = [1, 1]} : vector<64x256xf32> to vector<64x1xf32>
    %91 = vector.extract_strided_slice %67 {offsets = [0, 255], sizes = [64, 1], strides = [1, 1]} : vector<64x256xf32> to vector<64x1xf32>
    %92 = arith.subf %69, %75 : vector<64x1xf32>
    %93 = arith.subf %92, %87 : vector<64x1xf32>
    %94 = arith.addf %93, %91 : vector<64x1xf32>
    %95 = arith.subf %69, %75 : vector<64x1xf32>
    %96 = arith.subf %69, %75 : vector<64x1xf32>
    %97 = arith.subf %96, %81 : vector<64x1xf32>
    %98 = arith.addf %97, %90 : vector<64x1xf32>
    %99 = arith.subf %69, %87 : vector<64x1xf32>
    %100 = arith.subf %69, %81 : vector<64x1xf32>
    %101 = arith.subf %69, %72 : vector<64x1xf32>
    %102 = arith.subf %101, %87 : vector<64x1xf32>
    %103 = arith.addf %102, %89 : vector<64x1xf32>
    %104 = arith.subf %69, %72 : vector<64x1xf32>
    %105 = arith.subf %69, %72 : vector<64x1xf32>
    %106 = arith.subf %105, %81 : vector<64x1xf32>
    %107 = arith.addf %106, %88 : vector<64x1xf32>
    %108 = tpu.concatenate %94, %95, %98, %99, %69, %100, %103, %104, %107 in 0 : vector<64x1xf32>, vector<64x1xf32>, vector<64x1xf32>, vector<64x1xf32>, vector<64x1xf32>, vector<64x1xf32>, vector<64x1xf32>, vector<64x1xf32>, vector<64x1xf32> -> vector<576x1xf32>
    %c0_30 = arith.constant 0 : index
    %c0_31 = arith.constant 0 : index
    %109 = vector.load %arg3[%c0_30, %c0_31] : memref<32x576xf32, #tpu.memory_space<vmem>>, vector<32x576xf32>
    %cst_32 = arith.constant dense<0.000000e+00> : vector<32x1xf32>
    %110 = tpu.matmul %109, %108, %cst_32 {dimension_numbers = #tpu.dot_dimension_numbers<[1], [0], [0], [1], [0, 0, 1, 1], [], []>} : vector<32x576xf32>, vector<576x1xf32>, vector<32x1xf32> -> vector<32x1xf32>
    %cst_33 = arith.constant 3.906250e-03 : f32
    %111 = vector.broadcast %cst_33 : f32 to vector<32x1xf32>
    %112 = arith.mulf %110, %111 : vector<32x1xf32>
    %c0_34 = arith.constant 0 : index
    %c0_35 = arith.constant 0 : index
    %113 = vector.load %arg4[%c0_34, %c0_35] : memref<32x1xf32, #tpu.memory_space<vmem>>, vector<32x1xf32>
    %114 = arith.addf %112, %113 : vector<32x1xf32>
    %115 = tpu.concatenate %65, %114 in 0 : vector<32x1xf32>, vector<32x1xf32> -> vector<64x1xf32>
    %c0_36 = arith.constant 0 : index
    %c0_37 = arith.constant 0 : index
    %116 = vector.load %arg5[%c0_36, %c0_37] : memref<1024x64xf32, #tpu.memory_space<vmem>>, vector<1024x64xf32>
    %cst_38 = arith.constant dense<0.000000e+00> : vector<1024x1xf32>
    %117 = tpu.matmul %116, %115, %cst_38 {dimension_numbers = #tpu.dot_dimension_numbers<[1], [0], [0], [1], [0, 0, 1, 1], [], []>} : vector<1024x64xf32>, vector<64x1xf32>, vector<1024x1xf32> -> vector<1024x1xf32>
    %c0_39 = arith.constant 0 : index
    %c0_40 = arith.constant 0 : index
    %118 = vector.load %arg6[%c0_39, %c0_40] : memref<1024x1xf32, #tpu.memory_space<vmem>>, vector<1024x1xf32>
    %119 = arith.addf %117, %118 : vector<1024x1xf32>
    %c0_41 = arith.constant 0 : index
    %c0_42 = arith.constant 0 : index
    %c0_43 = arith.constant 0 : index
    %120 = vector.load %arg7[%c0_41, %c0_42, %c0_43] : memref<1x1024x1xf32, #tpu.memory_space<vmem>>, vector<1x1024x1xf32>
    %121 = vector.shape_cast %120 : vector<1x1024x1xf32> to vector<1024x1xf32>
    %122 = vector.shape_cast %119 : vector<1024x1xf32> to vector<1x1024x1xf32>
    tpu.vector_store %arg7[%c0_41, %c0_42, %c0_43], %122 {strides = array<i32>} : memref<1x1024x1xf32, #tpu.memory_space<vmem>>, vector<1x1024x1xf32>,
    return
  }
  func.func @transform_0(%arg0: i32) -> (i32, i32, i32) {
    %c0_i32 = arith.constant 0 : i32
    %c0_i32_0 = arith.constant 0 : i32
    %c0_i32_1 = arith.constant 0 : i32
    return %arg0, %c0_i32, %c0_i32_0 : i32, i32, i32
  }
  func.func @transform_1(%arg0: i32) -> (i32, i32, i32) {
    %c0_i32 = arith.constant 0 : i32
    %c0_i32_0 = arith.constant 0 : i32
    %c0_i32_1 = arith.constant 0 : i32
    return %arg0, %c0_i32, %c0_i32_0 : i32, i32, i32
  }
  func.func @transform_2(%arg0: i32) -> (i32, i32) {
    %c0_i32 = arith.constant 0 : i32
    %c0_i32_0 = arith.constant 0 : i32
    %c0_i32_1 = arith.constant 0 : i32
    return %c0_i32, %c0_i32_0 : i32, i32
  }
  func.func @transform_3(%arg0: i32) -> (i32, i32) {
    %c0_i32 = arith.constant 0 : i32
    %c0_i32_0 = arith.constant 0 : i32
    %c0_i32_1 = arith.constant 0 : i32
    return %c0_i32, %c0_i32_0 : i32, i32
  }
  func.func @transform_4(%arg0: i32) -> (i32, i32) {
    %c0_i32 = arith.constant 0 : i32
    %c0_i32_0 = arith.constant 0 : i32
    %c0_i32_1 = arith.constant 0 : i32
    return %c0_i32, %c0_i32_0 : i32, i32
  }
  func.func @transform_5(%arg0: i32) -> (i32, i32) {
    %c0_i32 = arith.constant 0 : i32
    %c0_i32_0 = arith.constant 0 : i32
    %c0_i32_1 = arith.constant 0 : i32
    return %c0_i32, %c0_i32_0 : i32, i32
  }
  func.func @transform_6(%arg0: i32) -> (i32, i32, i32) {
    %c0_i32 = arith.constant 0 : i32
    %c0_i32_0 = arith.constant 0 : i32
    %c0_i32_1 = arith.constant 0 : i32
    return %arg0, %c0_i32, %c0_i32_0 : i32, i32, i32
  }
}

</mosaic_0001>

<bundles_post_ra>
// kernel: tpu_custom_call.1
= control target key start
LH: loop header
LB: loop body
LE: loop exit
PB: predicated region body
PF: predicated region fallthrough
CT: control target
= control target key end

     0   :  { %s3878_s21 = smov 0   ;;  %s6500_s0 = inlined_call_operand.vmem [shape: f32[2,64,256], index: 0, kind: input, shape index: {}]   ;;  %s6501_s1 = inlined_call_operand.vmem [shape: f32[2,64,256], index: 1, kind: input, shape index: {}]   ;;  %s6502_s2 = inlined_call_operand.vmem [shape: f32[32,576], index: 2, kind: input, shape index: {}]   ;;  %s6503_s3 = inlined_call_operand.vmem [shape: f32[32,1], index: 3, kind: input, shape index: {}]   ;;  %s6504_s4 = inlined_call_operand.vmem [shape: f32[1024,64], index: 4, kind: input, shape index: {}]   ;;  %s6505_s5 = inlined_call_operand.vmem [shape: f32[1024,1], index: 5, kind: input, shape index: {}]   ;;  %s6506_s6 = inlined_call_operand.vmem [shape: f32[2,1024,1], index: 6, kind: output, shape index: {}]  }
   0x1 LB: > { %s3148_s22 = sadd.s32 4294967295, %s3836_s21   ;;  %p3152_p0 = scmp.ge.s32.totalorder %s3836_s21, 1  ;;  %s3836_s21 = sphi %s3878_s21, %s16_s21  }
   0x2   : > { %p222_p1 = scmp.lt.s32.totalorder %s3836_s21, 3 }
   0x4   : > { %p223_p2 = pnand %p3152_p0, %p222_p1 }
   0x6   : > { %226 = sbr.rel (%p223_p2) target bundleno = 1589 (0x635), region = 44 }
   0xb   : > { %p257_p3 = scmp.lt.s32.totalorder %s3148_s22, 1  ;;  %vm339_vm0 = vcmask 130048   ;;  %s3838_s27 = smov 16   ;;  %v272_v50 = vlaneseq  ;;  %vm956_vm5 = vcmask 523264   ;;  %vm2952_vm6 = vcmask 7168  }
   0xc   : > { %s3839_s7 = smov 15   ;;  %s3840_s8 = smov 1  }
   0xd   : > { %s6706_s22 = smov (!%p257_p3, %s3148_s22), 1  ;;  %v273_v51 = vand.u32 127, %v272_v50  ;;  %s3841_s9 = smov 112  }
   0xe   : > { %s3297_s23 = sshll.u32 %s6706_s22, 7  ;;  %s3842_s10 = smov 127  }
   0xf   : > { %s3894_s26 = scalar_lea.vmem %s6500_s0, %s3297_s23  ;;  %v274_v56 = vadd.s32 128, %v273_v51  ;;  %v279_v59 = vand.u32 15, %v273_v51  ;;  %s4137_s30 = scalar_lea.vmem %s6501_s1, %s3297_s23 }
  0x10   : > { %v3897_v0 = vld [vmem:[%s3894_s26 + $0x40] sm:$0xff]  ;;  %v3900_v1 = vld [vmem:[%s3894_s26 + $0x48] sm:$0xff]  ;;  %v3921_v9 = vld [vmem:[%s3894_s26 + $0x50] sm:$0xff]  ;;  %s3299_s15 = sshll.u32 %s6706_s22, 10 }
  0x11   : > { %6571 = vst [vmem:[#allocation2_spill] sm:$0xff] %v3897_v0  ;;  %v3903_v2 = vld [vmem:[%s3894_s26 + $0x20] sm:$0xff]  ;;  %v327_v3 = vadd.f32 %v3900_v1, %v3897_v0  ;;  %v3908_v4 = vld [vmem:[%s3894_s26 + $0x28] sm:$0xff]  ;;  %v3924_v10 = vld [vmem:[%s3894_s26 + $0x58] sm:$0xff]  ;;  %v355_v29 = vsel %vm339_vm0, %v3921_v9, 0.0  ;;  %v352_v30 = vsel %vm339_vm0, %v3897_v0, 0.0 }
  0x12   : > { %v3911_v5 = vld [vmem:[%s3894_s26] sm:$0xff]  ;;  %v3914_v6 = vld [vmem:[%s3894_s26 + $0x8] sm:$0xff]  ;;  %v321_v7 = vadd.f32 %v3908_v4, %v3903_v2  ;;  %v3927_v11 = vld [vmem:[%s3894_s26 + $0x30] sm:$0xff]  ;;  %v330_v15 = vadd.f32 %v3924_v10, %v3921_v9  ;;  %v346_v26 = vsel %vm339_vm0, %v3903_v2, 0.0  ;;  %v286_v60 = vand.u32 15, %v274_v56 }
  0x13   : > { %v315_v8 = vadd.f32 %v3914_v6, %v3911_v5  ;;  %328 = vadd.xlane.f32.xlu2 %v327_v3  ;;  %v3930_v12 = vld [vmem:[%s3894_s26 + $0x38] sm:$0xff]  ;;  %v3933_v13 = vld [vmem:[%s3894_s26 + $0x10] sm:$0xff]  ;;  %v3951_v20 = vld [vmem:[%s3894_s26 + $0x60] sm:$0xff]  ;;  %v340_v23 = vsel %vm339_vm0, %v3911_v5, 0.0  ;;  %v349_v25 = vsel %vm339_vm0, %v3927_v11, 0.0  ;;  %vm4029_vm1 = vcmp.eq.s32.totalorder %v279_v59, 0 }
  0x14   : > { %322 = vadd.xlane.f32.xlu1 %v321_v7  ;;  %v3936_v14 = vld [vmem:[%s3894_s26 + $0x18] sm:$0xff]  ;;  %v324_v16 = vadd.f32 %v3930_v12, %v3927_v11  ;;  %v3945_v18 = vld [vmem:[%s3894_s26 + $0x70] sm:$0xff]  ;;  %v3954_v21 = vld [vmem:[%s3894_s26 + $0x68] sm:$0xff]  ;;  %v343_v27 = vsel %vm339_vm0, %v3933_v13, 0.0  ;;  %v358_v28 = vsel %vm339_vm0, %v3951_v20, 0.0  ;;  %vm4033_vm2 = vcmp.eq.s32.totalorder %v286_v60, 0 }
  0x15   : > { %316 = vadd.xlane.f32.xlu0 %v315_v8  ;;  %v318_v17 = vadd.f32 %v3936_v14, %v3933_v13  ;;  %v3948_v19 = vld [vmem:[%s3894_s26 + $0x78] sm:$0xff]  ;;  %v333_v24 = vadd.f32 %v3954_v21, %v3951_v20  ;;  %v361_v31 = vsel %vm339_vm0, %v3945_v18, 0.0  ;;  %v432_v51 = vsel %vm4029_vm1, %v3921_v9, 0.0 }
  0x16   : > { %v336_v22 = vadd.f32 %v3948_v19, %v3945_v18  ;;  %vm4082_vm3 = vcmp.eq.s32.totalorder %v279_v59, 15  ;;  %vm4086_vm4 = vcmp.eq.s32.totalorder %v286_v60, 15  ;;  %v436_v59 = vsel %vm4029_vm1, %v3945_v18, 0.0 }
  0x17   : > { %v437_v60 = vsel %vm4033_vm2, %v3948_v19, 0.0 }
  0x1b   : > { %331 = vadd.xlane.f32.xlu2 %v330_v15 }
  0x1c   : > { %325 = vadd.xlane.f32.xlu1 %v324_v16  ;;  %v422_v16 = vsel %vm4029_vm1, %v3911_v5, 0.0 }
  0x1d   : > { %319 = vadd.xlane.f32.xlu0 %v318_v17  ;;  %v423_v17 = vsel %vm4033_vm2, %v3914_v6, 0.0 }
  0x23   : > { %341 = vadd.xlane.f32.xlu2 %v340_v23 }
  0x24   : > { %337 = vadd.xlane.f32.xlu1 %v336_v22 }
  0x25   : > { %334 = vadd.xlane.f32.xlu0 %v333_v24 }
  0x2b   : > { %350 = vadd.xlane.f32.xlu2 %v349_v25  ;;  %v438_v25 = vadd.f32 %v423_v17, %v422_v16  ;;  %v459_v17 = vadd.f32 %v437_v60, %v436_v59 }
  0x2c   : > { %347 = vadd.xlane.f32.xlu1 %v346_v26  ;;  %v426_v26 = vsel %vm4029_vm1, %v3903_v2, 0.0 }
  0x2d   : > { %344 = vadd.xlane.f32.xlu0 %v343_v27  ;;  %v427_v27 = vsel %vm4033_vm2, %v3908_v4, 0.0 }
  0x33   : > { %359 = vadd.xlane.f32.xlu2 %v358_v28  ;;  %v424_v28 = vsel %vm4029_vm1, %v3933_v13, 0.0 }
  0x34   : > { %356 = vadd.xlane.f32.xlu1 %v355_v29  ;;  %v425_v29 = vsel %vm4033_vm2, %v3936_v14, 0.0 }
  0x35   : > { %353 = vadd.xlane.f32.xlu0 %v352_v30  ;;  %v444_v30 = vadd.f32 %v427_v27, %v426_v26  ;;  %v471_v26 = vsel %vm4086_vm4, %v3930_v12, 0.0  ;;  %v468_v27 = vsel %vm4082_vm3, %v3903_v2, 0.0  ;;  %v474_v2 = vsel %vm4082_vm3, %v3921_v9, 0.0 }
  0x3d   : > { %362 = vadd.xlane.f32.xlu0 %v361_v31  ;;  %v441_v31 = vadd.f32 %v425_v29, %v424_v28  ;;  %v469_v28 = vsel %vm4086_vm4, %v3908_v4, 0.0 }
  0x4b   : > { %374 = vrot.lane.b32.xlu2 %v3936_v14, %s3838_s27 }
  0x4d   : > { %372 = vrot.lane.b32.xlu1 %v3914_v6, %s3838_s27 }
  0x51   : > { %376 = vrot.lane.b32.xlu0 %v3908_v4, %s3838_s27 }
  0x53   : > { %378 = vrot.lane.b32.xlu2 %v3930_v12, %s3838_s27 }
  0x55   : > { %380 = vrot.lane.b32.xlu1 %v3900_v1, %s3838_s27 }
  0x59   : > { %382 = vrot.lane.b32.xlu0 %v3924_v10, %s3838_s27 }
  0x5b   : > { %384 = vrot.lane.b32.xlu2 %v3954_v21, %s3838_s27 }
  0x5d   : > { %386 = vrot.lane.b32.xlu1 %v3948_v19, %s3838_s27 }
  0x86   : > { %v3992_v32 = vpop.xlane.xlu2 %328 }
  0x87   : > { %6572 = vst [vmem:[#allocation3_spill] sm:$0xff] %v3992_v32  ;;  %v3998_v35 = vpop.xlane.xlu1 %322 }
  0x88   : > { %v3994_v33 = vpop.xlane.xlu0 %316  ;;  %6575 = vst [vmem:[#allocation6_spill] sm:$0xff] %v3998_v35 }
  0x89   : > { %6573 = vst [vmem:[#allocation4_spill] sm:$0xff] %v3994_v33 }
  0x8e   : > { %v3996_v34 = vpop.xlane.xlu2 %331 }
  0x8f   : > { %6574 = vst [vmem:[#allocation5_spill] sm:$0xff] %v3996_v34  ;;  %v4004_v38 = vpop.xlane.xlu1 %325 }
  0x90   : > { %v4000_v36 = vpop.xlane.xlu0 %319  ;;  %6577 = vst [vmem:[#allocation8_spill] sm:$0xff] %v4004_v38 }
  0x91   : > { %6576 = vst [vmem:[#allocation7_spill] sm:$0xff] %v4000_v36 }
  0x96   : > { %v4002_v37 = vpop.xlane.xlu2 %341 }
  0x97   : > { %v4010_v41 = vpop.xlane.xlu1 %337 }
  0x98   : > { %v4006_v39 = vpop.xlane.xlu0 %334 }
  0x9e   : > { %v4008_v40 = vpop.xlane.xlu2 %350 }
  0x9f   : > { %6578 = vst [vmem:[#allocation9_spill] sm:$0xff] %v4008_v40  ;;  %v4016_v44 = vpop.xlane.xlu1 %347 }
  0xa0   : > { %v4012_v42 = vpop.xlane.xlu0 %344  ;;  %6579 = vst [vmem:[#allocation10_spill] sm:$0xff] %v4016_v44 }
  0xa6   : > { %v4014_v43 = vpop.xlane.xlu2 %359 }
  0xa7   : > { %v4021_v48 = vpop.xlane.xlu1 %356 }
  0xa8   : > { %v4019_v47 = vpop.xlane.xlu0 %353 }
  0xae   : > { %v375_v45 = vpop.permute.xlu2 %374 }
  0xaf   : > { %v399_v46 = vsel %vm339_vm0, %v375_v45, 0.0  ;;  %v428_v45 = vsel %vm4029_vm1, %v3927_v11, 0.0 }
  0xb0   : > { %400 = vadd.xlane.f32.xlu2 %v399_v46  ;;  %v4023_v49 = vpop.xlane.xlu0 %362  ;;  %v429_v46 = vsel %vm4033_vm2, %v3930_v12, 0.0 }
  0xb1   : > { %v447_v50 = vadd.f32 %v429_v46, %v428_v45  ;;  %v475_v46 = vsel %vm4086_vm4, %v3924_v10, 0.0 }
  0xb6   : > { %v379_v54 = vpop.permute.xlu2 %378 }
  0xb7   : > { %v405_v58 = vsel %vm339_vm0, %v379_v54, 0.0  ;;  %v431_v54 = vsel %vm4033_vm2, %v3900_v1, 0.0 }
  0xbe   : > { %v385_v15 = vpop.permute.xlu2 %384 }
  0xbf   : > { %v373_v52 = vpop.permute.xlu1 %372  ;;  %v414_v22 = vsel %vm339_vm0, %v385_v15, 0.0  ;;  %v465_v15 = vsel %vm4086_vm4, %v3914_v6, 0.0 }
  0xc0   : > { %v396_v53 = vsel %vm339_vm0, %v373_v52, 0.0  ;;  %v433_v52 = vsel %vm4033_vm2, %v3924_v10, 0.0 }
  0xc1   : > { %397 = vadd.xlane.f32.xlu0 %v396_v53  ;;  %v430_v53 = vsel %vm4029_vm1, %v3897_v0, 0.0 }
  0xc2   : > { %v450_v56 = vadd.f32 %v431_v54, %v430_v53  ;;  %v4148_v53 = vld [vmem:[%s4137_s30 + $0x58] sm:$0xff]  ;;  %v4155_v54 = vld [vmem:[%s4137_s30 + $0x48] sm:$0xff] }
  0xc3   : > { %v377_v55 = vpop.permute.xlu0 %376 }
  0xc4   : > { %v402_v57 = vsel %vm339_vm0, %v377_v55, 0.0  ;;  %v453_v55 = vadd.f32 %v433_v52, %v432_v51  ;;  %v4140_v51 = vld [vmem:[%s4137_s30 + $0x78] sm:$0xff]  ;;  %v4145_v52 = vld [vmem:[%s4137_s30 + $0x68] sm:$0xff] }
  0xc5   : > { %403 = vadd.xlane.f32.xlu1 %v402_v57  ;;  %v434_v57 = vsel %vm4029_vm1, %v3951_v20, 0.0 }
  0xc7   : > { %v381_v61 = vpop.permute.xlu1 %380 }
  0xc8   : > { %v408_v62 = vsel %vm339_vm0, %v381_v61, 0.0  ;;  %v3819_v61 = vld [vmem:[%s3894_s26 + $0x58] sm:$0xff] }
  0xc9   : > { %409 = vadd.xlane.f32.xlu2 %v408_v62  ;;  %406 = vadd.xlane.f32.xlu0 %v405_v58  ;;  %v435_v58 = vsel %vm4033_vm2, %v3954_v21, 0.0 }
  0xcb   : > { %v383_v63 = vpop.permute.xlu0 %382 }
  0xcc   : > { %v411_v8 = vsel %vm339_vm0, %v383_v63, 0.0  ;;  %v456_v63 = vadd.f32 %v435_v58, %v434_v57  ;;  %v4170_v57 = vld [vmem:[%s4137_s30 + $0x18] sm:$0xff]  ;;  %v478_v58 = vsel %vm4082_vm3, %v3945_v18, 0.0 }
  0xcd   : > { %412 = vadd.xlane.f32.xlu1 %v411_v8  ;;  %v464_v8 = vsel %vm4082_vm3, %v3911_v5, 0.0 }
  0xce   : > { %v480_v16 = vadd.f32 %v465_v15, %v464_v8 }
  0xcf   : > { %v387_v23 = vpop.permute.xlu1 %386 }
  0xd0   : > { %v417_v24 = vsel %vm339_vm0, %v387_v23, 0.0  ;;  %v467_v23 = vsel %vm4086_vm4, %v3936_v14, 0.0 }
  0xd1   : > { %418 = vadd.xlane.f32.xlu2 %v417_v24  ;;  %415 = vadd.xlane.f32.xlu0 %v414_v22  ;;  %v466_v22 = vsel %vm4082_vm3, %v3933_v13, 0.0 }
  0xd2   : > { %v483_v24 = vadd.f32 %v467_v23, %v466_v22  ;;  %v4187_v22 = vld [vmem:[%s4137_s30 + $0x8] sm:$0xff] }
  0xd5   : > { %439 = vadd.xlane.f32.xlu1 %v438_v25  ;;  %v470_v25 = vsel %vm4082_vm3, %v3927_v11, 0.0  ;;  %v472_v11 = vsel %vm4082_vm3, %v3897_v0, 0.0 }
  0xd6   : > { %v489_v29 = vadd.f32 %v471_v26, %v470_v25 }
  0xd9   : > { %445 = vadd.xlane.f32.xlu2 %v444_v30  ;;  %442 = vadd.xlane.f32.xlu0 %v441_v31  ;;  %v486_v30 = vadd.f32 %v469_v28, %v468_v27  ;;  %v473_v31 = vsel %vm4086_vm4, %v3900_v1, 0.0 }
  0xda   : > { %v492_v45 = vadd.f32 %v473_v31, %v472_v11 }
  0xdd   : > { %448 = vadd.xlane.f32.xlu1 %v447_v50  ;;  %v495_v50 = vadd.f32 %v475_v46, %v474_v2  ;;  %v4207_v46 = vsub.f32 %v3992_v32, %v4019_v47 }
  0xe1   : > { %454 = vadd.xlane.f32.xlu2 %v453_v55  ;;  %451 = vadd.xlane.f32.xlu0 %v450_v56  ;;  %v4160_v55 = vld [vmem:[%s4137_s30 + $0x28] sm:$0xff]  ;;  %v4165_v56 = vld [vmem:[%s4137_s30 + $0x38] sm:$0xff] }
  0xe2   : > { %6588 = vst [vmem:[#allocation11_spill] sm:$0xff] %v4160_v55 }
  0xe3   : > { %6589 = vst [vmem:[#allocation12_spill] sm:$0xff] %v4165_v56 }
  0xe5   : > { %457 = vadd.xlane.f32.xlu1 %v456_v63  ;;  %v479_v63 = vsel %vm4086_vm4, %v3948_v19, 0.0 }
  0xe6   : > { %v501_v59 = vadd.f32 %v479_v63, %v478_v58 }
  0xe9   : > { %481 = vadd.xlane.f32.xlu2 %v480_v16  ;;  %460 = vadd.xlane.f32.xlu0 %v459_v17  ;;  %v476_v16 = vsel %vm4082_vm3, %v3951_v20, 0.0  ;;  %v477_v17 = vsel %vm4086_vm4, %v3954_v21, 0.0 }
  0xea   : > { %v498_v23 = vadd.f32 %v477_v17, %v476_v16  ;;  %v4221_v16 = vsub.f32 %v3996_v34, %v4021_v48 }
  0xed   : > { %484 = vadd.xlane.f32.xlu1 %v483_v24 }
  0xf1   : > { %490 = vadd.xlane.f32.xlu2 %v489_v29  ;;  %487 = vadd.xlane.f32.xlu0 %v486_v30 }
  0xf5   : > { %493 = vadd.xlane.f32.xlu1 %v492_v45 }
  0xf9   : > { %496 = vadd.xlane.f32.xlu0 %v495_v50 }
 0x109   : > { %1212 = vrot.lane.b32.xlu2 %v4140_v51, %s3838_s27 }
 0x10d   : > { %1208 = vrot.lane.b32.xlu0 %v4148_v53, %s3838_s27 }
 0x10e   : > { %1210 = vrot.lane.b32.xlu1 %v4145_v52, %s3838_s27 }
 0x111   : > { %1206 = vrot.lane.b32.xlu2 %v4155_v54, %s3838_s27 }
 0x115   : > { %1204 = vrot.lane.b32.xlu0 %v4165_v56, %s3838_s27 }
 0x116   : > { %1202 = vrot.lane.b32.xlu1 %v4160_v55, %s3838_s27 }
 0x11d   : > { %1200 = vrot.lane.b32.xlu0 %v4170_v57, %s3838_s27 }
 0x123   : > { %v401_v8 = vpop.xlane.xlu2 %400 }
 0x125   : > { %1198 = vrot.lane.b32.xlu0 %v4187_v22, %s3838_s27  ;;  %s5619_s27 = scalar_lea.vmem %s6506_s6, %s3299_s15 }
 0x134   : > { %v398_v15 = vpop.xlane.xlu0 %397 }
 0x135   : > { %v4247_v40 = vsub.f32 %v3994_v33, %v398_v15 }
 0x138   : > { %v404_v60 = vpop.xlane.xlu1 %403 }
 0x139   : > { %v4198_v31 = vsub.f32 %v3998_v35, %v404_v60 }
 0x13a   : > { %502 = vadd.xlane.f32.xlu2 %v501_v59 }
 0x13c   : > { %v410_v24 = vpop.xlane.xlu2 %409  ;;  %v407_v25 = vpop.xlane.xlu0 %406 }
 0x13d   : > { %v4201_v45 = vsub.f32 %v4004_v38, %v407_v25 }
 0x140   : > { %499 = vadd.xlane.f32.xlu1 %v498_v23  ;;  %v413_v26 = vpop.xlane.xlu1 %412 }
 0x144   : > { %v419_v27 = vpop.xlane.xlu2 %418  ;;  %v416_v28 = vpop.xlane.xlu0 %415 }
 0x148   : > { %v4191_v29 = vpop.xlane.xlu1 %439 }
 0x149   : > { %6590 = vst [vmem:[#allocation13_spill] sm:$0xff] %v4191_v29 }
 0x14c   : > { %v4193_v30 = vpop.xlane.xlu2 %445  ;;  %v4195_v11 = vpop.xlane.xlu0 %442 }
 0x14d   : > { %6591 = vst [vmem:[#allocation14_spill] sm:$0xff] %v4193_v30  ;;  %v530_v50 = vsub.f32 %v4198_v31, %v4193_v30 }
 0x14e   : > { %6592 = vst [vmem:[#allocation15_spill] sm:$0xff] %v4195_v11 }
 0x14f   : > { %v538_v23 = vadd.f32 %v530_v50, %v3908_v4  ;;  %v4242_v50 = vsub.f32 %v4006_v39, %v416_v28 }
 0x150   : > { %v4203_v2 = vpop.xlane.xlu1 %448 }
 0x151   : > { %6593 = vst [vmem:[#allocation16_spill] sm:$0xff] %v4203_v2  ;;  %v531_v58 = vsub.f32 %v4201_v45, %v4203_v2  ;;  %v555_v63 = vsub.f32 %v4004_v38, %v4203_v2 }
 0x153   : > { %v539_v59 = vadd.f32 %v531_v58, %v3930_v12  ;;  %v4217_v60 = vpack.i.bf16 %v4207_v46, %v555_v63 }
 0x154   : > { %v4223_v47 = vpop.xlane.xlu2 %454  ;;  %v4225_v17 = vpop.xlane.xlu0 %451 }
 0x155   : > { %6594 = vst [vmem:[#allocation17_spill] sm:$0xff] %v4217_v60  ;;  %v589_v25 = vsub.f32 %v4221_v16, %v4223_v47  ;;  %v588_v30 = vsub.f32 %v4207_v46, %v4225_v17  ;;  %v3347_v58 = vpack.i.bf16 %v538_v23, %v539_v59  ;;  %v4250_v59 = vsub.f32 %v4010_v41, %v419_v27 }
 0x156   : > { %6595 = vst [vmem:[#allocation18_spill] sm:$0xff] %v4223_v47  ;;  %v4268_v27 = vsub.f32 %v4000_v36, %v4012_v42  ;;  %v4271_v60 = vsub.f32 %v4000_v36, %v401_v8 }
 0x157   : > { %6596 = vst [vmem:[#allocation19_spill] sm:$0xff] %v4225_v17  ;;  %v4235_v63 = vadd.f32 %v589_v25, %v3921_v9  ;;  %v4239_v48 = vadd.f32 %v588_v30, %v3897_v0  ;;  %v4256_v25 = vsub.f32 %v3994_v33, %v4002_v37  ;;  %v3357_v7 = vpack.i.bf16 %v4242_v50, %v4250_v59 }
 0x158   : > { %v4232_v2 = vpop.xlane.xlu1 %457  ;;  %6600 = vst [vmem:[#allocation23_spill] sm:$0xff] %v4268_v27 }
 0x159   : > { %6597 = vst [vmem:[#allocation20_spill] sm:$0xff] %v4235_v63  ;;  %3348 = vrot.lane.b32.xlu1 %v3347_v58, %s3839_s7  ;;  %v534_v23 = vsub.f32 %v4242_v50, %v4232_v2  ;;  %v4276_v63 = vsub.f32 %v3992_v32, %v410_v24 }
 0x15a   : > { %6598 = vst [vmem:[#allocation21_spill] sm:$0xff] %v4239_v48  ;;  %v4279_v48 = vsub.f32 %v3996_v34, %v413_v26 }
 0x15b   : > { %6599 = vst [vmem:[#allocation22_spill] sm:$0xff] %v4256_v25  ;;  %v542_v58 = vadd.f32 %v534_v23, %v3954_v21  ;;  %v532_v24 = vsub.f32 %v4276_v63, %v4225_v17 }
 0x15c   : > { %v4258_v30 = vpop.xlane.xlu2 %481  ;;  %v4260_v28 = vpop.xlane.xlu0 %460  ;;  %6601 = vst [vmem:[#allocation24_spill] sm:$0xff] %v4276_v63 }
 0x15d   : > { %v535_v15 = vsub.f32 %v4250_v59, %v4260_v28  ;;  %v568_v37 = vsub.f32 %v4256_v25, %v4258_v30  ;;  %v533_v25 = vsub.f32 %v4279_v48, %v4223_v47  ;;  %v4359_v47 = vld [vmem:[%s4137_s30 + $0x30] sm:$0xff] }
 0x15e   : > { %6606 = vst [vmem:[#allocation29_spill] sm:$0xff] %v4359_v47 }
 0x15f   : > { %v543_v44 = vadd.f32 %v535_v15, %v3948_v19  ;;  %v4294_v34 = vadd.f32 %v568_v37, %v3911_v5  ;;  %v540_v5 = vadd.f32 %v532_v24, %v3900_v1 }
 0x160   : > { %v4282_v35 = vpop.xlane.xlu1 %484 }
 0x161   : > { %v569_v8 = vsub.f32 %v4268_v27, %v4282_v35  ;;  %v3337_v26 = vpack.i.bf16 %v542_v58, %v543_v44  ;;  %6602 = vst [vmem:[#allocation25_spill] sm:$0xff] %v4294_v34 }
 0x163   : > { %v4297_v23 = vadd.f32 %v569_v8, %v3933_v13  ;;  %3338 = vrot.lane.b32.xlu0 %v3337_v26, %s3839_s7  ;;  %v541_v13 = vadd.f32 %v533_v25, %v3924_v10  ;;  %v4323_v10 = vld [vmem:[%s4137_s30 + $0x60] sm:$0xff] }
 0x164   : > { %v4300_v15 = vpop.xlane.xlu2 %490  ;;  %v1160_v25 = vadd.f32 %v4145_v52, %v4323_v10  ;;  %v4327_v24 = vpop.xlane.xlu0 %487 }
 0x165   : > { %6603 = vst [vmem:[#allocation26_spill] sm:$0xff] %v4297_v23  ;;  %v547_v44 = vsub.f32 %v4004_v38, %v4300_v15  ;;  %v3342_v26 = vpack.i.bf16 %v540_v5, %v541_v13 }
 0x167   : > { %v4313_v37 = vpack.i.bf16 %v4271_v60, %v547_v44  ;;  %v4330_v44 = vld [vmem:[%s4137_s30 + $0x50] sm:$0xff] }
 0x168   : > { %v4310_v58 = vpop.xlane.xlu1 %493  ;;  %v1157_v5 = vadd.f32 %v4148_v53, %v4330_v44 }
 0x169   : > { %6604 = vst [vmem:[#allocation27_spill] sm:$0xff] %v4313_v37  ;;  %v548_v8 = vsub.f32 %v3992_v32, %v4310_v58 }
 0x16b   : > { %v4318_v42 = vpack.i.bf16 %v4198_v31, %v548_v8  ;;  %3343 = vrot.lane.b32.xlu0 %v3342_v26, %s3839_s7  ;;  %v4335_v8 = vld [vmem:[%s4137_s30 + $0x70] sm:$0xff] }
 0x16c   : > { %v1213_v27 = vpop.permute.xlu2 %1212  ;;  %v4347_v32 = vpop.xlane.xlu0 %496  ;;  %v1187_v37 = vsel %vm339_vm0, %v4335_v8, 0.0  ;;  %v1163_v38 = vadd.f32 %v4140_v51, %v4335_v8 }
 0x16d   : > { %6605 = vst [vmem:[#allocation28_spill] sm:$0xff] %v4318_v42  ;;  %v1243_v1 = vsel %vm339_vm0, %v1213_v27, 0.0  ;;  %v4339_v27 = vld [vmem:[%s4137_s30 + $0x40] sm:$0xff] }
 0x16e   : > { %1244 = vadd.xlane.f32.xlu2 %v1243_v1  ;;  %v1260_v1 = vsel %vm4029_vm1, %v4335_v8, 0.0  ;;  %v1254_v17 = vsel %vm4029_vm1, %v4339_v27, 0.0 }
 0x176   : > { %1161 = vadd.xlane.f32.xlu2 %v1160_v25  ;;  %v1261_v25 = vsel %vm4033_vm2, %v4140_v51, 0.0 }
 0x17f   : > { %v1209_v23 = vpop.permute.xlu0 %1208 }
 0x180   : > { %v1211_v13 = vpop.permute.xlu1 %1210  ;;  %v1237_v34 = vsel %vm339_vm0, %v1209_v23, 0.0 }
 0x181   : > { %v1240_v26 = vsel %vm339_vm0, %v1211_v13, 0.0  ;;  %v1255_v13 = vsel %vm4033_vm2, %v4155_v54, 0.0 }
 0x182   : > { %1241 = vadd.xlane.f32.xlu2 %v1240_v26  ;;  %v1283_v26 = vadd.f32 %v1261_v25, %v1260_v1  ;;  %v1253_v1 = vsel %vm4033_vm2, %v4165_v56, 0.0  ;;  %v1258_v25 = vsel %vm4029_vm1, %v4323_v10, 0.0 }
 0x183   : > { %1158 = vadd.xlane.f32.xlu1 %v1157_v5  ;;  %v1274_v5 = vadd.f32 %v1255_v13, %v1254_v17  ;;  %v1252_v17 = vsel %vm4029_vm1, %v4359_v47, 0.0 }
 0x184   : > { %v1271_v23 = vadd.f32 %v1253_v1, %v1252_v17  ;;  %v1154_v17 = vadd.f32 %v4155_v54, %v4339_v27  ;;  %v1207_v1 = vpop.permute.xlu2 %1206 }
 0x188   : > { %v1203_v63 = vpop.permute.xlu1 %1202 }
 0x18a   : > { %1284 = vadd.xlane.f32.xlu2 %v1283_v26  ;;  %v1184_v26 = vsel %vm339_vm0, %v4323_v10, 0.0 }
 0x18b   : > { %1275 = vadd.xlane.f32.xlu1 %v1274_v5  ;;  %v4380_v5 = vld [vmem:[%s4137_s30 + $0x20] sm:$0xff] }
 0x18c   : > { %6607 = vst [vmem:[#allocation30_spill] sm:$0xff] %v4380_v5  ;;  %v1148_v42 = vadd.f32 %v4160_v55, %v4380_v5 }
 0x192   : > { %1238 = vadd.xlane.f32.xlu2 %v1237_v34  ;;  %v1259_v34 = vsel %vm4033_vm2, %v4145_v52, 0.0 }
 0x193   : > { %1188 = vadd.xlane.f32.xlu1 %v1187_v37  ;;  %v1280_v13 = vadd.f32 %v1259_v34, %v1258_v25  ;;  %v529_v37 = vsub.f32 %v4271_v60, %v4195_v11  ;;  %v1251_v34 = vsel %vm4033_vm2, %v4160_v55, 0.0 }
 0x195   : > { %1164 = vadd.xlane.f32.xlu0 %v1163_v38  ;;  %v528_v38 = vsub.f32 %v4247_v40, %v4191_v29  ;;  %v537_v25 = vadd.f32 %v529_v37, %v3936_v14 }
 0x19b   : > { %1272 = vadd.xlane.f32.xlu1 %v1271_v23  ;;  %v1250_v23 = vsel %vm4029_vm1, %v4380_v5, 0.0 }
 0x19c   : > { %v1268_v11 = vadd.f32 %v1251_v34, %v1250_v23 }
 0x19d   : > { %1281 = vadd.xlane.f32.xlu0 %v1280_v13  ;;  %v536_v13 = vadd.f32 %v528_v38, %v3914_v6  ;;  %v1257_v38 = vsel %vm4033_vm2, %v4148_v53, 0.0 }
 0x19f   : > { %v3352_v29 = vpack.i.bf16 %v536_v13, %v537_v25 }
 0x1a3   : > { %1185 = vadd.xlane.f32.xlu1 %v1184_v26  ;;  %v1234_v26 = vsel %vm339_vm0, %v1207_v1, 0.0 }
 0x1a5   : > { %1155 = vadd.xlane.f32.xlu0 %v1154_v17  ;;  %v1256_v17 = vsel %vm4029_vm1, %v4330_v44, 0.0 }
 0x1a6   : > { %v1277_v25 = vadd.f32 %v1257_v38, %v1256_v17  ;;  %v1205_v38 = vpop.permute.xlu0 %1204 }
 0x1aa   : > { %3353 = vrot.lane.b32.xlu2 %v3352_v29, %s3839_s7  ;;  %v1181_v29 = vsel %vm339_vm0, %v4330_v44, 0.0 }
 0x1ab   : > { %1269 = vadd.xlane.f32.xlu1 %v1268_v11  ;;  %v545_v11 = vsub.f32 %v4000_v36, %v4282_v35  ;;  %v1299_v36 = vsel %vm4086_vm4, %v4145_v52, 0.0 }
 0x1ad   : > { %v4396_v37 = vpop.xlane.xlu2 %502  ;;  %1235 = vadd.xlane.f32.xlu0 %v1234_v26  ;;  %v1298_v26 = vsel %vm4082_vm3, %v4323_v10, 0.0 }
 0x1ae   : > { %v519_v0 = vsub.f32 %v4250_v59, %v4396_v37  ;;  %v1320_v17 = vadd.f32 %v1299_v36, %v1298_v26  ;;  %v1247_v36 = vsel %vm4033_vm2, %v4187_v22, 0.0  ;;  %v1295_v59 = vsel %vm4086_vm4, %v4155_v54, 0.0 }
 0x1b0   : > { %v527_v1 = vadd.f32 %v519_v0, %v3948_v19  ;;  %v544_v0 = vsub.f32 %v3994_v33, %v4258_v30  ;;  %v1201_v33 = vpop.permute.xlu0 %1200 }
 0x1b2   : > { %v4413_v34 = vpack.i.bf16 %v527_v1, %v545_v11  ;;  %v1231_v11 = vsel %vm339_vm0, %v1205_v38, 0.0  ;;  %v1178_v1 = vsel %vm339_vm0, %v4339_v27, 0.0 }
 0x1b3   : > { %v4411_v23 = vpop.xlane.xlu1 %499  ;;  %1182 = vadd.xlane.f32.xlu1 %v1181_v29 }
 0x1b4   : > { %6608 = vst [vmem:[#allocation31_spill] sm:$0xff] %v4413_v34  ;;  %v518_v13 = vsub.f32 %v4242_v50, %v4411_v23  ;;  %v4432_v34 = vld [vmem:[%s4137_s30] sm:$0xff]  ;;  %v1294_v50 = vsel %vm4082_vm3, %v4339_v27, 0.0 }
 0x1b5   : > { %1278 = vadd.xlane.f32.xlu0 %v1277_v25  ;;  %6610 = vst [vmem:[#allocation33_spill] sm:$0xff] %v4432_v34 }
 0x1b6   : > { %v526_v19 = vadd.f32 %v518_v13, %v3954_v21  ;;  %v1246_v21 = vsel %vm4029_vm1, %v4432_v34, 0.0  ;;  %v514_v13 = vsub.f32 %v4198_v31, %v4327_v24  ;;  %v1151_v31 = vadd.f32 %v4165_v56, %v4359_v47 }
 0x1b7   : > { %v1262_v25 = vadd.f32 %v1247_v36, %v1246_v21  ;;  %v4457_v21 = vld [vmem:[%s4137_s30 + $0x10] sm:$0xff]  ;;  %v551_v36 = vsub.f32 %v4010_v41, %v4396_v37 }
 0x1b8   : > { %v4426_v29 = vpack.i.bf16 %v526_v19, %v544_v0  ;;  %v6611_v0 = vsub.f32 %v4271_v60, %v4282_v35  ;;  %6613 = vst [vmem:[#allocation35_spill] sm:$0xff] %v4457_v21  ;;  %v1301_v35 = vsel %vm4086_vm4, %v4140_v51, 0.0 }
 0x1ba   : > { %6609 = vst [vmem:[#allocation32_spill] sm:$0xff] %v4426_v29  ;;  %v521_v19 = vadd.f32 %v6611_v0, %v3936_v14  ;;  %v1228_v29 = vsel %vm339_vm0, %v1203_v63, 0.0  ;;  %v1145_v14 = vadd.f32 %v4170_v57, %v4457_v21 }
 0x1bb   : > { %1321 = vadd.xlane.f32.xlu1 %v1320_v17 }
 0x1bd   : > { %1232 = vadd.xlane.f32.xlu0 %v1231_v11  ;;  %v522_v11 = vadd.f32 %v514_v13, %v3908_v4  ;;  %v1300_v4 = vsel %vm4082_vm3, %v4335_v8, 0.0  ;;  %v6614_v13 = vsub.f32 %v4201_v45, %v4300_v15 }
 0x1be   : > { %v1323_v63 = vadd.f32 %v1301_v35, %v1300_v4  ;;  %v4496_v35 = vsub.f32 %v4006_v39, %v4014_v43 }
 0x1c0   : > { %v574_v3 = vsub.f32 %v4496_v35, %v4411_v23 }
 0x1c2   : > { %v582_v43 = vadd.f32 %v574_v3, %v3951_v20  ;;  %v6617_v3 = vsub.f32 %v4247_v40, %v4258_v30 }
 0x1c3   : > { %1179 = vadd.xlane.f32.xlu1 %v1178_v1  ;;  %v1199_v1 = vpop.permute.xlu0 %1198 }
 0x1c5   : > { %1149 = vadd.xlane.f32.xlu0 %v1148_v42 }
 0x1cb   : > { %1263 = vadd.xlane.f32.xlu1 %v1262_v25  ;;  %v3349_v26 = vpop.permute.xlu1 %3348 }
 0x1cc   : > { %v3351_v17 = vunpack.i.h.bf16 %v3349_v26  ;;  %v3350_v38 = vunpack.i.l.bf16 %v3349_v26  ;;  %v523_v26 = vadd.f32 %v6614_v13, %v3930_v12  ;;  %v1248_v12 = vsel %vm4029_vm1, %v4457_v21, 0.0 }
 0x1cd   : > { %1229 = vadd.xlane.f32.xlu0 %v1228_v29  ;;  %v1225_v29 = vsel %vm339_vm0, %v1201_v33, 0.0 }
 0x1ce   : > { %v4450_v55 = vpack.i.bf16 %v3351_v17, %v521_v19  ;;  %v4452_v42 = vpack.i.bf16 %v3350_v38, %v522_v11  ;;  %v1222_v17 = vsel %vm339_vm0, %v1199_v1, 0.0  ;;  %v3367_v38 = vpack.i.bf16 %v4279_v48, %v551_v36 }
 0x1cf   : > { %v1142_v11 = vadd.f32 %v4187_v22, %v4432_v34 }
 0x1d0   : > { %6612 = vst [vmem:[#allocation34_spill] sm:$0xff] %v4450_v55 }
 0x1d3   : > { %1152 = vadd.xlane.f32.xlu2 %v1151_v31  ;;  %v1249_v31 = vsel %vm4033_vm2, %v4170_v57, 0.0 }
 0x1d4   : > { %v1265_v1 = vadd.f32 %v1249_v31, %v1248_v12 }
 0x1d5   : > { %1146 = vadd.xlane.f32.xlu0 %v1145_v14  ;;  %v4467_v60 = vpop.permute.xlu0 %3338 }
 0x1db   : > { %1324 = vadd.xlane.f32.xlu2 %v1323_v63 }
 0x1dd   : > { %1226 = vadd.xlane.f32.xlu0 %v1225_v29  ;;  %v4472_v25 = vpop.permute.xlu0 %3343  ;;  %v4502_v29 = vsub.f32 %v4010_v41, %v4023_v49 }
 0x1de   : > { %v3346_v0 = vunpack.i.h.bf16 %v4472_v25 }
 0x1df   : > { %6615 = vst [vmem:[#allocation36_spill] sm:$0xff] %v4502_v29  ;;  %v575_v36 = vsub.f32 %v4502_v29, %v4396_v37 }
 0x1e0   : > { %v4479_v19 = vpack.i.bf16 %v3346_v0, %v523_v26 }
 0x1e1   : > { %v1245_v33 = vpop.xlane.xlu2 %1244  ;;  %v583_v26 = vadd.f32 %v575_v36, %v3945_v18 }
 0x1e3   : > { %1223 = vadd.xlane.f32.xlu2 %v1222_v17  ;;  %v3362_v49 = vpack.i.bf16 %v582_v43, %v583_v26  ;;  %v1292_v26 = vsel %vm4082_vm3, %v4359_v47, 0.0 }
 0x1e4   : > { %3368 = vrot.lane.b32.xlu1 %v3367_v38, %s3840_s8 }
 0x1e5   : > { %1143 = vadd.xlane.f32.xlu0 %v1142_v11  ;;  %v1314_v11 = vadd.f32 %v1295_v59, %v1294_v50 }
 0x1e9   : > { %v4492_v14 = vpop.xlane.xlu2 %1161 }
 0x1ed   : > { %1266 = vadd.xlane.f32.xlu0 %v1265_v1 }
 0x1f5   : > { %v1242_v4 = vpop.xlane.xlu2 %1241 }
 0x1f6   : > { %v4498_v63 = vpop.xlane.xlu1 %1158 }
 0x1fb   : > { %3358 = vrot.lane.b32.xlu2 %v3357_v7, %s3840_s8  ;;  %v520_v7 = vadd.f32 %v6617_v3, %v3914_v6 }
 0x1fd   : > { %v1285_v13 = vpop.xlane.xlu2 %1284 }
 0x1fe   : > { %v4513_v0 = vpop.xlane.xlu1 %1275 }
 0x201   : > { %3363 = vrot.lane.b32.xlu0 %v3362_v49, %s3841_s9  ;;  %v4546_v49 = vsub.f32 %v4492_v14, %v1242_v4 }
 0x203   : > { %6619 = vst [vmem:[#allocation39_spill] sm:$0xff] %v4546_v49 }
 0x205   : > { %v4516_v17 = vpop.xlane.xlu2 %1238 }
 0x206   : > { %v1189_v38 = vpop.xlane.xlu1 %1188 }
 0x208   : > { %v4524_v37 = vpop.xlane.xlu0 %1164 }
 0x209   : > { %v4527_v12 = vsub.f32 %v4524_v37, %v1245_v33  ;;  %v1293_v33 = vsel %vm4086_vm4, %v4165_v56, 0.0 }
 0x20a   : > { %v1311_v59 = vadd.f32 %v1293_v33, %v1292_v26 }
 0x20b   : > { %6616 = vst [vmem:[#allocation37_spill] sm:$0xff] %v4527_v12  ;;  %v1357_v31 = vsub.f32 %v4527_v12, %v1285_v13 }
 0x20d   : > { %v4530_v1 = vpop.permute.xlu2 %3353 }
 0x20e   : > { %v3355_v36 = vunpack.i.l.bf16 %v4530_v1  ;;  %1315 = vadd.xlane.f32.xlu1 %v1314_v11  ;;  %v4537_v43 = vpop.xlane.xlu1 %1272  ;;  %v4555_v11 = vsub.f32 %v4524_v37, %v1189_v38 }
 0x20f   : > { %6618 = vst [vmem:[#allocation38_spill] sm:$0xff] %v4537_v43  ;;  %v4561_v43 = vadd.f32 %v1357_v31, %v4140_v51  ;;  %v1169_v51 = vsel %vm339_vm0, %v4457_v21, 0.0 }
 0x210   : > { %v4548_v50 = vpack.i.bf16 %v3355_v36, %v520_v7  ;;  %v4550_v30 = vpop.xlane.xlu0 %1281  ;;  %6620 = vst [vmem:[#allocation40_spill] sm:$0xff] %v4555_v11  ;;  %v1413_v56 = vsub.f32 %v4555_v11, %v1285_v13 }
 0x211   : > { %v1356_v6 = vsub.f32 %v4546_v49, %v4550_v30  ;;  %6622 = vst [vmem:[#allocation42_spill] sm:$0xff] %v4561_v43  ;;  %v591_v49 = vsub.f32 %v4502_v29, %v4260_v28 }
 0x213   : > { %v4558_v3 = vadd.f32 %v1356_v6, %v4145_v52  ;;  %v4577_v52 = vadd.f32 %v1413_v56, %v4335_v8  ;;  %v1297_v56 = vsel %vm4086_vm4, %v4148_v53, 0.0  ;;  %v599_v43 = vadd.f32 %v591_v49, %v3945_v18  ;;  %v6635_v18 = vld [vmem:[#allocation5_spill] sm:$0xff] }
 0x214   : > { %v549_v49 = vsub.f32 %v6635_v18, %v4347_v32 }
 0x215   : > { %6621 = vst [vmem:[#allocation41_spill] sm:$0xff] %v4558_v3 }
 0x216   : > { %1312 = vadd.xlane.f32.xlu1 %v1311_v59  ;;  %v1186_v4 = vpop.xlane.xlu1 %1185  ;;  %6625 = vst [vmem:[#allocation45_spill] sm:$0xff] %v4577_v52  ;;  %v1175_v59 = vsel %vm339_vm0, %v4359_v47, 0.0 }
 0x217   : > { %v4566_v36 = vsub.f32 %v4492_v14, %v1186_v4  ;;  %v1296_v4 = vsel %vm4082_vm3, %v4330_v44, 0.0 }
 0x218   : > { %v4583_v6 = vpop.xlane.xlu0 %1155  ;;  %v1317_v7 = vadd.f32 %v1297_v56, %v1296_v4  ;;  %v573_v4 = vsub.f32 %v4221_v16, %v4347_v32  ;;  %v572_v56 = vsub.f32 %v4207_v46, %v4310_v58  ;;  %v6632_v46 = vld [vmem:[#allocation2_spill] sm:$0xff] }
 0x219   : > { %6623 = vst [vmem:[#allocation43_spill] sm:$0xff] %v4566_v36  ;;  %v1412_v38 = vsub.f32 %v4566_v36, %v4550_v30 }
 0x21a   : > { %6627 = vst [vmem:[#allocation47_spill] sm:$0xff] %v4583_v6  ;;  %v581_v55 = vadd.f32 %v573_v4, %v3921_v9  ;;  %v550_v9 = vsub.f32 %v4006_v39, %v4411_v23 }
 0x21b   : > { %v4572_v26 = vadd.f32 %v1412_v38, %v4323_v10 }
 0x21d   : > { %6624 = vst [vmem:[#allocation44_spill] sm:$0xff] %v4572_v26  ;;  %v1381_v26 = vsub.f32 %v4524_v37, %v1285_v13 }
 0x21e   : > { %1170 = vadd.xlane.f32.xlu1 %v1169_v51  ;;  %v4581_v33 = vpop.xlane.xlu1 %1269 }
 0x21f   : > { %6626 = vst [vmem:[#allocation46_spill] sm:$0xff] %v4581_v33 }
 0x220   : > { %v4593_v31 = vpop.xlane.xlu0 %1235 }
 0x224   : > { %1176 = vadd.xlane.f32.xlu2 %v1175_v59 }
 0x226   : > { %v1183_v38 = vpop.xlane.xlu1 %1182 }
 0x228   : > { %v4613_v52 = vpop.xlane.xlu0 %1278 }
 0x22b   : > { %1318 = vadd.xlane.f32.xlu0 %v1317_v7  ;;  %v4609_v7 = vsub.f32 %v4498_v63, %v1183_v38 }
 0x22e   : > { %v4595_v51 = vpop.xlane.xlu1 %1321 }
 0x22f   : > { %6628 = vst [vmem:[#allocation48_spill] sm:$0xff] %v4595_v51  ;;  %v1372_v59 = vsub.f32 %v4492_v14, %v4595_v51  ;;  %v1396_v47 = vsub.f32 %v4566_v36, %v4595_v51  ;;  %v580_v36 = vadd.f32 %v572_v56, %v6632_v46  ;;  %v6636_v46 = vld [vmem:[#allocation24_spill] sm:$0xff] }
 0x230   : > { %v3372_v23 = vpack.i.bf16 %v6636_v46, %v550_v9 }
 0x231   : > { %v4604_v33 = vpack.i.bf16 %v1381_v26, %v1372_v59  ;;  %v590_v26 = vsub.f32 %v4496_v35, %v4232_v2  ;;  %v1411_v59 = vsub.f32 %v4609_v7, %v4613_v52  ;;  %v3377_v4 = vpack.i.bf16 %v580_v36, %v581_v55 }
 0x233   : > { %6629 = vst [vmem:[#allocation49_spill] sm:$0xff] %v4604_v33  ;;  %v6631_v33 = vld [vmem:[#allocation28_spill] sm:$0xff]  ;;  %v598_v3 = vadd.f32 %v590_v26, %v3951_v20  ;;  %v4635_v29 = vadd.f32 %v1411_v59, %v4330_v44  ;;  %v3382_v20 = vpack.i.bf16 %v4201_v45, %v549_v49  ;;  %v4661_v26 = vadd.f32 %v1396_v47, %v4323_v10  ;;  %v1233_v45 = vpop.xlane.xlu0 %1232 }
 0x234   : > { %v1166_v10 = vsel %vm339_vm0, %v4432_v34, 0.0 }
 0x235   : > { %6633 = vst [vmem:[#allocation28_spill] sm:$0xff] %v4635_v29 }
 0x236   : > { %v1180_v13 = vpop.xlane.xlu1 %1179  ;;  %6637 = vst [vmem:[#allocation5_spill] sm:$0xff] %v4661_v26  ;;  %v6641_v26 = vld [vmem:[#allocation6_spill] sm:$0xff] }
 0x237   : > { %v4623_v38 = vsub.f32 %v4583_v6, %v1180_v13  ;;  %3388 = vrot.lane.b32.xlu1 %v6631_v33, %s3840_s8  ;;  %v3397_v33 = vpack.i.bf16 %v598_v3, %v599_v43 }
 0x239   : > { %6630 = vst [vmem:[#allocation50_spill] sm:$0xff] %v4623_v38  ;;  %v1410_v51 = vsub.f32 %v4623_v38, %v4513_v0 }
 0x23b   : > { %v4638_v13 = vadd.f32 %v1410_v51, %v4339_v27 }
 0x23c   : > { %3378 = vrot.lane.b32.xlu2 %v3377_v4, %s3841_s9 }
 0x23d   : > { %6634 = vst [vmem:[#allocation2_spill] sm:$0xff] %v4638_v13 }
 0x23e   : > { %v4652_v43 = vpop.xlane.xlu1 %1263 }
 0x23f   : > { %3398 = vrot.lane.b32.xlu1 %v3397_v33, %s3842_s10  ;;  %3373 = vrot.lane.b32.xlu0 %v3372_v23, %s3840_s8  ;;  %v4670_v23 = vpop.xlane.xlu0 %1149 }
 0x244   : > { %3383 = vrot.lane.b32.xlu2 %v3382_v20, %s3840_s8 }
 0x246   : > { %v4650_v55 = vpop.xlane.xlu2 %1152 }
 0x247   : > { %v4680_v9 = vpop.xlane.xlu0 %1229 }
 0x24e   : > { %v4654_v3 = vpop.xlane.xlu2 %1324 }
 0x24f   : > { %v1397_v51 = vsub.f32 %v4555_v11, %v4654_v3 }
 0x251   : > { %v4664_v59 = vadd.f32 %v1397_v51, %v4335_v8  ;;  %v1290_v8 = vsel %vm4082_vm3, %v4380_v5, 0.0  ;;  %v6639_v51 = vld [vmem:[#allocation11_spill] sm:$0xff] }
 0x253   : > { %6638 = vst [vmem:[#allocation24_spill] sm:$0xff] %v4664_v59  ;;  %v6640_v59 = vld [vmem:[#allocation10_spill] sm:$0xff] }
 0x256   : > { %v3369_v4 = vpop.permute.xlu1 %3368  ;;  %v4668_v33 = vpop.xlane.xlu2 %1223 }
 0x257   : > { %v3370_v49 = vunpack.i.l.bf16 %v3369_v4  ;;  %v3371_v47 = vunpack.i.h.bf16 %v3369_v4  ;;  %v1288_v4 = vsel %vm4082_vm3, %v4457_v21, 0.0 }
 0x259   : > { %998 = vmatpush.msra.mxu1 %v3370_v49  ;;  %v1291_v49 = vsel %vm4086_vm4, %v6639_v51, 0.0 }
 0x25e   : > { %v3359_v20 = vpop.permute.xlu2 %3358 }
 0x25f   : > { %v3360_v36 = vunpack.i.l.bf16 %v3359_v20  ;;  %v3361_v56 = vunpack.i.h.bf16 %v3359_v20  ;;  %v1289_v20 = vsel %vm4086_vm4, %v4170_v57, 0.0 }
 0x260   : > { %v1305_v11 = vadd.f32 %v1289_v20, %v1288_v4  ;;  %v1286_v4 = vsel %vm4082_vm3, %v4432_v34, 0.0  ;;  %v3817_v20 = vld [vmem:[%s3894_s26 + $0x30] sm:$0xff] }
 0x261   : > { %969 = vmatpush.msra.mxu0 %v3360_v36  ;;  %v1172_v36 = vsel %vm339_vm0, %v4380_v5, 0.0  ;;  %v4694_v5 = vsub.f32 %v6641_v26, %v6640_v59  ;;  %v1287_v59 = vsel %vm4086_vm4, %v4187_v22, 0.0 }
 0x262   : > { %v1302_v12 = vadd.f32 %v1287_v59, %v1286_v4 }
 0x263   : > { %970 = vmatpush.msra.mxu0 %v3361_v56  ;;  %v1308_v56 = vadd.f32 %v1291_v49, %v1290_v8  ;;  %v6643_v8 = vld [vmem:[#allocation8_spill] sm:$0xff] }
 0x265   : > { %971 = vmatpush.msra.mxu0 %v3371_v47  ;;  %v4690_v47 = vpop.xlane.xlu0 %1146 }
 0x269   : > { %1167 = vadd.xlane.f32.xlu1 %v1166_v10  ;;  %1173 = vadd.xlane.f32.xlu0 %v1172_v36  ;;  %v6642_v10 = vld [vmem:[#allocation9_spill] sm:$0xff] }
 0x26a   : > { %v4698_v49 = vsub.f32 %v6643_v8, %v6642_v10  ;;  %v3818_v10 = vld [vmem:[%s3894_s26 + $0x20] sm:$0xff] }
 0x26c   : > { %v571_v36 = vsub.f32 %v4698_v49, %v4300_v15  ;;  %v517_v15 = vsub.f32 %v4279_v48, %v4347_v32  ;;  %v6645_v32 = vld [vmem:[#allocation18_spill] sm:$0xff] }
 0x26d   : > { %1309 = vadd.xlane.f32.xlu2 %v1308_v56  ;;  %v570_v56 = vsub.f32 %v4694_v5, %v4327_v24  ;;  %v4714_v29 = vpop.xlane.xlu0 %1226  ;;  %v557_v48 = vsub.f32 %v6635_v18, %v6645_v32  ;;  %v6650_v32 = vld [vmem:[#allocation14_spill] sm:$0xff] }
 0x26e   : > { %v579_v21 = vadd.f32 %v3817_v20, %v571_v36  ;;  %v525_v34 = vadd.f32 %v3819_v61, %v517_v15  ;;  %v1379_v36 = vsub.f32 %v4498_v63, %v4613_v52 }
 0x26f   : > { %v578_v51 = vadd.f32 %v3818_v10, %v570_v56  ;;  %v3472_v4 = vpack.i.bf16 %v4496_v35, %v557_v48  ;;  %v586_v48 = vsub.f32 %v4694_v5, %v6650_v32 }
 0x271   : > { %v3392_v13 = vpack.i.bf16 %v578_v51, %v579_v21  ;;  %v4737_v51 = vsub.f32 %v4650_v55, %v1233_v45  ;;  %v6649_v45 = vld [vmem:[#allocation16_spill] sm:$0xff] }
 0x275   : > { %1306 = vadd.xlane.f32.xlu2 %v1305_v11  ;;  %v3340_v11 = vunpack.i.l.bf16 %v4467_v60 }
 0x277   : > { %v3437_v62 = vpack.i.bf16 %v525_v34, %v3340_v11  ;;  %v546_v34 = vsub.f32 %v6641_v26, %v4327_v24  ;;  %v1378_v11 = vsub.f32 %v4583_v6, %v4513_v0 }
 0x279   : > { %v3407_v24 = vpack.i.bf16 %v4247_v40, %v546_v34  ;;  %v1331_v40 = vsub.f32 %v4498_v63, %v4516_v17  ;;  %v554_v34 = vsub.f32 %v6641_v26, %v6650_v32  ;;  %v594_v17 = vadd.f32 %v3818_v10, %v586_v48 }
 0x27d   : > { %1303 = vadd.xlane.f32.xlu2 %v1302_v12  ;;  %3393 = vrot.lane.b32.xlu0 %v3392_v13, %s3841_s9  ;;  %v4730_v12 = vpop.xlane.xlu0 %1143  ;;  %v6647_v13 = vld [vmem:[#allocation27_spill] sm:$0xff] }
 0x281   : > { %v4719_v8 = vpop.xlane.xlu1 %1315 }
 0x282   : > { %6644 = vst [vmem:[#allocation10_spill] sm:$0xff] %v4719_v8  ;;  %v1370_v56 = vsub.f32 %v4583_v6, %v4719_v8  ;;  %3438 = vrot.lane.b32.xlu1 %v3437_v62, %s3840_s8 }
 0x284   : > { %v4728_v21 = vpack.i.bf16 %v1379_v36, %v1370_v56  ;;  %v587_v36 = vsub.f32 %v4698_v49, %v6649_v45  ;;  %v3356_v56 = vunpack.i.h.bf16 %v4530_v1  ;;  %v6654_v1 = vld [vmem:[#allocation21_spill] sm:$0xff] }
 0x285   : > { %3403 = vrot.lane.b32.xlu0 %v6647_v13, %s3840_s8  ;;  %v4753_v35 = vpop.xlane.xlu0 %1266  ;;  %v6651_v13 = vld [vmem:[#allocation25_spill] sm:$0xff] }
 0x286   : > { %6646 = vst [vmem:[#allocation6_spill] sm:$0xff] %v4728_v21  ;;  %v595_v45 = vadd.f32 %v3817_v20, %v587_v36  ;;  %v6659_v20 = vld [vmem:[#allocation13_spill] sm:$0xff]  ;;  %v6660_v36 = vld [vmem:[#allocation22_spill] sm:$0xff] }
 0x289   : > { %v4740_v59 = vpop.xlane.xlu1 %1312 }
 0x28a   : > { %v1369_v15 = vsub.f32 %v4650_v55, %v4740_v59  ;;  %3473 = vrot.lane.b32.xlu1 %v3472_v4, %s3840_s8  ;;  %v6652_v4 = vld [vmem:[#allocation26_spill] sm:$0xff] }
 0x28c   : > { %v4749_v62 = vpack.i.bf16 %v1378_v11, %v1369_v15  ;;  %v6653_v15 = vpack.i.bf16 %v6651_v13, %v6652_v4  ;;  %v6655_v11 = vld [vmem:[#allocation20_spill] sm:$0xff]  ;;  %v3502_v13 = vpack.i.bf16 %v554_v34, %v3356_v56  ;;  %v1355_v4 = vsub.f32 %v1331_v40, %v4613_v52 }
 0x28d   : > { %3408 = vrot.lane.b32.xlu0 %v3407_v24, %s3840_s8  ;;  %v6656_v24 = vpack.i.bf16 %v6654_v1, %v6655_v11  ;;  %v4778_v61 = vpop.permute.xlu0 %3363  ;;  %v584_v11 = vsub.f32 %v6660_v36, %v6659_v20  ;;  %v1394_v52 = vsub.f32 %v4623_v38, %v4719_v8  ;;  %v3820_v34 = vld [vmem:[%s3894_s26 + $0x10] sm:$0xff]  ;;  %v3821_v38 = vld [vmem:[%s3894_s26] sm:$0xff] }
 0x28e   : > { %6648 = vst [vmem:[#allocation9_spill] sm:$0xff] %v4749_v62  ;;  %v3432_v62 = vpack.i.bf16 %v594_v17, %v595_v45  ;;  %v1363_v1 = vadd.f32 %v1355_v4, %v4148_v53  ;;  %v1380_v45 = vsub.f32 %v4492_v14, %v4550_v30  ;;  %v1373_v30 = vsub.f32 %v4524_v37, %v4654_v3 }
 0x28f   : > { %v592_v8 = vadd.f32 %v3821_v38, %v584_v11  ;;  %v4804_v21 = vadd.f32 %v1394_v52, %v4339_v27  ;;  %v6662_v11 = vld [vmem:[#allocation32_spill] sm:$0xff]  ;;  %v3341_v52 = vunpack.i.h.bf16 %v4467_v60  ;;  %v4841_v60 = vsub.f32 %v4730_v12, %v4668_v33 }
 0x292   : > { %3488 = vrot.lane.b32.xlu1 %v4548_v50, %s3840_s8  ;;  %v4772_v50 = vsub.f32 %v4583_v6, %v4593_v31  ;;  %v6657_v31 = vld [vmem:[#allocation15_spill] sm:$0xff] }
 0x294   : > { %v1354_v32 = vsub.f32 %v4772_v50, %v4513_v0  ;;  %v6661_v0 = vld [vmem:[#allocation31_spill] sm:$0xff] }
 0x295   : > { %3413 = vrot.lane.b32.xlu2 %v6653_v15, %s3841_s9  ;;  %3418 = vrot.lane.b32.xlu0 %v6656_v24, %s3842_s10  ;;  %v6658_v15 = vld [vmem:[#allocation23_spill] sm:$0xff] }
 0x296   : > { %v585_v6 = vsub.f32 %v6658_v15, %v6657_v31  ;;  %v1362_v56 = vadd.f32 %v1354_v32, %v4155_v54 }
 0x297   : > { %v4792_v10 = vpop.xlane.xlu2 %1176 }
 0x298   : > { %v593_v24 = vadd.f32 %v3820_v34, %v585_v6  ;;  %v3517_v4 = vpack.i.bf16 %v1362_v56, %v1363_v1 }
 0x29a   : > { %3503 = vrot.lane.b32.xlu1 %v3502_v13, %s3840_s8  ;;  %v3447_v1 = vpack.i.bf16 %v592_v8, %v593_v24  ;;  %v3822_v8 = vld [vmem:[%s3894_s26 + $0x48] sm:$0xff] }
 0x29d   : > { %3433 = vrot.lane.b32.xlu2 %v3432_v62, %s3842_s10  ;;  %3423 = vrot.lane.b32.xlu0 %v6661_v0, %s3840_s8 }
 0x29e   : > { %v1319_v48 = vpop.xlane.xlu0 %1318 }
 0x29f   : > { %v1371_v13 = vsub.f32 %v4498_v63, %v1319_v48  ;;  %v1395_v62 = vsub.f32 %v4609_v7, %v1319_v48  ;;  %v1339_v17 = vsub.f32 %v1331_v40, %v1319_v48  ;;  %v4825_v0 = vpop.permute.xlu2 %3378  ;;  %v4830_v48 = vpop.xlane.xlu1 %1170 }
 0x2a1   : > { %v4807_v54 = vadd.f32 %v1395_v62, %v4330_v44  ;;  %v4809_v32 = vpack.i.bf16 %v1380_v45, %v1371_v13  ;;  %v1347_v6 = vadd.f32 %v1339_v17, %v4148_v53  ;;  %v516_v44 = vsub.f32 %v6636_v46, %v4310_v58 }
 0x2a2   : > { %3518 = vrot.lane.b32.xlu1 %v3517_v4, %s3839_s7  ;;  %v3532_v53 = vpack.i.bf16 %v1331_v40, %v6660_v36  ;;  %v4836_v58 = vsub.f32 %v4690_v47, %v4714_v29  ;;  %v3345_v46 = vunpack.i.l.bf16 %v4472_v25  ;;  %v3547_v36 = vpack.i.bf16 %v6635_v18, %v4772_v50 }
 0x2a3   : > { %v3582_v38 = vpack.i.bf16 %v4804_v21, %v4807_v54  ;;  %v4818_v27 = vpack.i.bf16 %v1373_v30, %v1347_v6  ;;  %v524_v56 = vadd.f32 %v3822_v8, %v516_v44  ;;  %v1350_v45 = vsub.f32 %v4841_v60, %v4652_v43  ;;  %v6664_v44 = vld [vmem:[#allocation3_spill] sm:$0xff] }
 0x2a4   : > { %v1351_v40 = vsub.f32 %v4836_v58, %v4753_v35 }
 0x2a5   : > { %3448 = vrot.lane.b32.xlu2 %v3447_v1, %s3842_s10  ;;  %3428 = vrot.lane.b32.xlu0 %v6662_v11, %s3840_s8  ;;  %v3442_v34 = vpack.i.bf16 %v524_v56, %v3341_v52  ;;  %v6663_v1 = vld [vmem:[#allocation19_spill] sm:$0xff]  ;;  %v6666_v56 = vld [vmem:[#allocation8_spill] sm:$0xff] }
 0x2a6   : > { %v1359_v25 = vadd.f32 %v1351_v40, %v4170_v57  ;;  %v556_v11 = vsub.f32 %v6664_v44, %v6663_v1  ;;  %v558_v57 = vsub.f32 %v4006_v39, %v4232_v2  ;;  %v6680_v1 = vld [vmem:[#allocation46_spill] sm:$0xff] }
 0x2a7   : > { %v3384_v24 = vpop.permute.xlu2 %3383 }
 0x2a8   : > { %v3386_v17 = vunpack.i.h.bf16 %v3384_v24  ;;  %v3385_v18 = vunpack.i.l.bf16 %v3384_v24  ;;  %v6674_v24 = vld [vmem:[#allocation37_spill] sm:$0xff] }
 0x2a9   : > { %v3389_v4 = vpop.permute.xlu1 %3388  ;;  %v6693_v21 = vsub.f32 %v6674_v24, %v4654_v3 }
 0x2aa   : > { %3533 = vrot.lane.b32.xlu1 %v3532_v53, %s3840_s8  ;;  %v3391_v30 = vunpack.i.h.bf16 %v3389_v4  ;;  %v3390_v6 = vunpack.i.l.bf16 %v3389_v4  ;;  %v6665_v53 = vld [vmem:[#allocation36_spill] sm:$0xff] }
 0x2ab   : > { %v3462_v8 = vpack.i.bf16 %v6665_v53, %v558_v57  ;;  %v6682_v53 = vld [vmem:[#allocation11_spill] sm:$0xff] }
 0x2ad   : > { %3458 = vrot.lane.b32.xlu2 %v4479_v19, %s3840_s8  ;;  %3443 = vrot.lane.b32.xlu0 %v3442_v34, %s3840_s8  ;;  %v559_v19 = vsub.f32 %v4010_v41, %v4260_v28  ;;  %v1358_v28 = vadd.f32 %v1350_v45, %v4187_v22  ;;  %v3482_v22 = vpack.i.bf16 %v4221_v16, %v556_v11  ;;  %v6667_v34 = vld [vmem:[#allocation41_spill] sm:$0xff]  ;;  %v6671_v16 = vld [vmem:[#allocation2_spill] sm:$0xff] }
 0x2ae   : > { %v6675_v45 = vld [vmem:[#allocation17_spill] sm:$0xff] }
 0x2af   : > { %v3452_v62 = vpack.i.bf16 %v559_v19, %v3345_v46  ;;  %v3562_v52 = vpack.i.bf16 %v1358_v28, %v1359_v25  ;;  %v6668_v46 = vld [vmem:[#allocation42_spill] sm:$0xff]  ;;  %v4901_v28 = vsub.f32 %v4650_v55, %v4792_v10  ;;  %v6681_v10 = vld [vmem:[#allocation12_spill] sm:$0xff] }
 0x2b0   : > { %v6669_v40 = vpack.i.bf16 %v6667_v34, %v6668_v46  ;;  %v6684_v34 = vld [vmem:[#allocation29_spill] sm:$0xff] }
 0x2b1   : > { %v3374_v29 = vpop.permute.xlu0 %3373 }
 0x2b2   : > { %3548 = vrot.lane.b32.xlu1 %v3547_v36, %s3840_s8  ;;  %v3376_v33 = vunpack.i.h.bf16 %v3374_v29  ;;  %v3375_v13 = vunpack.i.l.bf16 %v3374_v29  ;;  %v6672_v36 = vld [vmem:[#allocation28_spill] sm:$0xff]  ;;  %v3512_v29 = vpack.i.bf16 %v6674_v24, %v4694_v5 }
 0x2b3   : > { %v6673_v19 = vpack.i.bf16 %v6671_v16, %v6672_v36 }
 0x2b4   : > { %972 = vmatpush.msra.mxu0 %v3376_v33  ;;  %999 = vmatpush.msra.mxu1 %v3375_v13  ;;  %v6676_v33 = vld [vmem:[#allocation7_spill] sm:$0xff] }
 0x2b5   : > { %3468 = vrot.lane.b32.xlu2 %v4452_v42, %s3840_s8  ;;  %3453 = vrot.lane.b32.xlu0 %v3452_v62, %s3840_s8  ;;  %v4865_v42 = vsub.f32 %v4670_v23, %v4680_v9  ;;  %v6670_v9 = vld [vmem:[#allocation34_spill] sm:$0xff]  ;;  %v553_v13 = vsub.f32 %v6676_v33, %v6657_v31  ;;  %v6677_v62 = vld [vmem:[#allocation39_spill] sm:$0xff] }
 0x2b6   : > { %973 = vmatpush.msra.mxu0 %v3386_v17  ;;  %1000 = vmatpush.msra.mxu1 %v3385_v18  ;;  %v3527_v25 = vpack.i.bf16 %v4010_v41, %v6677_v62  ;;  %v6678_v17 = vld [vmem:[#allocation4_spill] sm:$0xff]  ;;  %v3365_v18 = vunpack.i.l.bf16 %v4778_v61  ;;  %v6679_v41 = vld [vmem:[#allocation38_spill] sm:$0xff] }
 0x2b7   : > { %v3577_v2 = vpack.i.bf16 %v6666_v56, %v4865_v42  ;;  %v3507_v4 = vpack.i.bf16 %v553_v13, %v4698_v49  ;;  %v552_v5 = vsub.f32 %v6678_v17, %v6659_v20  ;;  %v1353_v49 = vsub.f32 %v4737_v51, %v6679_v41  ;;  %v6683_v56 = vld [vmem:[#allocation30_spill] sm:$0xff] }
 0x2b8   : > { %974 = vmatpush.msra.mxu0 %v3391_v30  ;;  %1001 = vmatpush.msra.mxu1 %v3390_v6  ;;  %v3542_v31 = vpack.i.bf16 %v3365_v18, %v4006_v39  ;;  %v1352_v11 = vsub.f32 %v4865_v42, %v6680_v1  ;;  %v1393_v20 = vsub.f32 %v4901_v28, %v4740_v59  ;;  %v3366_v39 = vunpack.i.h.bf16 %v4778_v61 }
 0x2b9   : > { %v3522_v30 = vpack.i.bf16 %v6658_v15, %v552_v5  ;;  %v4943_v18 = vsub.f32 %v4690_v47, %v4830_v48 }
 0x2ba   : > { %3563 = vrot.lane.b32.xlu1 %v3562_v52, %s3839_s7  ;;  %v1361_v52 = vadd.f32 %v1353_v49, %v6681_v10  ;;  %v1401_v46 = vadd.f32 %v1393_v20, %v6684_v34  ;;  %v6686_v49 = vld [vmem:[#allocation24_spill] sm:$0xff] }
 0x2bd   : > { %3483 = vrot.lane.b32.xlu2 %v3482_v22, %s3840_s8  ;;  %3463 = vrot.lane.b32.xlu0 %v3462_v8, %s3840_s8  ;;  %v1360_v8 = vadd.f32 %v1352_v11, %v6682_v53  ;;  %v6689_v53 = vld [vmem:[#allocation33_spill] sm:$0xff] }
 0x2bf   : > { %v3537_v16 = vpack.i.bf16 %v1360_v8, %v1361_v52  ;;  %v6688_v52 = vld [vmem:[#allocation35_spill] sm:$0xff] }
 0x2c2   : > { %3578 = vrot.lane.b32.xlu1 %v3577_v2, %s3840_s8 }
 0x2c5   : > { %3498 = vrot.lane.b32.xlu2 %v6669_v40, %s3839_s7  ;;  %3478 = vrot.lane.b32.xlu0 %v6670_v9, %s3840_s8  ;;  %v3557_v40 = vpack.i.bf16 %v4737_v51, %v3366_v39  ;;  %v4926_v9 = vpop.permute.xlu1 %3398 }
 0x2ca   : > { %3593 = vrot.lane.b32.xlu1 %v6673_v19, %s3842_s10  ;;  %v1409_v19 = vsub.f32 %v4901_v28, %v6679_v41 }
 0x2cd   : > { %3513 = vrot.lane.b32.xlu2 %v3512_v29, %s3840_s8  ;;  %3493 = vrot.lane.b32.xlu0 %v6675_v45, %s3840_s8  ;;  %v3380_v29 = vunpack.i.l.bf16 %v4825_v0 }
 0x2d5   : > { %3528 = vrot.lane.b32.xlu2 %v3527_v25, %s3840_s8  ;;  %3508 = vrot.lane.b32.xlu0 %v3507_v4, %s3840_s8  ;;  %v1417_v25 = vadd.f32 %v1409_v19, %v6684_v34  ;;  %v3572_v4 = vpack.i.bf16 %v3380_v29, %v6664_v44  ;;  %v3381_v44 = vunpack.i.h.bf16 %v4825_v0  ;;  %v6690_v0 = vld [vmem:[#allocation44_spill] sm:$0xff] }
 0x2dc   : > { %v1174_v6 = vpop.xlane.xlu0 %1173  ;;  %v1168_v5 = vpop.xlane.xlu1 %1167 }
 0x2dd   : > { %v4910_v57 = vsub.f32 %v4670_v23, %v1174_v6  ;;  %3543 = vrot.lane.b32.xlu2 %v3542_v31, %s3840_s8  ;;  %3523 = vrot.lane.b32.xlu0 %v3522_v30, %s3840_s8  ;;  %v6685_v30 = vld [vmem:[#allocation5_spill] sm:$0xff]  ;;  %v4951_v11 = vsub.f32 %v4730_v12, %v1168_v5 }
 0x2de   : > { %v6687_v6 = vpack.i.bf16 %v6685_v30, %v6686_v49  ;;  %v3401_v49 = vunpack.i.h.bf16 %v4926_v9 }
 0x2df   : > { %v1408_v61 = vsub.f32 %v4910_v57, %v6680_v1 }
 0x2e0   : > { %v4917_v15 = vpop.xlane.xlu2 %1309 }
 0x2e1   : > { %v1392_v22 = vsub.f32 %v4910_v57, %v4917_v15  ;;  %v1416_v13 = vadd.f32 %v1408_v61, %v6683_v56 }
 0x2e3   : > { %v1400_v2 = vadd.f32 %v1392_v22, %v6683_v56  ;;  %v3622_v31 = vpack.i.bf16 %v1416_v13, %v1417_v25  ;;  %v3587_v56 = vpack.i.bf16 %v4836_v58, %v3381_v44 }
 0x2e5   : > { %v3607_v36 = vpack.i.bf16 %v1400_v2, %v1401_v46  ;;  %3558 = vrot.lane.b32.xlu2 %v3557_v40, %s3840_s8  ;;  %3538 = vrot.lane.b32.xlu0 %v3537_v16, %s3839_s7  ;;  %v1406_v2 = vsub.f32 %v4951_v11, %v4652_v43  ;;  %v6691_v46 = vld [vmem:[#allocation45_spill] sm:$0xff]  ;;  %v1407_v16 = vsub.f32 %v4943_v18, %v4753_v35 }
 0x2e6   : > { %v6692_v40 = vpack.i.bf16 %v6690_v0, %v6691_v46 }
 0x2e7   : > { %3608 = vrot.lane.b32.xlu1 %v3607_v36, %s3841_s9  ;;  %v3400_v36 = vunpack.i.l.bf16 %v4926_v9  ;;  %v1414_v13 = vadd.f32 %v1406_v2, %v6689_v53  ;;  %v1415_v5 = vadd.f32 %v1407_v16, %v6688_v52  ;;  %v6694_v9 = vsub.f32 %v4737_v51, %v4740_v59  ;;  %v6695_v51 = vld [vmem:[#allocation48_spill] sm:$0xff] }
 0x2e8   : > { %v4936_v45 = vpop.xlane.xlu2 %1306  ;;  %v6696_v59 = vsub.f32 %v6677_v62, %v6695_v51 }
 0x2e9   : > { %v1391_v20 = vsub.f32 %v4943_v18, %v4936_v45  ;;  %v3652_v30 = vpack.i.bf16 %v1414_v13, %v1415_v5 }
 0x2eb   : > { %v1399_v22 = vadd.f32 %v1391_v20, %v6688_v52 }
 0x2ed   : > { %3573 = vrot.lane.b32.xlu2 %v3572_v4, %s3840_s8  ;;  %3553 = vrot.lane.b32.xlu0 %v6687_v6, %s3841_s9 }
 0x2ef   : > { %3623 = vrot.lane.b32.xlu1 %v3622_v31, %s3842_s10  ;;  %v3394_v39 = vpop.permute.xlu0 %3393  ;;  %v3602_v31 = vpack.i.bf16 %v4841_v60, %v3400_v36 }
 0x2f0   : > { %v4957_v48 = vpop.xlane.xlu2 %1303  ;;  %v3395_v6 = vunpack.i.l.bf16 %v3394_v39  ;;  %v3396_v46 = vunpack.i.h.bf16 %v3394_v39  ;;  %v6697_v39 = vld [vmem:[#allocation6_spill] sm:$0xff] }
 0x2f1   : > { %v1390_v10 = vsub.f32 %v4951_v11, %v4957_v48 }
 0x2f2   : > { %v3612_v13 = vpack.i.bf16 %v3396_v46, %v6676_v33  ;;  %v1368_v33 = vsub.f32 %v4670_v23, %v4917_v15  ;;  %v1336_v46 = vsub.f32 %v4865_v42, %v4917_v15  ;;  %v3828_v42 = vld [vmem:[%s4137_s30 + $0x28] sm:$0xff] }
 0x2f3   : > { %v1398_v8 = vadd.f32 %v1390_v10, %v6689_v53 }
 0x2f4   : > { %v4973_v61 = vpop.permute.xlu1 %3438  ;;  %v1344_v15 = vadd.f32 %v3828_v42, %v1336_v46  ;;  %v6703_v42 = vld [vmem:[#allocation40_spill] sm:$0xff] }
 0x2f5   : > { %v3637_v34 = vpack.i.bf16 %v1398_v8, %v1399_v22  ;;  %3588 = vrot.lane.b32.xlu2 %v3587_v56, %s3840_s8  ;;  %3568 = vrot.lane.b32.xlu0 %v6692_v40, %s3842_s10  ;;  %v3823_v8 = vld [vmem:[%s4137_s30 + $0x78] sm:$0xff]  ;;  %v3825_v40 = vld [vmem:[%s4137_s30 + $0x68] sm:$0xff] }
 0x2f6   : > { %v1349_v54 = vadd.f32 %v3823_v8, %v6693_v21  ;;  %v1348_v16 = vadd.f32 %v3825_v40, %v6696_v59  ;;  %v1366_v21 = vsub.f32 %v4730_v12, %v4957_v48 }
 0x2f7   : > { %3638 = vrot.lane.b32.xlu1 %v3637_v34, %s3841_s9  ;;  %v3404_v29 = vpop.permute.xlu0 %3403  ;;  %v3597_v34 = vpack.i.bf16 %v3395_v6, %v6641_v26 }
 0x2f8   : > { %v4977_v19 = vpop.permute.xlu2 %3413  ;;  %v3406_v25 = vunpack.i.h.bf16 %v3404_v29  ;;  %v3405_v4 = vunpack.i.l.bf16 %v3404_v29  ;;  %v3617_v2 = vpack.i.bf16 %v1349_v54, %v3401_v49 }
 0x2fa   : > { %975 = vmatpush.msra.mxu0 %v3406_v25  ;;  %1002 = vmatpush.msra.mxu1 %v3405_v4  ;;  %v1334_v25 = vsub.f32 %v4841_v60, %v4957_v48  ;;  %v3415_v4 = vunpack.i.l.bf16 %v4977_v19 }
 0x2fc   : > { %v4991_v10 = vpop.permute.xlu1 %3473  ;;  %v3627_v60 = vpack.i.bf16 %v3415_v4, %v6678_v17  ;;  %v3416_v17 = vunpack.i.h.bf16 %v4977_v19  ;;  %v6700_v19 = vld [vmem:[#allocation49_spill] sm:$0xff] }
 0x2fd   : > { %3603 = vrot.lane.b32.xlu2 %v3602_v31, %s3840_s8  ;;  %3583 = vrot.lane.b32.xlu0 %v3582_v38, %s3841_s9  ;;  %v3824_v38 = vld [vmem:[%s4137_s30 + $0x38] sm:$0xff]  ;;  %v3826_v31 = vld [vmem:[%s4137_s30 + $0x8] sm:$0xff] }
 0x2fe   : > { %v1345_v56 = vadd.f32 %v3824_v38, %v6694_v9  ;;  %v3441_v9 = vunpack.i.h.bf16 %v4973_v61 }
 0x2ff   : > { %3653 = vrot.lane.b32.xlu1 %v3652_v30, %s3842_s10  ;;  %v3409_v44 = vpop.permute.xlu0 %3408  ;;  %v1342_v30 = vadd.f32 %v3826_v31, %v1334_v25 }
 0x300   : > { %v4989_v20 = vpop.permute.xlu2 %3433  ;;  %v3411_v22 = vunpack.i.h.bf16 %v3409_v44  ;;  %v3410_v53 = vunpack.i.l.bf16 %v3409_v44 }
 0x301   : > { %v3436_v52 = vunpack.i.h.bf16 %v4989_v20 }
 0x302   : > { %976 = vmatpush.msra.mxu0 %v3411_v22  ;;  %1003 = vmatpush.msra.mxu1 %v3410_v53 }
 0x303   : > { %v3667_v0 = vpack.i.bf16 %v1345_v56, %v3436_v52  ;;  %v3697_v52 = vpack.i.bf16 %v1368_v33, %v1342_v30  ;;  %v6701_v33 = vld [vmem:[#allocation50_spill] sm:$0xff] }
 0x304   : > { %v5012_v29 = vpop.permute.xlu1 %3488 }
 0x305   : > { %3618 = vrot.lane.b32.xlu2 %v3617_v2, %s3840_s8  ;;  %3598 = vrot.lane.b32.xlu0 %v3597_v34, %s3840_s8  ;;  %v6698_v2 = vld [vmem:[#allocation43_spill] sm:$0xff] }
 0x306   : > { %v3712_v34 = vpack.i.bf16 %v1366_v21, %v6698_v2  ;;  %v1335_v21 = vsub.f32 %v4836_v58, %v4936_v45 }
 0x307   : > { %3668 = vrot.lane.b32.xlu1 %v3667_v0, %s3840_s8  ;;  %v3419_v24 = vpop.permute.xlu0 %3418  ;;  %v6699_v0 = vld [vmem:[#allocation10_spill] sm:$0xff] }
 0x308   : > { %v5006_v3 = vpop.permute.xlu2 %3448  ;;  %v3420_v36 = vunpack.i.l.bf16 %v3419_v24  ;;  %v3421_v22 = vunpack.i.h.bf16 %v3419_v24  ;;  %v1338_v48 = vsub.f32 %v4772_v50, %v6699_v0 }
 0x309   : > { %v3450_v40 = vunpack.i.l.bf16 %v5006_v3 }
 0x30a   : > { %v3632_v26 = vpack.i.bf16 %v1348_v16, %v3420_v36  ;;  %v3642_v56 = vpack.i.bf16 %v3421_v22, %v3416_v17  ;;  %v3827_v36 = vld [vmem:[%s4137_s30 + $0x48] sm:$0xff] }
 0x30c   : > { %v5028_v44 = vpop.permute.xlu1 %3503 }
 0x30d   : > { %3633 = vrot.lane.b32.xlu2 %v3632_v26, %s3840_s8  ;;  %3613 = vrot.lane.b32.xlu0 %v3612_v13, %s3840_s8  ;;  %v1346_v26 = vadd.f32 %v3827_v36, %v1338_v48  ;;  %v3476_v48 = vunpack.i.h.bf16 %v4991_v10 }
 0x30f   : > { %3683 = vrot.lane.b32.xlu1 %v6697_v39, %s3840_s8  ;;  %v3424_v62 = vpop.permute.xlu0 %3423  ;;  %v3677_v39 = vpack.i.bf16 %v1344_v15, %v3450_v40 }
 0x310   : > { %v5022_v5 = vpop.permute.xlu2 %3458  ;;  %v3426_v49 = vunpack.i.h.bf16 %v3424_v62  ;;  %v3425_v6 = vunpack.i.l.bf16 %v3424_v62 }
 0x311   : > { %v3460_v13 = vunpack.i.l.bf16 %v5022_v5 }
 0x312   : > { %977 = vmatpush.msra.mxu0 %v3426_v49  ;;  %1004 = vmatpush.msra.mxu1 %v3425_v6 }
 0x314   : > { %v5047_v24 = vpop.permute.xlu1 %3518 }
 0x315   : > { %3648 = vrot.lane.b32.xlu2 %v4818_v27, %s3840_s8  ;;  %3628 = vrot.lane.b32.xlu0 %v3627_v60, %s3840_s8  ;;  %v3440_v27 = vunpack.i.l.bf16 %v4973_v61  ;;  %v3435_v61 = vunpack.i.l.bf16 %v4989_v20 }
 0x317   : > { %3698 = vrot.lane.b32.xlu1 %v3697_v52, %s3840_s8  ;;  %v3429_v53 = vpop.permute.xlu0 %3428  ;;  %v3657_v25 = vpack.i.bf16 %v1346_v26, %v3435_v61  ;;  %v3461_v52 = vunpack.i.h.bf16 %v5022_v5  ;;  %v1367_v5 = vsub.f32 %v4690_v47, %v4936_v45  ;;  %v3475_v45 = vunpack.i.l.bf16 %v4991_v10 }
 0x318   : > { %v3469_v8 = vpop.permute.xlu2 %3468  ;;  %v3431_v54 = vunpack.i.h.bf16 %v3429_v53  ;;  %v3430_v38 = vunpack.i.l.bf16 %v3429_v53  ;;  %v6702_v53 = vld [vmem:[#allocation9_spill] sm:$0xff]  ;;  %v1377_v10 = vsub.f32 %v4650_v55, %v6679_v41  ;;  %v3505_v41 = vunpack.i.l.bf16 %v5028_v44 }
 0x319   : > { %v3470_v4 = vunpack.i.l.bf16 %v3469_v8  ;;  %v3471_v22 = vunpack.i.h.bf16 %v3469_v8  ;;  %v3451_v8 = vunpack.i.h.bf16 %v5006_v3 }
 0x31a   : > { %978 = vmatpush.msra.mxu0 %v3431_v54  ;;  %1005 = vmatpush.msra.mxu1 %v3430_v38  ;;  %v3521_v54 = vunpack.i.h.bf16 %v5047_v24  ;;  %v3702_v15 = vpack.i.bf16 %v6703_v42, %v1377_v10 }
 0x31c   : > { %979 = vmatpush.msra.mxu0 %v3441_v9  ;;  %1006 = vmatpush.msra.mxu1 %v3440_v27  ;;  %v5057_v31 = vpop.permute.xlu1 %3533  ;;  %v3742_v58 = vpack.i.bf16 %v3521_v54, %v4910_v57 }
 0x31d   : > { %3663 = vrot.lane.b32.xlu2 %v6700_v19, %s3840_s8  ;;  %3643 = vrot.lane.b32.xlu0 %v3642_v56, %s3840_s8  ;;  %v1376_v56 = vsub.f32 %v4670_v23, %v6680_v1 }
 0x31f   : > { %3713 = vrot.lane.b32.xlu1 %v3712_v34, %s3840_s8  ;;  %v3444_v59 = vpop.permute.xlu0 %3443  ;;  %v3707_v0 = vpack.i.bf16 %v1376_v56, %v1367_v5  ;;  %v3747_v56 = vpack.i.bf16 %v4943_v18, %v4498_v63 }
 0x320   : > { %v3484_v51 = vpop.permute.xlu2 %3483  ;;  %v3446_v16 = vunpack.i.h.bf16 %v3444_v59  ;;  %v3445_v50 = vunpack.i.l.bf16 %v3444_v59 }
 0x321   : > { %v3485_v3 = vunpack.i.l.bf16 %v3484_v51  ;;  %v3486_v1 = vunpack.i.h.bf16 %v3484_v51  ;;  %v3490_v51 = vunpack.i.l.bf16 %v5012_v29 }
 0x322   : > { %980 = vmatpush.msra.mxu0 %v3446_v16  ;;  %1007 = vmatpush.msra.mxu1 %v3445_v50  ;;  %v1374_v16 = vsub.f32 %v4730_v12, %v4652_v43  ;;  %v3491_v50 = vunpack.i.h.bf16 %v5012_v29  ;;  %v3520_v43 = vunpack.i.l.bf16 %v5047_v24 }
 0x324   : > { %981 = vmatpush.msra.mxu0 %v3460_v13  ;;  %v5078_v34 = vpop.permute.xlu1 %3548 }
 0x325   : > { %3678 = vrot.lane.b32.xlu2 %v3677_v39, %s3840_s8  ;;  %3658 = vrot.lane.b32.xlu0 %v3657_v25, %s3840_s8  ;;  %v3550_v24 = vunpack.i.l.bf16 %v5078_v34 }
 0x326   : > { %982 = vmatpush.msra.mxu0 %v3470_v4  ;;  %v1375_v4 = vsub.f32 %v4690_v47, %v4753_v35 }
 0x327   : > { %v3454_v62 = vpop.permute.xlu0 %3453 }
 0x328   : > { %v3499_v20 = vpop.permute.xlu2 %3498  ;;  %v3455_v49 = vunpack.i.l.bf16 %v3454_v62  ;;  %v3456_v6 = vunpack.i.h.bf16 %v3454_v62 }
 0x329   : > { %v3501_v30 = vunpack.i.h.bf16 %v3499_v20  ;;  %v3500_v57 = vunpack.i.l.bf16 %v3499_v20 }
 0x32a   : > { %1008 = vmatpush.msra.mxu1 %v3455_v49  ;;  %1027 = vmatpush.msra.mxu2 %v3456_v6  ;;  %v3506_v49 = vunpack.i.h.bf16 %v5028_v44  ;;  %v3737_v6 = vpack.i.bf16 %v4492_v14, %v3520_v43 }
 0x32b   : > { %v3727_v60 = vpack.i.bf16 %v3501_v30, %v6701_v33  ;;  %v3722_v36 = vpack.i.bf16 %v1374_v16, %v3500_v57  ;;  %v3536_v30 = vunpack.i.h.bf16 %v5057_v31  ;;  %v3717_v33 = vpack.i.bf16 %v4609_v7, %v1375_v4 }
 0x32c   : > { %1009 = vmatpush.msra.mxu1 %v3461_v52  ;;  %v5093_v26 = vpop.permute.xlu1 %3563  ;;  %v3732_v7 = vpack.i.bf16 %v4901_v28, %v4524_v37 }
 0x32d   : > { %3728 = vrot.lane.b32.xlu1 %v3727_v60, %s3840_s8  ;;  %3693 = vrot.lane.b32.xlu2 %v6702_v53, %s3840_s8  ;;  %v3566_v42 = vunpack.i.h.bf16 %v5093_v26 }
 0x32e   : > { %3673 = vrot.lane.b32.xlu0 %v4809_v32, %s3840_s8  ;;  %1010 = vmatpush.msra.mxu1 %v3471_v22  ;;  %v3829_v32 = vld [vmem:[%s4137_s30 + $0x18] sm:$0xff] }
 0x32f   : > { %v3464_v17 = vpop.permute.xlu0 %3463  ;;  %v1343_v2 = vadd.f32 %v3829_v32, %v1335_v21  ;;  %v3551_v32 = vunpack.i.h.bf16 %v5078_v34 }
 0x330   : > { %v5071_v38 = vpop.permute.xlu2 %3513  ;;  %v3465_v9 = vunpack.i.l.bf16 %v3464_v17  ;;  %v3466_v27 = vunpack.i.h.bf16 %v3464_v17 }
 0x331   : > { %v3687_v46 = vpack.i.bf16 %v1343_v2, %v3451_v8  ;;  %v3516_v13 = vunpack.i.h.bf16 %v5071_v38  ;;  %v3515_v14 = vunpack.i.l.bf16 %v5071_v38  ;;  %v3535_v38 = vunpack.i.l.bf16 %v5057_v31 }
 0x332   : > { %1028 = vmatpush.msra.mxu2 %v3465_v9  ;;  %1056 = vmatpush.msra.mxu3 %v3466_v27 }
 0x334   : > { %1029 = vmatpush.msra.mxu2 %v3475_v45  ;;  %1057 = vmatpush.msra.mxu3 %v3476_v48  ;;  %v3579_v35 = vpop.permute.xlu1 %3578 }
 0x335   : > { %3743 = vrot.lane.b32.xlu1 %v3742_v58, %s3840_s8  ;;  %3708 = vrot.lane.b32.xlu2 %v3707_v0, %s3840_s8  ;;  %v3580_v44 = vunpack.i.l.bf16 %v3579_v35  ;;  %v3581_v34 = vunpack.i.h.bf16 %v3579_v35 }
 0x336   : > { %3688 = vrot.lane.b32.xlu0 %v3687_v46, %s3840_s8  ;;  %1030 = vmatpush.msra.mxu2 %v3485_v3 }
 0x337   : > { %1058 = vmatpush.msra.mxu3 %v3486_v1  ;;  %v3479_v61 = vpop.permute.xlu0 %3478  ;;  %v6704_v1 = vld [vmem:[#allocation47_spill] sm:$0xff] }
 0x338   : > { %v5085_v19 = vpop.permute.xlu2 %3528  ;;  %v3480_v40 = vunpack.i.l.bf16 %v3479_v61  ;;  %v3481_v59 = vunpack.i.h.bf16 %v3479_v61  ;;  %v3565_v61 = vunpack.i.l.bf16 %v5093_v26 }
 0x339   : > { %v3530_v39 = vunpack.i.l.bf16 %v5085_v19  ;;  %v3531_v27 = vunpack.i.h.bf16 %v5085_v19 }
 0x33a   : > { %983 = vmatpush.msra.mxu0 %v3480_v40  ;;  %1011 = vmatpush.msra.mxu1 %v3481_v59 }
 0x33c   : > { %984 = vmatpush.msra.mxu0 %v3490_v51  ;;  %1012 = vmatpush.msra.mxu1 %v3491_v50  ;;  %v5115_v17 = vpop.permute.xlu1 %3593  ;;  %v3767_v50 = vpack.i.bf16 %v4670_v23, %v3565_v61 }
 0x33d   : > { %3723 = vrot.lane.b32.xlu2 %v3722_v36, %s3840_s8  ;;  %v3595_v26 = vunpack.i.l.bf16 %v5115_v17 }
 0x33e   : > { %3703 = vrot.lane.b32.xlu0 %v3702_v15, %s3840_s8  ;;  %1013 = vmatpush.msra.mxu1 %v3505_v41 }
 0x33f   : > { %v3494_v29 = vpop.permute.xlu0 %3493 }
 0x340   : > { %v3544_v25 = vpop.permute.xlu2 %3543  ;;  %1758 = vmatpush.msrb.mxu1 %v3516_v13  ;;  %v3495_v20 = vunpack.i.l.bf16 %v3494_v29  ;;  %v3496_v62 = vunpack.i.h.bf16 %v3494_v29 }
 0x341   : > { %v3545_v37 = vunpack.i.l.bf16 %v3544_v25  ;;  %v3546_v28 = vunpack.i.h.bf16 %v3544_v25 }
 0x342   : > { %1759 = vmatpush.msrb.mxu1 %v3530_v39  ;;  %1031 = vmatpush.msra.mxu2 %v3495_v20  ;;  %v3777_v39 = vpack.i.bf16 %v4690_v47, %v3566_v42 }
 0x343   : > { %1059 = vmatpush.msra.mxu3 %v3496_v62 }
 0x344   : > { %1760 = vmatpush.msrb.mxu1 %v3536_v30  ;;  %1032 = vmatpush.msra.mxu2 %v3506_v49 }
 0x345   : > { %3738 = vrot.lane.b32.xlu2 %v3737_v6, %s3840_s8 }
 0x346   : > { %1761 = vmatpush.msrb.mxu1 %v3550_v24  ;;  %3718 = vrot.lane.b32.xlu0 %v3717_v33, %s3840_s8 }
 0x347   : > { %v3509_v52 = vpop.permute.xlu0 %3508 }
 0x348   : > { %v3559_v60 = vpop.permute.xlu2 %3558  ;;  %v3511_v22 = vunpack.i.h.bf16 %v3509_v52  ;;  %v3510_v53 = vunpack.i.l.bf16 %v3509_v52 }
 0x349   : > { %v3561_v21 = vunpack.i.h.bf16 %v3559_v60  ;;  %v3560_v45 = vunpack.i.l.bf16 %v3559_v60 }
 0x34a   : > { %1033 = vmatpush.msra.mxu2 %v3511_v22  ;;  %1060 = vmatpush.msra.mxu3 %v3510_v53 }
 0x34b   : > { %1762 = vmatpush.msrb.mxu1 %v3561_v21 }
 0x34c   : > { %1061 = vmatpush.msra.mxu3 %v3515_v14 }
 0x34d   : > { %1763 = vmatpush.msrb.mxu1 %v3580_v44 }
 0x34e   : > { %3733 = vrot.lane.b32.xlu0 %v3732_v7, %s3840_s8 }
 0x34f   : > { %v3524_v5 = vpop.permute.xlu0 %3523 }
 0x350   : > { %v3574_v54 = vpop.permute.xlu2 %3573  ;;  %v3525_v8 = vunpack.i.l.bf16 %v3524_v5  ;;  %v3526_v9 = vunpack.i.h.bf16 %v3524_v5 }
 0x351   : > { %v3575_v31 = vunpack.i.l.bf16 %v3574_v54  ;;  %v3576_v18 = vunpack.i.h.bf16 %v3574_v54 }
 0x352   : > { %1034 = vmatpush.msra.mxu2 %v3525_v8  ;;  %1062 = vmatpush.msra.mxu3 %v3526_v9  ;;  %v3596_v9 = vunpack.i.h.bf16 %v5115_v17 }
 0x354   : > { %1035 = vmatpush.msra.mxu2 %v3531_v27  ;;  %1063 = vmatpush.msra.mxu3 %v3535_v38 }
 0x356   : > { %3748 = vrot.lane.b32.xlu0 %v3747_v56, %s3840_s8  ;;  %1036 = vmatpush.msra.mxu2 %v3545_v37  ;;  %v5149_v56 = vld [vmem:[%s6502_s2] sm:$0xff] }
 0x357   : > { %1064 = vmatpush.msra.mxu3 %v3546_v28  ;;  %v3539_v58 = vpop.permute.xlu0 %3538  ;;  %985 = vmatmul.f32.vlgmr.msra.gmra.mxu0 %v5149_v56 }
 0x358   : > { %v3589_v2 = vpop.permute.xlu2 %3588  ;;  %v3541_v0 = vunpack.i.h.bf16 %v3539_v58  ;;  %v3540_v48 = vunpack.i.l.bf16 %v3539_v58  ;;  %1037 = vmatpush.msra.mxu2 %v3551_v32 }
 0x359   : > { %v5123_v46 = vpop.permute.xlu1 %3608  ;;  %v3591_v63 = vunpack.i.h.bf16 %v3589_v2  ;;  %1065 = vmatpush.msra.mxu3 %v3560_v45  ;;  %v3590_v19 = vunpack.i.l.bf16 %v3589_v2  ;;  %v5158_v45 = vld [vmem:[%s6502_s2 + $0x28] sm:$0xff] }
 0x35a   : > { %v3757_v3 = vpack.i.bf16 %v3541_v0, %v4951_v11  ;;  %v3752_v57 = vpack.i.bf16 %v6704_v1, %v3540_v48  ;;  %1038 = vmatpush.msra.mxu2 %v3575_v31  ;;  %v3611_v21 = vunpack.i.h.bf16 %v5123_v46  ;;  %v5165_v1 = vld [vmem:[%s6502_s2 + $0x50] sm:$0xff] }
 0x35b   : > { %1764 = vmatpush.msrb.mxu1 %v3591_v63  ;;  %1066 = vmatpush.msra.mxu3 %v3576_v18 }
 0x35c   : > { %3758 = vrot.lane.b32.xlu1 %v3757_v3, %s3840_s8  ;;  %3753 = vrot.lane.b32.xlu2 %v3752_v57, %s3840_s8  ;;  %v3797_v37 = vpack.i.bf16 %v3611_v21, %v3596_v9 }
 0x35d   : > { %1039 = vmatpush.msra.mxu2 %v3581_v34  ;;  %1067 = vmatpush.msra.mxu3 %v3590_v19 }
 0x35f   : > { %v3554_v40 = vpop.permute.xlu0 %3553  ;;  %988 = vmatmul.f32.gmra.mxu0 %v5158_v45 }
 0x360   : > { %v3604_v10 = vpop.permute.xlu2 %3603  ;;  %v3555_v59 = vunpack.i.l.bf16 %v3554_v40  ;;  %v3556_v13 = vunpack.i.h.bf16 %v3554_v40  ;;  %v5171_v40 = vld [vmem:[%s6502_s2 + $0x10] sm:$0xff] }
 0x361   : > { %v3624_v16 = vpop.permute.xlu1 %3623  ;;  %v3605_v11 = vunpack.i.l.bf16 %v3604_v10  ;;  %v3606_v51 = vunpack.i.h.bf16 %v3604_v10 }
 0x362   : > { %v3762_v36 = vpack.i.bf16 %v3555_v59, %v4650_v55  ;;  %v3610_v55 = vunpack.i.l.bf16 %v5123_v46  ;;  %v3626_v14 = vunpack.i.h.bf16 %v3624_v16  ;;  %v3625_v54 = vunpack.i.l.bf16 %v3624_v16  ;;  %v5179_v16 = vld [vmem:[%s6502_s2 + $0x78] sm:$0xff] }
 0x363   : > { %1093 = vmatpush.msrb.mxu0 %v3605_v11  ;;  %1765 = vmatpush.msrb.mxu1 %v3606_v51  ;;  %v5184_v11 = vld [vmem:[%s6502_s2 + $0x18] sm:$0xff]  ;;  %v5191_v51 = vld [vmem:[%s6502_s2 + $0x8] sm:$0xff] }
 0x364   : > { %3763 = vrot.lane.b32.xlu0 %v3762_v36, %s3840_s8  ;;  %3768 = vrot.lane.b32.xlu2 %v3767_v50, %s3840_s8  ;;  %v3792_v47 = vpack.i.bf16 %v3610_v55, %v3595_v26 }
 0x365   : > { %1014 = vmatmul.f32.vlgmr.msra.gmra.mxu1 %v5191_v51 }
 0x367   : > { %v3569_v41 = vpop.permute.xlu0 %3568  ;;  %991 = vmatmul.f32.gmra.mxu0 %v5165_v1 }
 0x368   : > { %v3619_v15 = vpop.permute.xlu2 %3618  ;;  %v3570_v43 = vunpack.i.l.bf16 %v3569_v41  ;;  %v3571_v20 = vunpack.i.h.bf16 %v3569_v41  ;;  %v5199_v41 = vld [vmem:[%s6502_s2 + $0x38] sm:$0xff] }
 0x369   : > { %v3620_v25 = vunpack.i.l.bf16 %v3619_v15  ;;  %v3621_v29 = vunpack.i.h.bf16 %v3619_v15  ;;  %v3639_v23 = vpop.permute.xlu1 %3638 }
 0x36a   : > { %v3772_v4 = vpack.i.bf16 %v3570_v43, %v3556_v13  ;;  %v3641_v22 = vunpack.i.h.bf16 %v3639_v23  ;;  %v3640_v53 = vunpack.i.l.bf16 %v3639_v23  ;;  %v5213_v23 = vld [vmem:[%s6502_s2 + $0x30] sm:$0xff] }
 0x36b   : > { %1094 = vmatpush.msrb.mxu0 %v3620_v25  ;;  %1766 = vmatpush.msrb.mxu1 %v3621_v29  ;;  %v5205_v25 = vld [vmem:[%s6502_s2 + $0x40] sm:$0xff] }
 0x36c   : > { %3778 = vrot.lane.b32.xlu0 %v3777_v39, %s3840_s8  ;;  %3773 = vrot.lane.b32.xlu1 %v3772_v4, %s3840_s8  ;;  %v3807_v27 = vpack.i.bf16 %v3641_v22, %v3626_v14  ;;  %v3802_v38 = vpack.i.bf16 %v3640_v53, %v3625_v54  ;;  %v5249_v54 = vld [vmem:[%s6502_s2 + $0x88] sm:$0xff] }
 0x36d   : > { %1017 = vmatmul.f32.gmra.mxu1 %v5213_v23 }
 0x36f   : > { %v3584_v30 = vpop.permute.xlu0 %3583  ;;  %994 = vmatmul.f32.gmra.mxu0 %v5179_v16 }
 0x370   : > { %v3634_v62 = vpop.permute.xlu2 %3633  ;;  %v3586_v49 = vunpack.i.h.bf16 %v3584_v30  ;;  %v3585_v6 = vunpack.i.l.bf16 %v3584_v30 }
 0x371   : > { %v3635_v24 = vunpack.i.l.bf16 %v3634_v62  ;;  %v3636_v33 = vunpack.i.h.bf16 %v3634_v62  ;;  %v3654_v52 = vpop.permute.xlu1 %3653  ;;  %v5219_v62 = vld [vmem:[%s6502_s2 + $0x60] sm:$0xff] }
 0x372   : > { %v3787_v35 = vpack.i.bf16 %v3586_v49, %v4730_v12  ;;  %v3782_v60 = vpack.i.bf16 %v3571_v20, %v3585_v6 }
 0x373   : > { %1095 = vmatpush.msrb.mxu0 %v3635_v24  ;;  %1767 = vmatpush.msrb.mxu1 %v3636_v33  ;;  %v5227_v24 = vld [vmem:[%s6502_s2 + $0x68] sm:$0xff] }
 0x374   : > { %3793 = vrot.lane.b32.xlu0 %v3792_v47, %s3840_s8  ;;  %3788 = vrot.lane.b32.xlu1 %v3787_v35, %s3840_s8 }
 0x375   : > { %3783 = vrot.lane.b32.xlu2 %v3782_v60, %s3840_s8  ;;  %v5235_v60 = vld [vmem:[%s6502_s2 + $0x58] sm:$0xff] }
 0x376   : > { %1020 = vmatmul.f32.gmra.mxu1 %v5235_v60 }
 0x377   : > { %v3599_v7 = vpop.permute.xlu0 %3598 }
 0x378   : > { %v3649_v44 = vpop.permute.xlu2 %3648  ;;  %v3600_v5 = vunpack.i.l.bf16 %v3599_v7  ;;  %v3601_v12 = vunpack.i.h.bf16 %v3599_v7 }
 0x379   : > { %v3650_v8 = vunpack.i.l.bf16 %v3649_v44  ;;  %v3669_v17 = vpop.permute.xlu1 %3668  ;;  %v3651_v18 = vunpack.i.h.bf16 %v3649_v44  ;;  %v5243_v44 = vld [vmem:[%s6502_s2 + $0x20] sm:$0xff] }
 0x37a   : > { %1040 = vmatpush.msra.mxu2 %v3600_v5  ;;  %1068 = vmatpush.msra.mxu3 %v3601_v12  ;;  %v3670_v13 = vunpack.i.l.bf16 %v3669_v17  ;;  %v3671_v43 = vunpack.i.h.bf16 %v3669_v17  ;;  %v5255_v12 = vld [vmem:[%s6502_s2 + $0x90] sm:$0xff] }
 0x37b   : > { %1768 = vmatpush.msrb.mxu1 %v3650_v8 }
 0x37c   : > { %3808 = vrot.lane.b32.xlu0 %v3807_v27, %s3840_s8  ;;  %3803 = vrot.lane.b32.xlu1 %v3802_v38, %s3840_s8 }
 0x37d   : > { %3798 = vrot.lane.b32.xlu2 %v3797_v37, %s3840_s8  ;;  %v5266_v37 = vld [vmem:[%s6502_s2 + $0x80] sm:$0xff] }
 0x37e   : > { %1023 = vmatmul.f32.gmra.mxu1 %v5266_v37 }
 0x37f   : > { %v3614_v32 = vpop.permute.xlu0 %3613 }
 0x380   : > { %v3664_v28 = vpop.permute.xlu2 %3663  ;;  %v3615_v2 = vunpack.i.l.bf16 %v3614_v32  ;;  %v3616_v58 = vunpack.i.h.bf16 %v3614_v32 }
 0x381   : > { %v3684_v63 = vpop.permute.xlu1 %3683  ;;  %v3665_v3 = vunpack.i.l.bf16 %v3664_v28  ;;  %v3666_v10 = vunpack.i.h.bf16 %v3664_v28 }
 0x382   : > { %1041 = vmatpush.msra.mxu2 %v3615_v2  ;;  %1069 = vmatpush.msra.mxu3 %v3616_v58  ;;  %v3685_v30 = vunpack.i.l.bf16 %v3684_v63  ;;  %v3686_v49 = vunpack.i.h.bf16 %v3684_v63  ;;  %v5272_v58 = vld [vmem:[%s6502_s2 + $0x48] sm:$0xff] }
 0x385   : > { %3813 = vrot.lane.b32.xlu2 %v3654_v52, %s3840_s8 }
 0x387   : > { %v3629_v48 = vpop.permute.xlu0 %3628 }
 0x388   : > { %v3679_v0 = vpop.permute.xlu2 %3678  ;;  %v3630_v46 = vunpack.i.l.bf16 %v3629_v48  ;;  %v3631_v31 = vunpack.i.h.bf16 %v3629_v48 }
 0x389   : > { %v5173_v59 = vpop.permute.xlu1 %3698  ;;  %v3680_v29 = vunpack.i.l.bf16 %v3679_v0  ;;  %v3681_v39 = vunpack.i.h.bf16 %v3679_v0 }
 0x38a   : > { %1042 = vmatpush.msra.mxu2 %v3630_v46  ;;  %1070 = vmatpush.msra.mxu3 %v3631_v31  ;;  %v3701_v52 = vunpack.i.h.bf16 %v5173_v59  ;;  %v3700_v5 = vunpack.i.l.bf16 %v5173_v59 }
 0x38b   : > { %1043 = vmatmul.f32.vlgmr.msra.gmra.mxu2 %v5171_v40 }
 0x38c   : > { %1787 = vmatpush.msrb.mxu2 %v3651_v18 }
 0x38e   : > { %1788 = vmatpush.msrb.mxu2 %v3665_v3 }
 0x38f   : > { %v3644_v34 = vpop.permute.xlu0 %3643 }
 0x390   : > { %v3694_v57 = vpop.permute.xlu2 %3693  ;;  %v3645_v19 = vunpack.i.l.bf16 %v3644_v34  ;;  %v3646_v61 = vunpack.i.h.bf16 %v3644_v34  ;;  %v5282_v34 = vld [vmem:[%s6502_s2 + $0x70] sm:$0xff] }
 0x391   : > { %v5207_v4 = vpop.permute.xlu1 %3713  ;;  %v3695_v33 = vunpack.i.l.bf16 %v3694_v57  ;;  %v3696_v47 = vunpack.i.h.bf16 %v3694_v57 }
 0x392   : > { %1071 = vmatpush.msra.mxu3 %v3645_v19  ;;  %1096 = vmatpush.msrb.mxu0 %v3646_v61  ;;  %v3716_v7 = vunpack.i.h.bf16 %v5207_v4  ;;  %v3715_v48 = vunpack.i.l.bf16 %v5207_v4 }
 0x393   : > { %1072 = vmatmul.f32.vlgmr.msra.gmra.mxu3 %v5184_v11  ;;  %1046 = vmatmul.f32.gmra.mxu2 %v5199_v41 }
 0x394   : > { %1816 = vmatpush.msrb.mxu3 %v3666_v10 }
 0x397   : > { %v3659_v50 = vpop.permute.xlu0 %3658 }
 0x398   : > { %v3660_v36 = vunpack.i.l.bf16 %v3659_v50  ;;  %v3661_v42 = vunpack.i.h.bf16 %v3659_v50  ;;  %v5194_v15 = vpop.permute.xlu2 %3708  ;;  %v5292_v50 = vld [vmem:[%s6502_s2 + $0x98] sm:$0xff] }
 0x399   : > { %v3710_v53 = vunpack.i.l.bf16 %v5194_v15  ;;  %v3711_v46 = vunpack.i.h.bf16 %v5194_v15 }
 0x39a   : > { %1097 = vmatpush.msrb.mxu0 %v3660_v36  ;;  %1769 = vmatpush.msrb.mxu1 %v3661_v42 }
 0x39b   : > { %1075 = vmatmul.f32.gmra.mxu3 %v5205_v25  ;;  %1049 = vmatmul.f32.gmra.mxu2 %v5219_v62 }
 0x39c   : > { %1098 = vmatpush.msrb.mxu0 %v3670_v13  ;;  %1770 = vmatpush.msrb.mxu1 %v3671_v43 }
 0x39e   : > { %1099 = vmatpush.msrb.mxu0 %v3680_v29  ;;  %1771 = vmatpush.msrb.mxu1 %v3681_v39 }
 0x39f   : > { %v5229_v35 = vpop.permute.xlu1 %3728 }
 0x3a0   : > { %v3674_v55 = vpop.permute.xlu0 %3673  ;;  %v5221_v6 = vpop.permute.xlu2 %3723  ;;  %v3731_v27 = vunpack.i.h.bf16 %v5229_v35  ;;  %v3730_v19 = vunpack.i.l.bf16 %v5229_v35 }
 0x3a1   : > { %v3675_v26 = vunpack.i.l.bf16 %v3674_v55  ;;  %v3676_v20 = vunpack.i.h.bf16 %v3674_v55  ;;  %v3725_v8 = vunpack.i.l.bf16 %v5221_v6  ;;  %v3726_v61 = vunpack.i.h.bf16 %v5221_v6 }
 0x3a3   : > { %1789 = vmatpush.msrb.mxu2 %v3675_v26  ;;  %1817 = vmatpush.msrb.mxu3 %v3676_v20 }
 0x3a4   : > { %1078 = vmatmul.f32.gmra.mxu3 %v5227_v24  ;;  %1052 = vmatmul.f32.gmra.mxu2 %v5249_v54 }
 0x3a5   : > { %1790 = vmatpush.msrb.mxu2 %v3685_v30  ;;  %1818 = vmatpush.msrb.mxu3 %v3686_v49 }
 0x3a7   : > { %1791 = vmatpush.msrb.mxu2 %v3695_v33  ;;  %1819 = vmatpush.msrb.mxu3 %v3696_v47  ;;  %v3744_v38 = vpop.permute.xlu1 %3743 }
 0x3a8   : > { %v3689_v22 = vpop.permute.xlu0 %3688  ;;  %v3739_v9 = vpop.permute.xlu2 %3738  ;;  %v3746_v0 = vunpack.i.h.bf16 %v3744_v38  ;;  %v3745_v36 = vunpack.i.l.bf16 %v3744_v38 }
 0x3a9   : > { %1792 = vmatpush.msrb.mxu2 %v3701_v52  ;;  %v3690_v21 = vunpack.i.l.bf16 %v3689_v22  ;;  %v3691_v14 = vunpack.i.h.bf16 %v3689_v22  ;;  %v3740_v28 = vunpack.i.l.bf16 %v3739_v9  ;;  %v3741_v42 = vunpack.i.h.bf16 %v3739_v9 }
 0x3ab   : > { %1793 = vmatpush.msrb.mxu2 %v3710_v53  ;;  %1100 = vmatpush.msrb.mxu0 %v3690_v21 }
 0x3ac   : > { %1772 = vmatpush.msrb.mxu1 %v3691_v14  ;;  %3159 = vmatmul.msk.f32.vlgmr.msrb.gmra.mxu0 %vm956_vm5, %v5243_v44 }
 0x3ad   : > { %1794 = vmatpush.msrb.mxu2 %v3716_v7  ;;  %1081 = vmatmul.f32.gmra.mxu3 %v5255_v12 }
 0x3ae   : > { %1773 = vmatpush.msrb.mxu1 %v3700_v5 }
 0x3af   : > { %1795 = vmatpush.msrb.mxu2 %v3725_v8  ;;  %1774 = vmatmul.f32.vlgmr.msrb.gmra.mxu1 %v5149_v56 }
 0x3b0   : > { %v3704_v17 = vpop.permute.xlu0 %3703 }
 0x3b1   : > { %1796 = vmatpush.msrb.mxu2 %v3731_v27  ;;  %v3706_v32 = vunpack.i.h.bf16 %v3704_v17  ;;  %v3705_v2 = vunpack.i.l.bf16 %v3704_v17 }
 0x3b3   : > { %1797 = vmatpush.msrb.mxu2 %v3740_v28  ;;  %1820 = vmatpush.msrb.mxu3 %v3705_v2 }
 0x3b4   : > { %1845 = vmatpush.msra.mxu0 %v3706_v32 }
 0x3b5   : > { %1798 = vmatpush.msrb.mxu2 %v3746_v0  ;;  %3160 = vmatmul.msk.f32.gmra.mxu0 %vm956_vm5, %v5272_v58 }
 0x3b6   : > { %1821 = vmatpush.msrb.mxu3 %v3711_v46  ;;  %1846 = vmatpush.msra.mxu0 %v3715_v48  ;;  %v3754_v31 = vpop.permute.xlu2 %3753 }
 0x3b7   : > { %v3755_v63 = vunpack.i.l.bf16 %v3754_v31  ;;  %1777 = vmatmul.f32.gmra.mxu1 %v5158_v45  ;;  %v3756_v43 = vunpack.i.h.bf16 %v3754_v31 }
 0x3b8   : > { %v3719_v18 = vpop.permute.xlu0 %3718 }
 0x3b9   : > { %v3721_v3 = vunpack.i.h.bf16 %v3719_v18  ;;  %1799 = vmatpush.msrb.mxu2 %v3755_v63  ;;  %v3720_v57 = vunpack.i.l.bf16 %v3719_v18 }
 0x3bb   : > { %1822 = vmatpush.msrb.mxu3 %v3720_v57  ;;  %1847 = vmatpush.msra.mxu0 %v3721_v3 }
 0x3bd   : > { %3161 = vmatmul.msk.f32.gmra.mxu0 %vm956_vm5, %v5282_v34  ;;  %1823 = vmatpush.msrb.mxu3 %v3726_v61 }
 0x3be   : > { %1848 = vmatpush.msra.mxu0 %v3730_v19  ;;  %v3769_v29 = vpop.permute.xlu2 %3768 }
 0x3bf   : > { %1780 = vmatmul.f32.gmra.mxu1 %v5165_v1  ;;  %v3770_v26 = vunpack.i.l.bf16 %v3769_v29  ;;  %v3771_v1 = vunpack.i.h.bf16 %v3769_v29 }
 0x3c0   : > { %v3734_v56 = vpop.permute.xlu0 %3733 }
 0x3c1   : > { %v3736_v10 = vunpack.i.h.bf16 %v3734_v56  ;;  %v3735_v59 = vunpack.i.l.bf16 %v3734_v56 }
 0x3c3   : > { %1824 = vmatpush.msrb.mxu3 %v3735_v59  ;;  %1849 = vmatpush.msra.mxu0 %v3736_v10 }
 0x3c5   : > { %3162 = vmatmul.msk.f32.gmra.mxu0 %vm956_vm5, %v5292_v50  ;;  %1825 = vmatpush.msrb.mxu3 %v3741_v42 }
 0x3c6   : > { %1850 = vmatpush.msra.mxu0 %v3745_v36 }
 0x3c7   : > { %1783 = vmatmul.f32.gmra.mxu1 %v5179_v16 }
 0x3c8   : > { %v3749_v15 = vpop.permute.xlu0 %3748 }
 0x3c9   : > { %v3751_v45 = vunpack.i.h.bf16 %v3749_v15  ;;  %v3750_v13 = vunpack.i.l.bf16 %v3749_v15 }
 0x3cb   : > { %1826 = vmatpush.msrb.mxu3 %v3750_v13  ;;  %1851 = vmatpush.msra.mxu0 %v3751_v45 }
 0x3cd   : > { %1827 = vmatpush.msrb.mxu3 %v3756_v43 }
 0x3ce   : > { %v3759_v39 = vpop.permute.xlu1 %3758 }
 0x3cf   : > { %v3760_v4 = vunpack.i.l.bf16 %v3759_v39  ;;  %v3761_v55 = vunpack.i.h.bf16 %v3759_v39  ;;  %v3784_v6 = vpop.permute.xlu2 %3783 }
 0x3d0   : > { %v3786_v16 = vunpack.i.h.bf16 %v3784_v6  ;;  %v3785_v21 = vunpack.i.l.bf16 %v3784_v6 }
 0x3d1   : > { %1800 = vmatpush.msrb.mxu2 %v3761_v55  ;;  %1852 = vmatpush.msra.mxu0 %v3760_v4 }
 0x3d3   : > { %1801 = vmatpush.msrb.mxu2 %v3770_v26 }
 0x3d6   : > { %v3764_v20 = vpop.permute.xlu0 %3763 }
 0x3d7   : > { %v3766_v30 = vunpack.i.h.bf16 %v3764_v20  ;;  %v3765_v49 = vunpack.i.l.bf16 %v3764_v20  ;;  %v3799_v5 = vpop.permute.xlu2 %3798 }
 0x3d8   : > { %v3800_v17 = vunpack.i.l.bf16 %v3799_v5  ;;  %v3801_v28 = vunpack.i.h.bf16 %v3799_v5 }
 0x3d9   : > { %1828 = vmatpush.msrb.mxu3 %v3765_v49  ;;  %1853 = vmatpush.msra.mxu0 %v3766_v30 }
 0x3db   : > { %1829 = vmatpush.msrb.mxu3 %v3771_v1 }
 0x3de   : > { %v3779_v33 = vpop.permute.xlu0 %3778  ;;  %v3774_v47 = vpop.permute.xlu1 %3773 }
 0x3df   : > { %v3776_v35 = vunpack.i.h.bf16 %v3774_v47  ;;  %v3775_v52 = vunpack.i.l.bf16 %v3774_v47  ;;  %v3780_v22 = vunpack.i.l.bf16 %v3779_v33  ;;  %v3781_v53 = vunpack.i.h.bf16 %v3779_v33  ;;  %v3814_v48 = vpop.permute.xlu2 %3813 }
 0x3e1   : > { %1802 = vmatpush.msrb.mxu2 %v3780_v22  ;;  %1830 = vmatpush.msrb.mxu3 %v3781_v53 }
 0x3e2   : > { %1854 = vmatpush.msra.mxu0 %v3775_v52  ;;  %1882 = vmatpush.msra.mxu1 %v3776_v35 }
 0x3e3   : > { %1803 = vmatmul.f32.vlgmr.msrb.gmra.mxu2 %v5191_v51 }
 0x3e4   : > { %1855 = vmatpush.msra.mxu0 %v3785_v21  ;;  %1883 = vmatpush.msra.mxu1 %v3786_v16 }
 0x3e6   : > { %v3794_v14 = vpop.permute.xlu0 %3793  ;;  %v3789_v7 = vpop.permute.xlu1 %3788 }
 0x3e7   : > { %v3795_v8 = vunpack.i.l.bf16 %v3794_v14  ;;  %v3791_v9 = vunpack.i.h.bf16 %v3789_v7  ;;  %v3790_v27 = vunpack.i.l.bf16 %v3789_v7  ;;  %v3796_v38 = vunpack.i.h.bf16 %v3794_v14 }
 0x3e9   : > { %1831 = vmatpush.msrb.mxu3 %v3790_v27  ;;  %1856 = vmatpush.msra.mxu0 %v3791_v9 }
 0x3ea   : > { %1884 = vmatpush.msra.mxu1 %v3795_v8  ;;  %1832 = vmatmul.f32.vlgmr.msrb.gmra.mxu3 %v5171_v40  ;;  %v3815_v40 = vunpack.i.l.bf16 %v3814_v48 }
 0x3eb   : > { %1806 = vmatmul.f32.gmra.mxu2 %v5213_v23  ;;  %1857 = vmatpush.msra.mxu0 %v3796_v38  ;;  %v3816_v23 = vunpack.i.h.bf16 %v3814_v48 }
 0x3ec   : > { %1885 = vmatpush.msra.mxu1 %v3800_v17 }
 0x3ed   : > { %1858 = vmatpush.msra.mxu0 %v3801_v28 }
 0x3ee   : > { %v3809_v51 = vpop.permute.xlu0 %3808  ;;  %v3804_v32 = vpop.permute.xlu1 %3803 }
 0x3ef   : > { %v3806_v2 = vunpack.i.h.bf16 %v3804_v32  ;;  %v3805_v0 = vunpack.i.l.bf16 %v3804_v32  ;;  %v3811_v46 = vunpack.i.h.bf16 %v3809_v51  ;;  %v3810_v31 = vunpack.i.l.bf16 %v3809_v51 }
 0x3f1   : > { %1859 = vmatpush.msra.mxu0 %v3806_v2  ;;  %1886 = vmatpush.msra.mxu1 %v3805_v0 }
 0x3f2   : > { %1835 = vmatmul.f32.gmra.mxu3 %v5199_v41  ;;  %v1015_v41 = vpop.f32.mrf.mxu1 }
 0x3f3   : > { %1809 = vmatmul.f32.gmra.mxu2 %v5235_v60  ;;  %1860 = vmatpush.msra.mxu0 %v3811_v46 }
 0x3f4   : > { %1887 = vmatpush.msra.mxu1 %v3810_v31  ;;  %1861 = vmatmul.f32.vlgmr.msra.gmra.mxu0 %v5184_v11  ;;  %v986_v11 = vpop.f32.mrf.mxu0 }
 0x3f5   : > { %v1016_v27 = vadd.f32 %v1015_v41, %v986_v11  ;;  %v1121_v11 = vld [vmem:[%s6503_s3 + $0x18] sm:$0xff] }
 0x3f6   : > { %1888 = vmatpush.msra.mxu1 %v3815_v40 }
 0x3f8   : > { %1889 = vmatpush.msra.mxu1 %v3816_v23 }
 0x3f9   : > { %3163 = vmatmul.msk.f32.vlgmr.msra.gmra.mxu1 %vm956_vm5, %v5243_v44 }
 0x3fa   : > { %1838 = vmatmul.f32.gmra.mxu3 %v5219_v62  ;;  %v1018_v60 = vpop.f32.mrf.mxu1 }
 0x3fb   : > { %1812 = vmatmul.f32.gmra.mxu2 %v5266_v37 }
 0x3fc   : > { %1864 = vmatmul.f32.gmra.mxu0 %v5205_v25  ;;  %v989_v62 = vpop.f32.mrf.mxu0 }
 0x3fd   : > { %v1019_v16 = vadd.f32 %v1018_v60, %v989_v62 }
 0x401   : > { %3164 = vmatmul.msk.f32.gmra.mxu1 %vm956_vm5, %v5272_v58 }
 0x402   : > { %1841 = vmatmul.f32.gmra.mxu3 %v5249_v54  ;;  %v1021_v44 = vpop.f32.mrf.mxu1 }
 0x404   : > { %1867 = vmatmul.f32.gmra.mxu0 %v5227_v24  ;;  %v992_v25 = vpop.f32.mrf.mxu0 }
 0x405   : > { %v1022_v47 = vadd.f32 %v1021_v44, %v992_v25 }
 0x409   : > { %3165 = vmatmul.msk.f32.gmra.mxu1 %vm956_vm5, %v5282_v34 }
 0x40a   : > { %v1024_v63 = vpop.f32.mrf.mxu1 }
 0x40c   : > { %1870 = vmatmul.f32.gmra.mxu0 %v5255_v12  ;;  %v995_v37 = vpop.f32.mrf.mxu0 }
 0x40d   : > { %v1025_v49 = vadd.f32 %v1024_v63, %v995_v37 }
 0x40e   : > { %v1044_v58 = vpop.f32.mrf.mxu2 }
 0x40f   : > { %v1045_v23 = vadd.f32 %v1044_v58, %v1016_v27  ;;  %v1946_v27 = vld [vmem:[%s6504_s4 + $0x118] sm:$0xff] }
 0x411   : > { %3166 = vmatmul.msk.f32.gmra.mxu1 %vm956_vm5, %v5292_v50 }
 0x416   : > { %v5318_v54 = vpop.f32.mrf.mxu3  ;;  %v1047_v18 = vpop.f32.mrf.mxu2 }
 0x417   : > { %v1048_v2 = vadd.f32 %v1047_v18, %v1019_v16  ;;  %v1120_v18 = vld [vmem:[%s6503_s3 + $0x10] sm:$0xff]  ;;  %v1975_v16 = vld [vmem:[%s6504_s4 + $0x200] sm:$0xff] }
 0x41e   : > { %v1076_v57 = vpop.f32.mrf.mxu3  ;;  %v1050_v34 = vpop.f32.mrf.mxu2 }
 0x41f   : > { %v1051_v38 = vadd.f32 %v1050_v34, %v1022_v47  ;;  %v1077_v41 = vadd.f32 %v1076_v57, %v1048_v2  ;;  %v1074_v34 = vadd.f32 %v5318_v54, %v1045_v23  ;;  %v1118_v54 = vld [vmem:[%s6503_s3] sm:$0xff]  ;;  %v2012_v2 = vld [vmem:[%s6504_s4 + $0x328] sm:$0xff]  ;;  %v1949_v23 = vld [vmem:[%s6504_s4 + $0x130] sm:$0xff] }
 0x420   : > { %v1943_v47 = vld [vmem:[%s6504_s4 + $0x100] sm:$0xff] }
 0x427   : > { %v1079_v61 = vpop.f32.mrf.mxu3  ;;  %v1053_v10 = vpop.f32.mrf.mxu2 }
 0x428   : > { %v1054_v21 = vadd.f32 %v1053_v10, %v1025_v49  ;;  %v1080_v62 = vadd.f32 %v1079_v61, %v1051_v38  ;;  %v1119_v10 = vld [vmem:[%s6503_s3 + $0x8] sm:$0xff]  ;;  %v1942_v49 = vld [vmem:[%s6504_s4 + $0xf8] sm:$0xff]  ;;  %v1977_v38 = vld [vmem:[%s6504_s4 + $0x210] sm:$0xff] }
 0x429   : > { %v5320_v24 = vpop.f32.mrf.mxu0 }
 0x42c   : > { %v1775_v3 = vpop.f32.mrf.mxu1 }
 0x430   : > { %v1082_v50 = vpop.f32.mrf.mxu3 }
 0x431   : > { %v1083_v48 = vadd.f32 %v1082_v50, %v1054_v21  ;;  %v2009_v21 = vld [vmem:[%s6504_s4 + $0x310] sm:$0xff] }
 0x432   : > { %v5322_v12 = vpop.f32.mrf.mxu0 }
 0x433   : > { %v1106_v57 = vadd.f32 %v5322_v12, %v1077_v41  ;;  %v2015_v41 = vld [vmem:[%s6504_s4 + $0x340] sm:$0xff] }
 0x434   : > { %v1778_v19 = vpop.f32.mrf.mxu1 }
 0x43a   : > { %v1108_v56 = vpop.f32.mrf.mxu0 }
 0x43c   : > { %v1781_v59 = vpop.f32.mrf.mxu1 }
 0x442   : > { %v1111_v42 = vpop.f32.mrf.mxu0 }
 0x443   : > { %v1112_v37 = vadd.f32 %v1111_v42, %v1083_v48  ;;  %v1948_v48 = vld [vmem:[%s6504_s4 + $0x128] sm:$0xff] }
 0x444   : > { %v1784_v15 = vpop.f32.mrf.mxu1 }
 0x466   : > { %v1804_v36 = vpop.f32.mrf.mxu2 }
 0x467   : > { %v1805_v7 = vadd.f32 %v1804_v36, %v1775_v3 }
 0x46d   : > { %v1833_v45 = vpop.f32.mrf.mxu3 }
 0x46e   : > { %v1807_v43 = vpop.f32.mrf.mxu2  ;;  %v1834_v17 = vadd.f32 %v1833_v45, %v1805_v7  ;;  %v1945_v7 = vld [vmem:[%s6504_s4 + $0x110] sm:$0xff] }
 0x46f   : > { %v1808_v52 = vadd.f32 %v1807_v43, %v1778_v19  ;;  %v1109_v19 = vadd.f32 %v1108_v56, %v1080_v62  ;;  %v1103_v56 = vadd.f32 %v5320_v24, %v1074_v34  ;;  %v1980_v62 = vld [vmem:[%s6504_s4 + $0x228] sm:$0xff]  ;;  %v1922_v34 = vld [vmem:[%s6504_s4 + $0x58] sm:$0xff] }
 0x471   : > { %v1862_v13 = vpop.f32.mrf.mxu0  ;;  %v1116_v36 = vmul.f32 0.00390625, %v1109_v19  ;;  %v1114_v45 = vmul.f32 0.00390625, %v1103_v56  ;;  %v1952_v19 = vld [vmem:[%s6504_s4 + $0x148] sm:$0xff]  ;;  %v2019_v56 = vld [vmem:[%s6504_s4 + $0x360] sm:$0xff] }
 0x472   : > { %v1863_v46 = vadd.f32 %v1862_v13, %v1834_v17  ;;  %v2011_v17 = vld [vmem:[%s6504_s4 + $0x320] sm:$0xff] }
 0x473   : > { %v1124_v13 = vadd.f32 %v1120_v18, %v1116_v36  ;;  %v1122_v24 = vadd.f32 %v1118_v54, %v1114_v45  ;;  %v1924_v36 = vld [vmem:[%s6504_s4 + $0x68] sm:$0xff]  ;;  %v1925_v45 = vld [vmem:[%s6504_s4 + $0x70] sm:$0xff] }
 0x475   : > { %v1836_v29 = vpop.f32.mrf.mxu3 }
 0x476   : > { %v1891_v39 = vpop.f32.mrf.mxu1  ;;  %v1810_v55 = vpop.f32.mrf.mxu2  ;;  %v1837_v5 = vadd.f32 %v1836_v29, %v1808_v52  ;;  %v1971_v29 = vld [vmem:[%s6504_s4 + $0x1e0] sm:$0xff]  ;;  %v2008_v52 = vld [vmem:[%s6504_s4 + $0x308] sm:$0xff] }
 0x477   : > { %v1811_v33 = vadd.f32 %v1810_v55, %v1781_v59  ;;  %v1892_v60 = vadd.f32 %v1891_v39, %v1863_v46  ;;  %v1117_v59 = vmul.f32 0.00390625, %v1112_v37  ;;  %v2005_v39 = vld [vmem:[%s6504_s4 + $0x2f0] sm:$0xff]  ;;  %v1979_v46 = vld [vmem:[%s6504_s4 + $0x220] sm:$0xff] }
 0x478   : > { %v1941_v55 = vld [vmem:[%s6504_s4 + $0xf0] sm:$0xff] }
 0x479   : > { %v1865_v4 = vpop.f32.mrf.mxu0  ;;  %v1903_v58 = vmul.f32 0.00390625, %v1892_v60  ;;  %v1125_v12 = vadd.f32 %v1121_v11, %v1117_v59  ;;  %v2014_v60 = vld [vmem:[%s6504_s4 + $0x338] sm:$0xff]  ;;  %v1921_v37 = vld [vmem:[%s6504_s4 + $0x50] sm:$0xff]  ;;  %v1923_v59 = vld [vmem:[%s6504_s4 + $0x60] sm:$0xff] }
 0x47a   : > { %v1866_v28 = vadd.f32 %v1865_v4, %v1837_v5  ;;  %v1911_v4 = vld [vmem:[%s6504_s4] sm:$0xff]  ;;  %v1976_v5 = vld [vmem:[%s6504_s4 + $0x208] sm:$0xff] }
 0x47b   : > { %v1907_v42 = vadd.f32 %v1903_v58, %v1118_v54  ;;  %v1983_v58 = vld [vmem:[%s6504_s4 + $0x240] sm:$0xff]  ;;  %v1985_v54 = vld [vmem:[%s6504_s4 + $0x250] sm:$0xff] }
 0x47d   : > { %v1839_v26 = vpop.f32.mrf.mxu3 }
 0x47e   : > { %v1894_v20 = vpop.f32.mrf.mxu1  ;;  %v1813_v1 = vpop.f32.mrf.mxu2  ;;  %v1840_v53 = vadd.f32 %v1839_v26, %v1811_v33  ;;  %v1972_v26 = vld [vmem:[%s6504_s4 + $0x1e8] sm:$0xff]  ;;  %v1913_v33 = vld [vmem:[%s6504_s4 + $0x10] sm:$0xff] }
 0x47f   : > { %v1814_v22 = vadd.f32 %v1813_v1, %v1784_v15  ;;  %v1895_v31 = vadd.f32 %v1894_v20, %v1866_v28  ;;  %v1115_v15 = vmul.f32 0.00390625, %v1106_v57  ;;  %v2006_v20 = vld [vmem:[%s6504_s4 + $0x2f8] sm:$0xff]  ;;  %v1973_v1 = vld [vmem:[%s6504_s4 + $0x1f0] sm:$0xff] }
 0x480   : > { %v1917_v28 = vld [vmem:[%s6504_s4 + $0x30] sm:$0xff]  ;;  %v2018_v57 = vld [vmem:[%s6504_s4 + $0x358] sm:$0xff] }
 0x481   : > { %v1868_v30 = vpop.f32.mrf.mxu0  ;;  %v1904_v63 = vmul.f32 0.00390625, %v1895_v31  ;;  %v1123_v43 = vadd.f32 %v1119_v10, %v1115_v15  ;;  %v2013_v31 = vld [vmem:[%s6504_s4 + $0x330] sm:$0xff]  ;;  %v1986_v15 = vld [vmem:[%s6504_s4 + $0x258] sm:$0xff] }
 0x482   : > { %v1869_v8 = vadd.f32 %v1868_v30, %v1840_v53  ;;  %v1912_v30 = vld [vmem:[%s6504_s4 + $0x8] sm:$0xff] }
 0x483   : > { %v1908_v50 = vadd.f32 %v1904_v63, %v1119_v10  ;;  %v1944_v53 = vld [vmem:[%s6504_s4 + $0x108] sm:$0xff]  ;;  %v1951_v63 = vld [vmem:[%s6504_s4 + $0x140] sm:$0xff] }
 0x484   : > { %v1984_v10 = vld [vmem:[%s6504_s4 + $0x248] sm:$0xff] }
 0x485   : > { %v1842_v35 = vpop.f32.mrf.mxu3 }
 0x486   : > { %v1897_v6 = vpop.f32.mrf.mxu1  ;;  %v1843_v9 = vadd.f32 %v1842_v35, %v1814_v22  ;;  %v1974_v35 = vld [vmem:[%s6504_s4 + $0x1f8] sm:$0xff] }
 0x487   : > { %v1898_v51 = vadd.f32 %v1897_v6, %v1869_v8  ;;  %v2007_v6 = vld [vmem:[%s6504_s4 + $0x300] sm:$0xff]  ;;  %v1914_v22 = vld [vmem:[%s6504_s4 + $0x18] sm:$0xff] }
 0x488   : > { %v2010_v8 = vld [vmem:[%s6504_s4 + $0x318] sm:$0xff] }
 0x489   : > { %v1871_v14 = vpop.f32.mrf.mxu0  ;;  %v1905_v25 = vmul.f32 0.00390625, %v1898_v51  ;;  %v1947_v51 = vld [vmem:[%s6504_s4 + $0x120] sm:$0xff] }
 0x48a   : > { %v1872_v32 = vadd.f32 %v1871_v14, %v1843_v9  ;;  %v1915_v14 = vld [vmem:[%s6504_s4 + $0x20] sm:$0xff]  ;;  %v1916_v9 = vld [vmem:[%s6504_s4 + $0x28] sm:$0xff] }
 0x48b   : > { %v1909_v61 = vadd.f32 %v1905_v25, %v1120_v18  ;;  %v1920_v25 = vld [vmem:[%s6504_s4 + $0x48] sm:$0xff] }
 0x48c   : > { %v2016_v18 = vld [vmem:[%s6504_s4 + $0x348] sm:$0xff] }
 0x48e   : > { %v1900_v0 = vpop.f32.mrf.mxu1 }
 0x48f   : > { %v1901_v40 = vadd.f32 %v1900_v0, %v1872_v32  ;;  %v1978_v32 = vld [vmem:[%s6504_s4 + $0x218] sm:$0xff] }
 0x490   : > { %v1918_v0 = vld [vmem:[%s6504_s4 + $0x38] sm:$0xff] }
 0x491   : > { %v1906_v44 = vmul.f32 0.00390625, %v1901_v40  ;;  %v1919_v40 = vld [vmem:[%s6504_s4 + $0x40] sm:$0xff] }
 0x493   : > { %v1910_v3 = vadd.f32 %v1906_v44, %v1121_v11  ;;  %v1950_v44 = vld [vmem:[%s6504_s4 + $0x138] sm:$0xff]  ;;  %v1981_v11 = vld [vmem:[%s6504_s4 + $0x230] sm:$0xff] }
 0x495   : > { %2559 = vmatpush.msrb.mxu0 %v1910_v3  ;;  %3300 = vmatpush.msrb.mxu1 %v1910_v3 }
 0x496   : > { %3301 = vmatpush.msra.mxu2 %v1910_v3  ;;  %3302 = vmatpush.msra.mxu3 %v1910_v3  ;;  %v1982_v3 = vld [vmem:[%s6504_s4 + $0x238] sm:$0xff] }
 0x497   : > { %2560 = vmatpush.msrb.mxu0 %v1909_v61  ;;  %3303 = vmatpush.msrb.mxu1 %v1909_v61 }
 0x498   : > { %3304 = vmatpush.msra.mxu2 %v1909_v61  ;;  %3305 = vmatpush.msra.mxu3 %v1909_v61  ;;  %v2017_v61 = vld [vmem:[%s6504_s4 + $0x350] sm:$0xff] }
 0x499   : > { %2561 = vmatpush.msrb.mxu0 %v1908_v50  ;;  %3306 = vmatpush.msrb.mxu1 %v1908_v50 }
 0x49a   : > { %3307 = vmatpush.msra.mxu2 %v1908_v50  ;;  %3308 = vmatpush.msra.mxu3 %v1908_v50  ;;  %v1953_v50 = vld [vmem:[%s6504_s4 + $0x150] sm:$0xff] }
 0x49b   : > { %2562 = vmatpush.msrb.mxu0 %v1907_v42  ;;  %3309 = vmatpush.msrb.mxu1 %v1907_v42 }
 0x49c   : > { %3310 = vmatpush.msra.mxu2 %v1907_v42  ;;  %3311 = vmatpush.msra.mxu3 %v1907_v42  ;;  %v1954_v42 = vld [vmem:[%s6504_s4 + $0x158] sm:$0xff] }
 0x49d   : > { %2563 = vmatpush.msrb.mxu0 %v1125_v12  ;;  %3312 = vmatpush.msrb.mxu1 %v1125_v12 }
 0x49e   : > { %3313 = vmatpush.msra.mxu2 %v1125_v12  ;;  %3314 = vmatpush.msra.mxu3 %v1125_v12  ;;  %v2020_v12 = vld [vmem:[%s6504_s4 + $0x368] sm:$0xff] }
 0x49f   : > { %2564 = vmatpush.msrb.mxu0 %v1124_v13  ;;  %3315 = vmatpush.msrb.mxu1 %v1124_v13 }
 0x4a0   : > { %3316 = vmatpush.msra.mxu2 %v1124_v13  ;;  %3317 = vmatpush.msra.mxu3 %v1124_v13  ;;  %v1955_v13 = vld [vmem:[%s6504_s4 + $0x160] sm:$0xff] }
 0x4a1   : > { %2565 = vmatpush.msrb.mxu0 %v1123_v43  ;;  %3318 = vmatpush.msrb.mxu1 %v1123_v43 }
 0x4a2   : > { %3319 = vmatpush.msra.mxu2 %v1123_v43  ;;  %3320 = vmatpush.msra.mxu3 %v1123_v43  ;;  %v1987_v43 = vld [vmem:[%s6504_s4 + $0x260] sm:$0xff] }
 0x4a3   : > { %2566 = vmatpush.msrb.mxu0 %v1122_v24  ;;  %3321 = vmatpush.msrb.mxu1 %v1122_v24 }
 0x4a4   : > { %3322 = vmatpush.msra.mxu2 %v1122_v24  ;;  %3323 = vmatpush.msra.mxu3 %v1122_v24  ;;  %v2021_v24 = vld [vmem:[%s6504_s4 + $0x370] sm:$0xff] }
 0x4a5   : > { %3227 = vmatmul.msk.f32.vlgmr.msra.gmra.mxu2 %vm956_vm5, %v1971_v29  ;;  %3261 = vmatmul.msk.f32.vlgmr.msra.gmra.mxu3 %vm956_vm5, %v2005_v39  ;;  %v1926_v29 = vld [vmem:[%s6504_s4 + $0x78] sm:$0xff]  ;;  %v1956_v39 = vld [vmem:[%s6504_s4 + $0x168] sm:$0xff] }
 0x4a6   : > { %3167 = vmatmul.msk.f32.vlgmr.msrb.gmra.mxu0 %vm956_vm5, %v1911_v4  ;;  %3197 = vmatmul.msk.f32.vlgmr.msrb.gmra.mxu1 %vm956_vm5, %v1941_v55  ;;  %v2039_v4 = vld [vmem:[%s6505_s5] sm:$0xff] }
 0x4ad   : > { %3228 = vmatmul.msk.f32.gmra.mxu2 %vm956_vm5, %v1972_v26  ;;  %3262 = vmatmul.msk.f32.gmra.mxu3 %vm956_vm5, %v2006_v20  ;;  %v2069_v26 = vld [vmem:[%s6505_s5 + $0xf0] sm:$0xff] }
 0x4ae   : > { %3168 = vmatmul.msk.f32.gmra.mxu0 %vm956_vm5, %v1912_v30  ;;  %3198 = vmatmul.msk.f32.gmra.mxu1 %vm956_vm5, %v1942_v49  ;;  %v2099_v30 = vld [vmem:[%s6505_s5 + $0x1e0] sm:$0xff]  ;;  %v2133_v49 = vld [vmem:[%s6505_s5 + $0x2f0] sm:$0xff] }
 0x4b5   : > { %3229 = vmatmul.msk.f32.gmra.mxu2 %vm956_vm5, %v1973_v1  ;;  %3263 = vmatmul.msk.f32.gmra.mxu3 %vm956_vm5, %v2007_v6 }
 0x4b6   : > { %3169 = vmatmul.msk.f32.gmra.mxu0 %vm956_vm5, %v1913_v33  ;;  %3199 = vmatmul.msk.f32.gmra.mxu1 %vm956_vm5, %v1943_v47 }
 0x4bd   : > { %3230 = vmatmul.msk.f32.gmra.mxu2 %vm956_vm5, %v1974_v35  ;;  %3264 = vmatmul.msk.f32.gmra.mxu3 %vm956_vm5, %v2008_v52 }
 0x4be   : > { %3170 = vmatmul.msk.f32.gmra.mxu0 %vm956_vm5, %v1914_v22  ;;  %3200 = vmatmul.msk.f32.gmra.mxu1 %vm956_vm5, %v1944_v53  ;;  %v1988_v22 = vld [vmem:[%s6504_s4 + $0x268] sm:$0xff]  ;;  %v2022_v53 = vld [vmem:[%s6504_s4 + $0x378] sm:$0xff] }
 0x4c5   : > { %3231 = vmatmul.msk.f32.gmra.mxu2 %vm956_vm5, %v1975_v16  ;;  %3265 = vmatmul.msk.f32.gmra.mxu3 %vm956_vm5, %v2009_v21  ;;  %v1927_v16 = vld [vmem:[%s6504_s4 + $0x80] sm:$0xff]  ;;  %v1957_v21 = vld [vmem:[%s6504_s4 + $0x170] sm:$0xff] }
 0x4c6   : > { %3171 = vmatmul.msk.f32.gmra.mxu0 %vm956_vm5, %v1915_v14  ;;  %3201 = vmatmul.msk.f32.gmra.mxu1 %vm956_vm5, %v1945_v7  ;;  %v2040_v14 = vld [vmem:[%s6505_s5 + $0x8] sm:$0xff] }
 0x4cd   : > { %3232 = vmatmul.msk.f32.gmra.mxu2 %vm956_vm5, %v1976_v5  ;;  %3266 = vmatmul.msk.f32.gmra.mxu3 %vm956_vm5, %v2010_v8  ;;  %v2070_v5 = vld [vmem:[%s6505_s5 + $0xf8] sm:$0xff] }
 0x4ce   : > { %3172 = vmatmul.msk.f32.gmra.mxu0 %vm956_vm5, %v1916_v9  ;;  %3202 = vmatmul.msk.f32.gmra.mxu1 %vm956_vm5, %v1946_v27  ;;  %v2100_v9 = vld [vmem:[%s6505_s5 + $0x1e8] sm:$0xff]  ;;  %v2134_v27 = vld [vmem:[%s6505_s5 + $0x2f8] sm:$0xff] }
 0x4d5   : > { %3233 = vmatmul.msk.f32.gmra.mxu2 %vm956_vm5, %v1977_v38  ;;  %3267 = vmatmul.msk.f32.gmra.mxu3 %vm956_vm5, %v2011_v17 }
 0x4d6   : > { %3173 = vmatmul.msk.f32.gmra.mxu0 %vm956_vm5, %v1917_v28  ;;  %3203 = vmatmul.msk.f32.gmra.mxu1 %vm956_vm5, %v1947_v51 }
 0x4dd   : > { %3234 = vmatmul.msk.f32.gmra.mxu2 %vm956_vm5, %v1978_v32  ;;  %3268 = vmatmul.msk.f32.gmra.mxu3 %vm956_vm5, %v2012_v2 }
 0x4de   : > { %3174 = vmatmul.msk.f32.gmra.mxu0 %vm956_vm5, %v1918_v0  ;;  %3204 = vmatmul.msk.f32.gmra.mxu1 %vm956_vm5, %v1948_v48  ;;  %v1989_v0 = vld [vmem:[%s6504_s4 + $0x270] sm:$0xff]  ;;  %v2023_v48 = vld [vmem:[%s6504_s4 + $0x380] sm:$0xff] }
 0x4e5   : > { %3235 = vmatmul.msk.f32.gmra.mxu2 %vm956_vm5, %v1979_v46  ;;  %3269 = vmatmul.msk.f32.gmra.mxu3 %vm956_vm5, %v2013_v31  ;;  %v1928_v46 = vld [vmem:[%s6504_s4 + $0x88] sm:$0xff]  ;;  %v1958_v31 = vld [vmem:[%s6504_s4 + $0x178] sm:$0xff] }
 0x4e6   : > { %3175 = vmatmul.msk.f32.gmra.mxu0 %vm956_vm5, %v1919_v40  ;;  %3205 = vmatmul.msk.f32.gmra.mxu1 %vm956_vm5, %v1949_v23  ;;  %v2041_v40 = vld [vmem:[%s6505_s5 + $0x10] sm:$0xff] }
 0x4ed   : > { %3236 = vmatmul.msk.f32.gmra.mxu2 %vm956_vm5, %v1980_v62  ;;  %3270 = vmatmul.msk.f32.gmra.mxu3 %vm956_vm5, %v2014_v60  ;;  %v2071_v62 = vld [vmem:[%s6505_s5 + $0x100] sm:$0xff] }
 0x4ee   : > { %3176 = vmatmul.msk.f32.gmra.mxu0 %vm956_vm5, %v1920_v25  ;;  %3206 = vmatmul.msk.f32.gmra.mxu1 %vm956_vm5, %v1950_v44  ;;  %v2101_v25 = vld [vmem:[%s6505_s5 + $0x1f0] sm:$0xff]  ;;  %v2135_v44 = vld [vmem:[%s6505_s5 + $0x300] sm:$0xff] }
 0x4f5   : > { %3237 = vmatmul.msk.f32.gmra.mxu2 %vm956_vm5, %v1981_v11  ;;  %3271 = vmatmul.msk.f32.gmra.mxu3 %vm956_vm5, %v2015_v41 }
 0x4f6   : > { %3177 = vmatmul.msk.f32.gmra.mxu0 %vm956_vm5, %v1921_v37  ;;  %3207 = vmatmul.msk.f32.gmra.mxu1 %vm956_vm5, %v1951_v63 }
 0x4fd   : > { %3238 = vmatmul.msk.f32.gmra.mxu2 %vm956_vm5, %v1982_v3  ;;  %3272 = vmatmul.msk.f32.gmra.mxu3 %vm956_vm5, %v2016_v18 }
 0x4fe   : > { %3178 = vmatmul.msk.f32.gmra.mxu0 %vm956_vm5, %v1922_v34  ;;  %3208 = vmatmul.msk.f32.gmra.mxu1 %vm956_vm5, %v1952_v19  ;;  %v1990_v34 = vld [vmem:[%s6504_s4 + $0x278] sm:$0xff]  ;;  %v2024_v19 = vld [vmem:[%s6504_s4 + $0x388] sm:$0xff] }
 0x505   : > { %3239 = vmatmul.msk.f32.gmra.mxu2 %vm956_vm5, %v1983_v58  ;;  %3273 = vmatmul.msk.f32.gmra.mxu3 %vm956_vm5, %v2017_v61  ;;  %v1929_v58 = vld [vmem:[%s6504_s4 + $0x90] sm:$0xff]  ;;  %v1959_v61 = vld [vmem:[%s6504_s4 + $0x180] sm:$0xff] }
 0x506   : > { %3179 = vmatmul.msk.f32.gmra.mxu0 %vm956_vm5, %v1923_v59  ;;  %3209 = vmatmul.msk.f32.gmra.mxu1 %vm956_vm5, %v1953_v50  ;;  %v2072_v59 = vld [vmem:[%s6505_s5 + $0x108] sm:$0xff] }
 0x50d   : > { %3240 = vmatmul.msk.f32.gmra.mxu2 %vm956_vm5, %v1984_v10  ;;  %3274 = vmatmul.msk.f32.gmra.mxu3 %vm956_vm5, %v2018_v57  ;;  %v2042_v10 = vld [vmem:[%s6505_s5 + $0x18] sm:$0xff] }
 0x50e   : > { %3180 = vmatmul.msk.f32.gmra.mxu0 %vm956_vm5, %v1924_v36  ;;  %3210 = vmatmul.msk.f32.gmra.mxu1 %vm956_vm5, %v1954_v42 }
 0x515   : > { %3241 = vmatmul.msk.f32.gmra.mxu2 %vm956_vm5, %v1985_v54  ;;  %3275 = vmatmul.msk.f32.gmra.mxu3 %vm956_vm5, %v2019_v56  ;;  %v2102_v54 = vld [vmem:[%s6505_s5 + $0x1f8] sm:$0xff]  ;;  %v2136_v56 = vld [vmem:[%s6505_s5 + $0x308] sm:$0xff] }
 0x516   : > { %3181 = vmatmul.msk.f32.gmra.mxu0 %vm956_vm5, %v1925_v45  ;;  %3211 = vmatmul.msk.f32.gmra.mxu1 %vm956_vm5, %v1955_v13 }
 0x51d   : > { %3242 = vmatmul.msk.f32.gmra.mxu2 %vm956_vm5, %v1986_v15  ;;  %3276 = vmatmul.msk.f32.gmra.mxu3 %vm956_vm5, %v2020_v12 }
 0x51e   : > { %3182 = vmatmul.msk.f32.gmra.mxu0 %vm956_vm5, %v1926_v29  ;;  %3212 = vmatmul.msk.f32.gmra.mxu1 %vm956_vm5, %v1956_v39  ;;  %v1930_v29 = vld [vmem:[%s6504_s4 + $0x98] sm:$0xff]  ;;  %v1960_v39 = vld [vmem:[%s6504_s4 + $0x188] sm:$0xff] }
 0x523   : > { %v2568_v55 = vpop.f32.mrf.mxu0  ;;  %v2658_v20 = vpop.f32.mrf.mxu1 }
 0x524   : > { %v2569_v1 = vadd.f32 %v2568_v55, %v2039_v4  ;;  %v2659_v6 = vadd.f32 %v2658_v20, %v2069_v26  ;;  %v2043_v4 = vld [vmem:[%s6505_s5 + $0x20] sm:$0xff]  ;;  %v2073_v26 = vld [vmem:[%s6505_s5 + $0x110] sm:$0xff] }
 0x525   : > { %3243 = vmatmul.msk.f32.gmra.mxu2 %vm956_vm5, %v1987_v43  ;;  %3277 = vmatmul.msk.f32.gmra.mxu3 %vm956_vm5, %v2021_v24  ;;  %v1991_v43 = vld [vmem:[%s6504_s4 + $0x280] sm:$0xff]  ;;  %v2025_v24 = vld [vmem:[%s6504_s4 + $0x390] sm:$0xff] }
 0x526   : > { %2953 = vst.msk [vmem:[%s5619_s27] sm:$0xff] %vm2952_vm6, %v2569_v1  ;;  %3183 = vmatmul.msk.f32.gmra.mxu0 %vm956_vm5, %v1927_v16  ;;  %3213 = vmatmul.msk.f32.gmra.mxu1 %vm956_vm5, %v1957_v21  ;;  %v1931_v16 = vld [vmem:[%s6504_s4 + $0xa0] sm:$0xff]  ;;  %v1961_v21 = vld [vmem:[%s6504_s4 + $0x190] sm:$0xff] }
 0x527   : > { %2983 = vst.msk [vmem:[%s5619_s27 + $0xf0] sm:$0xff] %vm2952_vm6, %v2659_v6 }
 0x528   : > { %v2748_v33 = vpop.f32.mrf.mxu2  ;;  %v2850_v47 = vpop.f32.mrf.mxu3 }
 0x529   : > { %v2749_v35 = vadd.f32 %v2748_v33, %v2099_v30  ;;  %v2851_v52 = vadd.f32 %v2850_v47, %v2133_v49  ;;  %v2103_v30 = vld [vmem:[%s6505_s5 + $0x200] sm:$0xff]  ;;  %v2137_v49 = vld [vmem:[%s6505_s5 + $0x310] sm:$0xff] }
 0x52b   : > { %3013 = vst.msk [vmem:[%s5619_s27 + $0x1e0] sm:$0xff] %vm2952_vm6, %v2749_v35  ;;  %v2571_v7 = vpop.f32.mrf.mxu0  ;;  %v2661_v8 = vpop.f32.mrf.mxu1 }
 0x52c   : > { %3047 = vst.msk [vmem:[%s5619_s27 + $0x2f0] sm:$0xff] %vm2952_vm6, %v2851_v52  ;;  %v2572_v38 = vadd.f32 %v2571_v7, %v2040_v14  ;;  %v2662_v17 = vadd.f32 %v2661_v8, %v2070_v5  ;;  %v2044_v14 = vld [vmem:[%s6505_s5 + $0x28] sm:$0xff]  ;;  %v2074_v5 = vld [vmem:[%s6505_s5 + $0x118] sm:$0xff] }
 0x52d   : > { %3244 = vmatmul.msk.f32.gmra.mxu2 %vm956_vm5, %v1988_v22  ;;  %3278 = vmatmul.msk.f32.gmra.mxu3 %vm956_vm5, %v2022_v53  ;;  %v1992_v22 = vld [vmem:[%s6504_s4 + $0x288] sm:$0xff]  ;;  %v2026_v53 = vld [vmem:[%s6504_s4 + $0x398] sm:$0xff] }
 0x52e   : > { %2954 = vst.msk [vmem:[%s5619_s27 + $0x8] sm:$0xff] %vm2952_vm6, %v2572_v38  ;;  %3184 = vmatmul.msk.f32.gmra.mxu0 %vm956_vm5, %v1928_v46  ;;  %3214 = vmatmul.msk.f32.gmra.mxu1 %vm956_vm5, %v1958_v31  ;;  %v1932_v46 = vld [vmem:[%s6504_s4 + $0xa8] sm:$0xff]  ;;  %v1962_v31 = vld [vmem:[%s6504_s4 + $0x198] sm:$0xff] }
 0x52f   : > { %2984 = vst.msk [vmem:[%s5619_s27 + $0xf8] sm:$0xff] %vm2952_vm6, %v2662_v17 }
 0x530   : > { %v2751_v28 = vpop.f32.mrf.mxu2  ;;  %v2853_v51 = vpop.f32.mrf.mxu3 }
 0x531   : > { %v2752_v32 = vadd.f32 %v2751_v28, %v2100_v9  ;;  %v2854_v2 = vadd.f32 %v2853_v51, %v2134_v27  ;;  %v2104_v9 = vld [vmem:[%s6505_s5 + $0x208] sm:$0xff]  ;;  %v2138_v27 = vld [vmem:[%s6505_s5 + $0x318] sm:$0xff] }
 0x533   : > { %3014 = vst.msk [vmem:[%s5619_s27 + $0x1e8] sm:$0xff] %vm2952_vm6, %v2752_v32  ;;  %v2574_v23 = vpop.f32.mrf.mxu0  ;;  %v2664_v60 = vpop.f32.mrf.mxu1 }
 0x534   : > { %3048 = vst.msk [vmem:[%s5619_s27 + $0x2f8] sm:$0xff] %vm2952_vm6, %v2854_v2  ;;  %v2575_v11 = vadd.f32 %v2574_v23, %v2041_v40  ;;  %v2665_v41 = vadd.f32 %v2664_v60, %v2071_v62  ;;  %v2045_v40 = vld [vmem:[%s6505_s5 + $0x30] sm:$0xff]  ;;  %v2075_v62 = vld [vmem:[%s6505_s5 + $0x120] sm:$0xff] }
 0x535   : > { %3245 = vmatmul.msk.f32.gmra.mxu2 %vm956_vm5, %v1989_v0  ;;  %3279 = vmatmul.msk.f32.gmra.mxu3 %vm956_vm5, %v2023_v48  ;;  %v1993_v0 = vld [vmem:[%s6504_s4 + $0x290] sm:$0xff]  ;;  %v2027_v48 = vld [vmem:[%s6504_s4 + $0x3a0] sm:$0xff] }
 0x536   : > { %2955 = vst.msk [vmem:[%s5619_s27 + $0x10] sm:$0xff] %vm2952_vm6, %v2575_v11  ;;  %3185 = vmatmul.msk.f32.gmra.mxu0 %vm956_vm5, %v1929_v58  ;;  %3215 = vmatmul.msk.f32.gmra.mxu1 %vm956_vm5, %v1959_v61  ;;  %v1933_v58 = vld [vmem:[%s6504_s4 + $0xb0] sm:$0xff]  ;;  %v1963_v61 = vld [vmem:[%s6504_s4 + $0x1a0] sm:$0xff] }
 0x537   : > { %2985 = vst.msk [vmem:[%s5619_s27 + $0x100] sm:$0xff] %vm2952_vm6, %v2665_v41 }
 0x538   : > { %v2754_v37 = vpop.f32.mrf.mxu2  ;;  %v2856_v63 = vpop.f32.mrf.mxu3 }
 0x539   : > { %v2755_v3 = vadd.f32 %v2754_v37, %v2101_v25  ;;  %v2857_v18 = vadd.f32 %v2856_v63, %v2135_v44  ;;  %v2105_v25 = vld [vmem:[%s6505_s5 + $0x210] sm:$0xff]  ;;  %v2139_v44 = vld [vmem:[%s6505_s5 + $0x320] sm:$0xff] }
 0x53b   : > { %3015 = vst.msk [vmem:[%s5619_s27 + $0x1f0] sm:$0xff] %vm2952_vm6, %v2755_v3  ;;  %v2577_v57 = vpop.f32.mrf.mxu0  ;;  %v2667_v50 = vpop.f32.mrf.mxu1 }
 0x53c   : > { %3049 = vst.msk [vmem:[%s5619_s27 + $0x300] sm:$0xff] %vm2952_vm6, %v2857_v18  ;;  %v2578_v36 = vadd.f32 %v2577_v57, %v2042_v10  ;;  %v2668_v42 = vadd.f32 %v2667_v50, %v2072_v59  ;;  %v2046_v10 = vld [vmem:[%s6505_s5 + $0x38] sm:$0xff]  ;;  %v2076_v59 = vld [vmem:[%s6505_s5 + $0x128] sm:$0xff] }
 0x53d   : > { %3246 = vmatmul.msk.f32.gmra.mxu2 %vm956_vm5, %v1990_v34  ;;  %3280 = vmatmul.msk.f32.gmra.mxu3 %vm956_vm5, %v2024_v19  ;;  %v1994_v34 = vld [vmem:[%s6504_s4 + $0x298] sm:$0xff]  ;;  %v2028_v19 = vld [vmem:[%s6504_s4 + $0x3a8] sm:$0xff] }
 0x53e   : > { %2956 = vst.msk [vmem:[%s5619_s27 + $0x18] sm:$0xff] %vm2952_vm6, %v2578_v36  ;;  %3186 = vmatmul.msk.f32.gmra.mxu0 %vm956_vm5, %v1930_v29  ;;  %3216 = vmatmul.msk.f32.gmra.mxu1 %vm956_vm5, %v1960_v39  ;;  %v1934_v29 = vld [vmem:[%s6504_s4 + $0xb8] sm:$0xff]  ;;  %v1964_v39 = vld [vmem:[%s6504_s4 + $0x1a8] sm:$0xff] }
 0x53f   : > { %2986 = vst.msk [vmem:[%s5619_s27 + $0x108] sm:$0xff] %vm2952_vm6, %v2668_v42 }
 0x540   : > { %v2757_v15 = vpop.f32.mrf.mxu2  ;;  %v2859_v12 = vpop.f32.mrf.mxu3 }
 0x541   : > { %v2758_v45 = vadd.f32 %v2757_v15, %v2102_v54  ;;  %v2860_v13 = vadd.f32 %v2859_v12, %v2136_v56  ;;  %v2106_v54 = vld [vmem:[%s6505_s5 + $0x218] sm:$0xff]  ;;  %v2140_v56 = vld [vmem:[%s6505_s5 + $0x328] sm:$0xff] }
 0x543   : > { %3016 = vst.msk [vmem:[%s5619_s27 + $0x1f8] sm:$0xff] %vm2952_vm6, %v2758_v45  ;;  %v2580_v55 = vpop.f32.mrf.mxu0  ;;  %v2670_v20 = vpop.f32.mrf.mxu1 }
 0x544   : > { %3050 = vst.msk [vmem:[%s5619_s27 + $0x308] sm:$0xff] %vm2952_vm6, %v2860_v13  ;;  %v2581_v1 = vadd.f32 %v2580_v55, %v2043_v4  ;;  %v2671_v6 = vadd.f32 %v2670_v20, %v2073_v26  ;;  %v2047_v4 = vld [vmem:[%s6505_s5 + $0x40] sm:$0xff]  ;;  %v2077_v26 = vld [vmem:[%s6505_s5 + $0x130] sm:$0xff] }
 0x545   : > { %3247 = vmatmul.msk.f32.gmra.mxu2 %vm956_vm5, %v1991_v43  ;;  %3281 = vmatmul.msk.f32.gmra.mxu3 %vm956_vm5, %v2025_v24  ;;  %v1995_v43 = vld [vmem:[%s6504_s4 + $0x2a0] sm:$0xff]  ;;  %v2029_v24 = vld [vmem:[%s6504_s4 + $0x3b0] sm:$0xff] }
 0x546   : > { %2957 = vst.msk [vmem:[%s5619_s27 + $0x20] sm:$0xff] %vm2952_vm6, %v2581_v1  ;;  %3187 = vmatmul.msk.f32.gmra.mxu0 %vm956_vm5, %v1931_v16  ;;  %3217 = vmatmul.msk.f32.gmra.mxu1 %vm956_vm5, %v1961_v21  ;;  %v1935_v16 = vld [vmem:[%s6504_s4 + $0xc0] sm:$0xff]  ;;  %v1965_v21 = vld [vmem:[%s6504_s4 + $0x1b0] sm:$0xff] }
 0x547   : > { %2987 = vst.msk [vmem:[%s5619_s27 + $0x110] sm:$0xff] %vm2952_vm6, %v2671_v6 }
 0x548   : > { %v2760_v33 = vpop.f32.mrf.mxu2  ;;  %v2862_v47 = vpop.f32.mrf.mxu3 }
 0x549   : > { %v2761_v35 = vadd.f32 %v2760_v33, %v2103_v30  ;;  %v2863_v52 = vadd.f32 %v2862_v47, %v2137_v49  ;;  %v2107_v30 = vld [vmem:[%s6505_s5 + $0x220] sm:$0xff]  ;;  %v2141_v49 = vld [vmem:[%s6505_s5 + $0x330] sm:$0xff] }
 0x54b   : > { %3017 = vst.msk [vmem:[%s5619_s27 + $0x200] sm:$0xff] %vm2952_vm6, %v2761_v35  ;;  %v2583_v7 = vpop.f32.mrf.mxu0  ;;  %v2673_v8 = vpop.f32.mrf.mxu1 }
 0x54c   : > { %3051 = vst.msk [vmem:[%s5619_s27 + $0x310] sm:$0xff] %vm2952_vm6, %v2863_v52  ;;  %v2584_v38 = vadd.f32 %v2583_v7, %v2044_v14  ;;  %v2674_v17 = vadd.f32 %v2673_v8, %v2074_v5  ;;  %v2048_v14 = vld [vmem:[%s6505_s5 + $0x48] sm:$0xff]  ;;  %v2078_v5 = vld [vmem:[%s6505_s5 + $0x138] sm:$0xff] }
 0x54d   : > { %3248 = vmatmul.msk.f32.gmra.mxu2 %vm956_vm5, %v1992_v22  ;;  %3282 = vmatmul.msk.f32.gmra.mxu3 %vm956_vm5, %v2026_v53  ;;  %v1996_v22 = vld [vmem:[%s6504_s4 + $0x2a8] sm:$0xff]  ;;  %v2030_v53 = vld [vmem:[%s6504_s4 + $0x3b8] sm:$0xff] }
 0x54e   : > { %2958 = vst.msk [vmem:[%s5619_s27 + $0x28] sm:$0xff] %vm2952_vm6, %v2584_v38  ;;  %3188 = vmatmul.msk.f32.gmra.mxu0 %vm956_vm5, %v1932_v46  ;;  %3218 = vmatmul.msk.f32.gmra.mxu1 %vm956_vm5, %v1962_v31  ;;  %v1936_v46 = vld [vmem:[%s6504_s4 + $0xc8] sm:$0xff]  ;;  %v1966_v31 = vld [vmem:[%s6504_s4 + $0x1b8] sm:$0xff] }
 0x54f   : > { %2988 = vst.msk [vmem:[%s5619_s27 + $0x118] sm:$0xff] %vm2952_vm6, %v2674_v17 }
 0x550   : > { %v2763_v28 = vpop.f32.mrf.mxu2  ;;  %v2865_v51 = vpop.f32.mrf.mxu3 }
 0x551   : > { %v2764_v32 = vadd.f32 %v2763_v28, %v2104_v9  ;;  %v2866_v2 = vadd.f32 %v2865_v51, %v2138_v27  ;;  %v2108_v9 = vld [vmem:[%s6505_s5 + $0x228] sm:$0xff]  ;;  %v2142_v27 = vld [vmem:[%s6505_s5 + $0x338] sm:$0xff] }
 0x553   : > { %3018 = vst.msk [vmem:[%s5619_s27 + $0x208] sm:$0xff] %vm2952_vm6, %v2764_v32  ;;  %v2586_v23 = vpop.f32.mrf.mxu0  ;;  %v2676_v60 = vpop.f32.mrf.mxu1 }
 0x554   : > { %3052 = vst.msk [vmem:[%s5619_s27 + $0x318] sm:$0xff] %vm2952_vm6, %v2866_v2  ;;  %v2587_v11 = vadd.f32 %v2586_v23, %v2045_v40  ;;  %v2677_v41 = vadd.f32 %v2676_v60, %v2075_v62  ;;  %v2049_v40 = vld [vmem:[%s6505_s5 + $0x50] sm:$0xff]  ;;  %v2079_v62 = vld [vmem:[%s6505_s5 + $0x140] sm:$0xff] }
 0x555   : > { %3249 = vmatmul.msk.f32.gmra.mxu2 %vm956_vm5, %v1993_v0  ;;  %3283 = vmatmul.msk.f32.gmra.mxu3 %vm956_vm5, %v2027_v48  ;;  %v1997_v0 = vld [vmem:[%s6504_s4 + $0x2b0] sm:$0xff]  ;;  %v2031_v48 = vld [vmem:[%s6504_s4 + $0x3c0] sm:$0xff] }
 0x556   : > { %2959 = vst.msk [vmem:[%s5619_s27 + $0x30] sm:$0xff] %vm2952_vm6, %v2587_v11  ;;  %3189 = vmatmul.msk.f32.gmra.mxu0 %vm956_vm5, %v1933_v58  ;;  %3219 = vmatmul.msk.f32.gmra.mxu1 %vm956_vm5, %v1963_v61  ;;  %v1937_v58 = vld [vmem:[%s6504_s4 + $0xd0] sm:$0xff]  ;;  %v1967_v61 = vld [vmem:[%s6504_s4 + $0x1c0] sm:$0xff] }
 0x557   : > { %2989 = vst.msk [vmem:[%s5619_s27 + $0x120] sm:$0xff] %vm2952_vm6, %v2677_v41 }
 0x558   : > { %v2766_v37 = vpop.f32.mrf.mxu2  ;;  %v2868_v63 = vpop.f32.mrf.mxu3 }
 0x559   : > { %v2767_v3 = vadd.f32 %v2766_v37, %v2105_v25  ;;  %v2869_v18 = vadd.f32 %v2868_v63, %v2139_v44  ;;  %v2109_v25 = vld [vmem:[%s6505_s5 + $0x230] sm:$0xff]  ;;  %v2143_v44 = vld [vmem:[%s6505_s5 + $0x340] sm:$0xff] }
 0x55b   : > { %3019 = vst.msk [vmem:[%s5619_s27 + $0x210] sm:$0xff] %vm2952_vm6, %v2767_v3  ;;  %v2589_v57 = vpop.f32.mrf.mxu0  ;;  %v2679_v50 = vpop.f32.mrf.mxu1 }
 0x55c   : > { %3053 = vst.msk [vmem:[%s5619_s27 + $0x320] sm:$0xff] %vm2952_vm6, %v2869_v18  ;;  %v2590_v36 = vadd.f32 %v2589_v57, %v2046_v10  ;;  %v2680_v42 = vadd.f32 %v2679_v50, %v2076_v59  ;;  %v2050_v10 = vld [vmem:[%s6505_s5 + $0x58] sm:$0xff]  ;;  %v2080_v59 = vld [vmem:[%s6505_s5 + $0x148] sm:$0xff] }
 0x55d   : > { %3250 = vmatmul.msk.f32.gmra.mxu2 %vm956_vm5, %v1994_v34  ;;  %3284 = vmatmul.msk.f32.gmra.mxu3 %vm956_vm5, %v2028_v19  ;;  %v1998_v34 = vld [vmem:[%s6504_s4 + $0x2b8] sm:$0xff]  ;;  %v2032_v19 = vld [vmem:[%s6504_s4 + $0x3c8] sm:$0xff] }
 0x55e   : > { %2960 = vst.msk [vmem:[%s5619_s27 + $0x38] sm:$0xff] %vm2952_vm6, %v2590_v36  ;;  %3190 = vmatmul.msk.f32.gmra.mxu0 %vm956_vm5, %v1934_v29  ;;  %3220 = vmatmul.msk.f32.gmra.mxu1 %vm956_vm5, %v1964_v39  ;;  %v1938_v29 = vld [vmem:[%s6504_s4 + $0xd8] sm:$0xff]  ;;  %v1968_v39 = vld [vmem:[%s6504_s4 + $0x1c8] sm:$0xff] }
 0x55f   : > { %2990 = vst.msk [vmem:[%s5619_s27 + $0x128] sm:$0xff] %vm2952_vm6, %v2680_v42 }
 0x560   : > { %v2769_v15 = vpop.f32.mrf.mxu2  ;;  %v2871_v12 = vpop.f32.mrf.mxu3 }
 0x561   : > { %v2770_v45 = vadd.f32 %v2769_v15, %v2106_v54  ;;  %v2872_v13 = vadd.f32 %v2871_v12, %v2140_v56  ;;  %v2110_v54 = vld [vmem:[%s6505_s5 + $0x238] sm:$0xff]  ;;  %v2144_v56 = vld [vmem:[%s6505_s5 + $0x348] sm:$0xff] }
 0x563   : > { %3020 = vst.msk [vmem:[%s5619_s27 + $0x218] sm:$0xff] %vm2952_vm6, %v2770_v45  ;;  %v2592_v55 = vpop.f32.mrf.mxu0  ;;  %v2682_v20 = vpop.f32.mrf.mxu1 }
 0x564   : > { %3054 = vst.msk [vmem:[%s5619_s27 + $0x328] sm:$0xff] %vm2952_vm6, %v2872_v13  ;;  %v2593_v1 = vadd.f32 %v2592_v55, %v2047_v4  ;;  %v2683_v6 = vadd.f32 %v2682_v20, %v2077_v26  ;;  %v2111_v4 = vld [vmem:[%s6505_s5 + $0x240] sm:$0xff]  ;;  %v2145_v55 = vld [vmem:[%s6505_s5 + $0x350] sm:$0xff] }
 0x565   : > { %3251 = vmatmul.msk.f32.gmra.mxu2 %vm956_vm5, %v1995_v43  ;;  %3285 = vmatmul.msk.f32.gmra.mxu3 %vm956_vm5, %v2029_v24  ;;  %v1999_v43 = vld [vmem:[%s6504_s4 + $0x2c0] sm:$0xff]  ;;  %v2033_v24 = vld [vmem:[%s6504_s4 + $0x3d0] sm:$0xff] }
 0x566   : > { %2961 = vst.msk [vmem:[%s5619_s27 + $0x40] sm:$0xff] %vm2952_vm6, %v2593_v1  ;;  %3191 = vmatmul.msk.f32.gmra.mxu0 %vm956_vm5, %v1935_v16  ;;  %3221 = vmatmul.msk.f32.gmra.mxu1 %vm956_vm5, %v1965_v21  ;;  %v2051_v26 = vld [vmem:[%s6505_s5 + $0x60] sm:$0xff]  ;;  %v2081_v20 = vld [vmem:[%s6505_s5 + $0x150] sm:$0xff] }
 0x567   : > { %2991 = vst.msk [vmem:[%s5619_s27 + $0x130] sm:$0xff] %vm2952_vm6, %v2683_v6  ;;  %v1939_v16 = vld [vmem:[%s6504_s4 + $0xe0] sm:$0xff]  ;;  %v1969_v21 = vld [vmem:[%s6504_s4 + $0x1d0] sm:$0xff] }
 0x568   : > { %v2772_v33 = vpop.f32.mrf.mxu2  ;;  %v2874_v47 = vpop.f32.mrf.mxu3 }
 0x569   : > { %v2773_v35 = vadd.f32 %v2772_v33, %v2107_v30  ;;  %v2875_v52 = vadd.f32 %v2874_v47, %v2141_v49 }
 0x56b   : > { %3021 = vst.msk [vmem:[%s5619_s27 + $0x220] sm:$0xff] %vm2952_vm6, %v2773_v35  ;;  %v2595_v7 = vpop.f32.mrf.mxu0  ;;  %v2685_v8 = vpop.f32.mrf.mxu1  ;;  %v2000_v35 = vld [vmem:[%s6504_s4 + $0x2c8] sm:$0xff] }
 0x56c   : > { %3055 = vst.msk [vmem:[%s5619_s27 + $0x330] sm:$0xff] %vm2952_vm6, %v2875_v52  ;;  %v2596_v38 = vadd.f32 %v2595_v7, %v2048_v14  ;;  %v2686_v17 = vadd.f32 %v2685_v8, %v2078_v5  ;;  %v2034_v52 = vld [vmem:[%s6504_s4 + $0x3d8] sm:$0xff]  ;;  %v2112_v14 = vld [vmem:[%s6505_s5 + $0x248] sm:$0xff] }
 0x56d   : > { %3252 = vmatmul.msk.f32.gmra.mxu2 %vm956_vm5, %v1996_v22  ;;  %3286 = vmatmul.msk.f32.gmra.mxu3 %vm956_vm5, %v2030_v53  ;;  %v2146_v7 = vld [vmem:[%s6505_s5 + $0x358] sm:$0xff]  ;;  %v2052_v5 = vld [vmem:[%s6505_s5 + $0x68] sm:$0xff] }
 0x56e   : > { %2962 = vst.msk [vmem:[%s5619_s27 + $0x48] sm:$0xff] %vm2952_vm6, %v2596_v38  ;;  %3192 = vmatmul.msk.f32.gmra.mxu0 %vm956_vm5, %v1936_v46  ;;  %3222 = vmatmul.msk.f32.gmra.mxu1 %vm956_vm5, %v1966_v31  ;;  %v2082_v8 = vld [vmem:[%s6505_s5 + $0x158] sm:$0xff]  ;;  %v1940_v46 = vld [vmem:[%s6504_s4 + $0xe8] sm:$0xff] }
 0x56f   : > { %2992 = vst.msk [vmem:[%s5619_s27 + $0x138] sm:$0xff] %vm2952_vm6, %v2686_v17  ;;  %v1970_v31 = vld [vmem:[%s6504_s4 + $0x1d8] sm:$0xff] }
 0x570   : > { %v2775_v28 = vpop.f32.mrf.mxu2  ;;  %v2877_v51 = vpop.f32.mrf.mxu3 }
 0x571   : > { %v2776_v32 = vadd.f32 %v2775_v28, %v2108_v9  ;;  %v2878_v2 = vadd.f32 %v2877_v51, %v2142_v27 }
 0x573   : > { %3022 = vst.msk [vmem:[%s5619_s27 + $0x228] sm:$0xff] %vm2952_vm6, %v2776_v32  ;;  %v2598_v23 = vpop.f32.mrf.mxu0  ;;  %v2688_v60 = vpop.f32.mrf.mxu1  ;;  %v2001_v32 = vld [vmem:[%s6504_s4 + $0x2d0] sm:$0xff] }
 0x574   : > { %3056 = vst.msk [vmem:[%s5619_s27 + $0x338] sm:$0xff] %vm2952_vm6, %v2878_v2  ;;  %v2599_v11 = vadd.f32 %v2598_v23, %v2049_v40  ;;  %v2689_v41 = vadd.f32 %v2688_v60, %v2079_v62  ;;  %v2035_v2 = vld [vmem:[%s6504_s4 + $0x3e0] sm:$0xff]  ;;  %v2113_v40 = vld [vmem:[%s6505_s5 + $0x250] sm:$0xff] }
 0x575   : > { %3253 = vmatmul.msk.f32.gmra.mxu2 %vm956_vm5, %v1997_v0  ;;  %3287 = vmatmul.msk.f32.gmra.mxu3 %vm956_vm5, %v2031_v48  ;;  %v2147_v23 = vld [vmem:[%s6505_s5 + $0x360] sm:$0xff]  ;;  %v2053_v62 = vld [vmem:[%s6505_s5 + $0x70] sm:$0xff] }
 0x576   : > { %2963 = vst.msk [vmem:[%s5619_s27 + $0x50] sm:$0xff] %vm2952_vm6, %v2599_v11  ;;  %3193 = vmatmul.msk.f32.gmra.mxu0 %vm956_vm5, %v1937_v58  ;;  %3223 = vmatmul.msk.f32.gmra.mxu1 %vm956_vm5, %v1967_v61  ;;  %v2083_v60 = vld [vmem:[%s6505_s5 + $0x160] sm:$0xff]  ;;  %v2114_v58 = vld [vmem:[%s6505_s5 + $0x258] sm:$0xff]  ;;  %v2148_v61 = vld [vmem:[%s6505_s5 + $0x368] sm:$0xff] }
 0x577   : > { %2993 = vst.msk [vmem:[%s5619_s27 + $0x140] sm:$0xff] %vm2952_vm6, %v2689_v41 }
 0x578   : > { %v2778_v37 = vpop.f32.mrf.mxu2  ;;  %v2880_v63 = vpop.f32.mrf.mxu3 }
 0x579   : > { %v2779_v3 = vadd.f32 %v2778_v37, %v2109_v25  ;;  %v2881_v18 = vadd.f32 %v2880_v63, %v2143_v44 }
 0x57b   : > { %3023 = vst.msk [vmem:[%s5619_s27 + $0x230] sm:$0xff] %vm2952_vm6, %v2779_v3  ;;  %v2601_v57 = vpop.f32.mrf.mxu0  ;;  %v2691_v50 = vpop.f32.mrf.mxu1  ;;  %v2002_v3 = vld [vmem:[%s6504_s4 + $0x2d8] sm:$0xff] }
 0x57c   : > { %3057 = vst.msk [vmem:[%s5619_s27 + $0x340] sm:$0xff] %vm2952_vm6, %v2881_v18  ;;  %v2602_v36 = vadd.f32 %v2601_v57, %v2050_v10  ;;  %v2692_v42 = vadd.f32 %v2691_v50, %v2080_v59  ;;  %v2036_v18 = vld [vmem:[%s6504_s4 + $0x3e8] sm:$0xff]  ;;  %v2054_v10 = vld [vmem:[%s6505_s5 + $0x78] sm:$0xff] }
 0x57d   : > { %3254 = vmatmul.msk.f32.gmra.mxu2 %vm956_vm5, %v1998_v34  ;;  %3288 = vmatmul.msk.f32.gmra.mxu3 %vm956_vm5, %v2032_v19  ;;  %v2084_v57 = vld [vmem:[%s6505_s5 + $0x168] sm:$0xff] }
 0x57e   : > { %2964 = vst.msk [vmem:[%s5619_s27 + $0x58] sm:$0xff] %vm2952_vm6, %v2602_v36  ;;  %3194 = vmatmul.msk.f32.gmra.mxu0 %vm956_vm5, %v1938_v29  ;;  %3224 = vmatmul.msk.f32.gmra.mxu1 %vm956_vm5, %v1968_v39  ;;  %v2055_v29 = vld [vmem:[%s6505_s5 + $0x80] sm:$0xff]  ;;  %v2085_v39 = vld [vmem:[%s6505_s5 + $0x170] sm:$0xff] }
 0x57f   : > { %2994 = vst.msk [vmem:[%s5619_s27 + $0x148] sm:$0xff] %vm2952_vm6, %v2692_v42 }
 0x580   : > { %v2781_v15 = vpop.f32.mrf.mxu2  ;;  %v2883_v12 = vpop.f32.mrf.mxu3 }
 0x581   : > { %v2782_v45 = vadd.f32 %v2781_v15, %v2110_v54  ;;  %v2884_v13 = vadd.f32 %v2883_v12, %v2144_v56  ;;  %v2003_v15 = vld [vmem:[%s6504_s4 + $0x2e0] sm:$0xff]  ;;  %v2037_v12 = vld [vmem:[%s6504_s4 + $0x3f0] sm:$0xff] }
 0x583   : > { %3024 = vst.msk [vmem:[%s5619_s27 + $0x238] sm:$0xff] %vm2952_vm6, %v2782_v45  ;;  %v2604_v33 = vpop.f32.mrf.mxu0  ;;  %v2694_v47 = vpop.f32.mrf.mxu1 }
 0x584   : > { %3058 = vst.msk [vmem:[%s5619_s27 + $0x348] sm:$0xff] %vm2952_vm6, %v2884_v13  ;;  %v2605_v22 = vadd.f32 %v2604_v33, %v2051_v26  ;;  %v2695_v53 = vadd.f32 %v2694_v47, %v2081_v20 }
 0x585   : > { %3255 = vmatmul.msk.f32.gmra.mxu2 %vm956_vm5, %v1999_v43  ;;  %3289 = vmatmul.msk.f32.gmra.mxu3 %vm956_vm5, %v2033_v24  ;;  %v2115_v43 = vld [vmem:[%s6505_s5 + $0x260] sm:$0xff]  ;;  %v2149_v24 = vld [vmem:[%s6505_s5 + $0x370] sm:$0xff] }
 0x586   : > { %3195 = vmatmul.msk.f32.gmra.mxu0 %vm956_vm5, %v1939_v16  ;;  %3225 = vmatmul.msk.f32.gmra.mxu1 %vm956_vm5, %v1969_v21  ;;  %2965 = vst.msk [vmem:[%s5619_s27 + $0x60] sm:$0xff] %vm2952_vm6, %v2605_v22  ;;  %v2056_v22 = vld [vmem:[%s6505_s5 + $0x88] sm:$0xff] }
 0x587   : > { %2995 = vst.msk [vmem:[%s5619_s27 + $0x150] sm:$0xff] %vm2952_vm6, %v2695_v53  ;;  %v2086_v53 = vld [vmem:[%s6505_s5 + $0x178] sm:$0xff] }
 0x588   : > { %v2784_v30 = vpop.f32.mrf.mxu2  ;;  %v2886_v49 = vpop.f32.mrf.mxu3 }
 0x589   : > { %v2785_v1 = vadd.f32 %v2784_v30, %v2111_v4  ;;  %v2887_v6 = vadd.f32 %v2886_v49, %v2145_v55 }
 0x58b   : > { %3025 = vst.msk [vmem:[%s5619_s27 + $0x240] sm:$0xff] %vm2952_vm6, %v2785_v1  ;;  %v2607_v28 = vpop.f32.mrf.mxu0  ;;  %v2697_v51 = vpop.f32.mrf.mxu1  ;;  %v2004_v1 = vld [vmem:[%s6504_s4 + $0x2e8] sm:$0xff] }
 0x58c   : > { %3059 = vst.msk [vmem:[%s5619_s27 + $0x350] sm:$0xff] %vm2952_vm6, %v2887_v6  ;;  %v2608_v0 = vadd.f32 %v2607_v28, %v2052_v5  ;;  %v2698_v48 = vadd.f32 %v2697_v51, %v2082_v8  ;;  %v2038_v6 = vld [vmem:[%s6504_s4 + $0x3f8] sm:$0xff]  ;;  %v2057_v28 = vld [vmem:[%s6505_s5 + $0x90] sm:$0xff]  ;;  %v2087_v51 = vld [vmem:[%s6505_s5 + $0x180] sm:$0xff] }
 0x58d   : > { %3256 = vmatmul.msk.f32.gmra.mxu2 %vm956_vm5, %v2000_v35  ;;  %3290 = vmatmul.msk.f32.gmra.mxu3 %vm956_vm5, %v2034_v52  ;;  %v2116_v35 = vld [vmem:[%s6505_s5 + $0x268] sm:$0xff]  ;;  %v2150_v52 = vld [vmem:[%s6505_s5 + $0x378] sm:$0xff] }
 0x58e   : > { %3196 = vmatmul.msk.f32.gmra.mxu0 %vm956_vm5, %v1940_v46  ;;  %3226 = vmatmul.msk.f32.gmra.mxu1 %vm956_vm5, %v1970_v31  ;;  %2966 = vst.msk [vmem:[%s5619_s27 + $0x68] sm:$0xff] %vm2952_vm6, %v2608_v0 }
 0x58f   : > { %2996 = vst.msk [vmem:[%s5619_s27 + $0x158] sm:$0xff] %vm2952_vm6, %v2698_v48 }
 0x590   : > { %v2787_v9 = vpop.f32.mrf.mxu2  ;;  %v2889_v27 = vpop.f32.mrf.mxu3 }
 0x591   : > { %v2788_v38 = vadd.f32 %v2787_v9, %v2112_v14  ;;  %v2890_v17 = vadd.f32 %v2889_v27, %v2146_v7 }
 0x593   : > { %3026 = vst.msk [vmem:[%s5619_s27 + $0x248] sm:$0xff] %vm2952_vm6, %v2788_v38  ;;  %v2610_v37 = vpop.f32.mrf.mxu0  ;;  %v2700_v63 = vpop.f32.mrf.mxu1  ;;  %v2117_v38 = vld [vmem:[%s6505_s5 + $0x270] sm:$0xff] }
 0x594   : > { %3060 = vst.msk [vmem:[%s5619_s27 + $0x358] sm:$0xff] %vm2952_vm6, %v2890_v17  ;;  %v2611_v34 = vadd.f32 %v2610_v37, %v2053_v62  ;;  %v2701_v19 = vadd.f32 %v2700_v63, %v2083_v60  ;;  %v2151_v17 = vld [vmem:[%s6505_s5 + $0x380] sm:$0xff]  ;;  %v2118_v62 = vld [vmem:[%s6505_s5 + $0x278] sm:$0xff]  ;;  %v2152_v60 = vld [vmem:[%s6505_s5 + $0x388] sm:$0xff] }
 0x595   : > { %3257 = vmatmul.msk.f32.gmra.mxu2 %vm956_vm5, %v2001_v32  ;;  %3291 = vmatmul.msk.f32.gmra.mxu3 %vm956_vm5, %v2035_v2 }
 0x596   : > { %2967 = vst.msk [vmem:[%s5619_s27 + $0x70] sm:$0xff] %vm2952_vm6, %v2611_v34 }
 0x597   : > { %2997 = vst.msk [vmem:[%s5619_s27 + $0x160] sm:$0xff] %vm2952_vm6, %v2701_v19 }
 0x598   : > { %v2790_v25 = vpop.f32.mrf.mxu2  ;;  %v2892_v44 = vpop.f32.mrf.mxu3 }
 0x599   : > { %v2791_v11 = vadd.f32 %v2790_v25, %v2113_v40  ;;  %v2893_v41 = vadd.f32 %v2892_v44, %v2147_v23  ;;  %v2058_v25 = vld [vmem:[%s6505_s5 + $0x98] sm:$0xff]  ;;  %v2088_v44 = vld [vmem:[%s6505_s5 + $0x188] sm:$0xff] }
 0x59b   : > { %3027 = vst.msk [vmem:[%s5619_s27 + $0x250] sm:$0xff] %vm2952_vm6, %v2791_v11  ;;  %v2613_v36 = vpop.f32.mrf.mxu0  ;;  %v2703_v42 = vpop.f32.mrf.mxu1 }
 0x59c   : > { %3061 = vst.msk [vmem:[%s5619_s27 + $0x360] sm:$0xff] %vm2952_vm6, %v2893_v41  ;;  %v2614_v45 = vadd.f32 %v2613_v36, %v2054_v10  ;;  %v2704_v13 = vadd.f32 %v2703_v42, %v2084_v57  ;;  %v2059_v10 = vld [vmem:[%s6505_s5 + $0xa0] sm:$0xff]  ;;  %v2089_v57 = vld [vmem:[%s6505_s5 + $0x190] sm:$0xff] }
 0x59d   : > { %3258 = vmatmul.msk.f32.gmra.mxu2 %vm956_vm5, %v2002_v3  ;;  %3292 = vmatmul.msk.f32.gmra.mxu3 %vm956_vm5, %v2036_v18 }
 0x59e   : > { %2968 = vst.msk [vmem:[%s5619_s27 + $0x78] sm:$0xff] %vm2952_vm6, %v2614_v45  ;;  %v2120_v45 = vld [vmem:[%s6505_s5 + $0x288] sm:$0xff] }
 0x59f   : > { %2998 = vst.msk [vmem:[%s5619_s27 + $0x168] sm:$0xff] %vm2952_vm6, %v2704_v13  ;;  %v2154_v13 = vld [vmem:[%s6505_s5 + $0x398] sm:$0xff] }
 0x5a0   : > { %v2793_v59 = vpop.f32.mrf.mxu2  ;;  %v2895_v50 = vpop.f32.mrf.mxu3 }
 0x5a1   : > { %v2794_v54 = vadd.f32 %v2793_v59, %v2114_v58  ;;  %v2896_v56 = vadd.f32 %v2895_v50, %v2148_v61  ;;  %v2119_v58 = vld [vmem:[%s6505_s5 + $0x280] sm:$0xff]  ;;  %v2153_v61 = vld [vmem:[%s6505_s5 + $0x390] sm:$0xff] }
 0x5a3   : > { %3028 = vst.msk [vmem:[%s5619_s27 + $0x258] sm:$0xff] %vm2952_vm6, %v2794_v54  ;;  %v2616_v30 = vpop.f32.mrf.mxu0  ;;  %v2706_v49 = vpop.f32.mrf.mxu1 }
 0x5a4   : > { %3062 = vst.msk [vmem:[%s5619_s27 + $0x368] sm:$0xff] %vm2952_vm6, %v2896_v56  ;;  %v2617_v33 = vadd.f32 %v2616_v30, %v2055_v29  ;;  %v2707_v47 = vadd.f32 %v2706_v49, %v2085_v39 }
 0x5a5   : > { %3259 = vmatmul.msk.f32.gmra.mxu2 %vm956_vm5, %v2003_v15  ;;  %3293 = vmatmul.msk.f32.gmra.mxu3 %vm956_vm5, %v2037_v12 }
 0x5a6   : > { %2969 = vst.msk [vmem:[%s5619_s27 + $0x80] sm:$0xff] %vm2952_vm6, %v2617_v33  ;;  %v2061_v33 = vld [vmem:[%s6505_s5 + $0xb0] sm:$0xff] }
 0x5a7   : > { %2999 = vst.msk [vmem:[%s5619_s27 + $0x170] sm:$0xff] %vm2952_vm6, %v2707_v47  ;;  %v2091_v47 = vld [vmem:[%s6505_s5 + $0x1a0] sm:$0xff] }
 0x5a8   : > { %v2796_v4 = vpop.f32.mrf.mxu2  ;;  %v2898_v55 = vpop.f32.mrf.mxu3 }
 0x5a9   : > { %v2797_v26 = vadd.f32 %v2796_v4, %v2115_v43  ;;  %v2899_v20 = vadd.f32 %v2898_v55, %v2149_v24  ;;  %v2060_v43 = vld [vmem:[%s6505_s5 + $0xa8] sm:$0xff]  ;;  %v2090_v24 = vld [vmem:[%s6505_s5 + $0x198] sm:$0xff] }
 0x5ab   : > { %3029 = vst.msk [vmem:[%s5619_s27 + $0x260] sm:$0xff] %vm2952_vm6, %v2797_v26  ;;  %v2619_v5 = vpop.f32.mrf.mxu0  ;;  %v2709_v8 = vpop.f32.mrf.mxu1 }
 0x5ac   : > { %3063 = vst.msk [vmem:[%s5619_s27 + $0x370] sm:$0xff] %vm2952_vm6, %v2899_v20  ;;  %v2620_v9 = vadd.f32 %v2619_v5, %v2056_v22  ;;  %v2710_v27 = vadd.f32 %v2709_v8, %v2086_v53  ;;  %v2122_v5 = vld [vmem:[%s6505_s5 + $0x298] sm:$0xff]  ;;  %v2156_v8 = vld [vmem:[%s6505_s5 + $0x3a8] sm:$0xff] }
 0x5ad   : > { %3260 = vmatmul.msk.f32.gmra.mxu2 %vm956_vm5, %v2004_v1  ;;  %3294 = vmatmul.msk.f32.gmra.mxu3 %vm956_vm5, %v2038_v6  ;;  %v2121_v1 = vld [vmem:[%s6505_s5 + $0x290] sm:$0xff]  ;;  %v2155_v6 = vld [vmem:[%s6505_s5 + $0x3a0] sm:$0xff] }
 0x5ae   : > { %2970 = vst.msk [vmem:[%s5619_s27 + $0x88] sm:$0xff] %vm2952_vm6, %v2620_v9  ;;  %v2062_v9 = vld [vmem:[%s6505_s5 + $0xb8] sm:$0xff] }
 0x5af   : > { %3000 = vst.msk [vmem:[%s5619_s27 + $0x178] sm:$0xff] %vm2952_vm6, %v2710_v27  ;;  %v2092_v27 = vld [vmem:[%s6505_s5 + $0x1a8] sm:$0xff] }
 0x5b0   : > { %v2799_v16 = vpop.f32.mrf.mxu2  ;;  %v2901_v21 = vpop.f32.mrf.mxu3 }
 0x5b1   : > { %v2800_v14 = vadd.f32 %v2799_v16, %v2116_v35  ;;  %v2902_v7 = vadd.f32 %v2901_v21, %v2150_v52 }
 0x5b3   : > { %3030 = vst.msk [vmem:[%s5619_s27 + $0x268] sm:$0xff] %vm2952_vm6, %v2800_v14  ;;  %v2622_v46 = vpop.f32.mrf.mxu0  ;;  %v2712_v31 = vpop.f32.mrf.mxu1 }
 0x5b4   : > { %3064 = vst.msk [vmem:[%s5619_s27 + $0x378] sm:$0xff] %vm2952_vm6, %v2902_v7  ;;  %v2623_v40 = vadd.f32 %v2622_v46, %v2057_v28  ;;  %v2713_v23 = vadd.f32 %v2712_v31, %v2087_v51  ;;  %v2123_v46 = vld [vmem:[%s6505_s5 + $0x2a0] sm:$0xff]  ;;  %v2157_v31 = vld [vmem:[%s6505_s5 + $0x3b0] sm:$0xff] }
 0x5b6   : > { %2971 = vst.msk [vmem:[%s5619_s27 + $0x90] sm:$0xff] %vm2952_vm6, %v2623_v40  ;;  %v2063_v40 = vld [vmem:[%s6505_s5 + $0xc0] sm:$0xff] }
 0x5b7   : > { %3001 = vst.msk [vmem:[%s5619_s27 + $0x180] sm:$0xff] %vm2952_vm6, %v2713_v23  ;;  %v2093_v23 = vld [vmem:[%s6505_s5 + $0x1b0] sm:$0xff] }
 0x5b8   : > { %v2802_v32 = vpop.f32.mrf.mxu2  ;;  %v2904_v2 = vpop.f32.mrf.mxu3 }
 0x5b9   : > { %v2803_v0 = vadd.f32 %v2802_v32, %v2117_v38  ;;  %v2905_v48 = vadd.f32 %v2904_v2, %v2151_v17 }
 0x5bb   : > { %3031 = vst.msk [vmem:[%s5619_s27 + $0x270] sm:$0xff] %vm2952_vm6, %v2803_v0  ;;  %v2625_v3 = vpop.f32.mrf.mxu0  ;;  %v2715_v18 = vpop.f32.mrf.mxu1 }
 0x5bc   : > { %3065 = vst.msk [vmem:[%s5619_s27 + $0x380] sm:$0xff] %vm2952_vm6, %v2905_v48  ;;  %v2626_v34 = vadd.f32 %v2625_v3, %v2058_v25  ;;  %v2716_v19 = vadd.f32 %v2715_v18, %v2088_v44  ;;  %v2124_v3 = vld [vmem:[%s6505_s5 + $0x2a8] sm:$0xff]  ;;  %v2158_v18 = vld [vmem:[%s6505_s5 + $0x3b8] sm:$0xff] }
 0x5be   : > { %2972 = vst.msk [vmem:[%s5619_s27 + $0x98] sm:$0xff] %vm2952_vm6, %v2626_v34  ;;  %v2064_v34 = vld [vmem:[%s6505_s5 + $0xc8] sm:$0xff] }
 0x5bf   : > { %3002 = vst.msk [vmem:[%s5619_s27 + $0x188] sm:$0xff] %vm2952_vm6, %v2716_v19  ;;  %v2094_v19 = vld [vmem:[%s6505_s5 + $0x1b8] sm:$0xff] }
 0x5c0   : > { %v2805_v11 = vpop.f32.mrf.mxu2  ;;  %v2907_v41 = vpop.f32.mrf.mxu3 }
 0x5c1   : > { %v2806_v37 = vadd.f32 %v2805_v11, %v2118_v62  ;;  %v2908_v63 = vadd.f32 %v2907_v41, %v2152_v60 }
 0x5c3   : > { %3032 = vst.msk [vmem:[%s5619_s27 + $0x278] sm:$0xff] %vm2952_vm6, %v2806_v37  ;;  %v2628_v36 = vpop.f32.mrf.mxu0  ;;  %v2718_v42 = vpop.f32.mrf.mxu1 }
 0x5c4   : > { %3066 = vst.msk [vmem:[%s5619_s27 + $0x388] sm:$0xff] %vm2952_vm6, %v2908_v63  ;;  %v2629_v15 = vadd.f32 %v2628_v36, %v2059_v10  ;;  %v2719_v12 = vadd.f32 %v2718_v42, %v2089_v57  ;;  %v2125_v36 = vld [vmem:[%s6505_s5 + $0x2b0] sm:$0xff]  ;;  %v2159_v42 = vld [vmem:[%s6505_s5 + $0x3c0] sm:$0xff] }
 0x5c6   : > { %2973 = vst.msk [vmem:[%s5619_s27 + $0xa0] sm:$0xff] %vm2952_vm6, %v2629_v15  ;;  %v2065_v15 = vld [vmem:[%s6505_s5 + $0xd0] sm:$0xff] }
 0x5c7   : > { %3003 = vst.msk [vmem:[%s5619_s27 + $0x190] sm:$0xff] %vm2952_vm6, %v2719_v12  ;;  %v2095_v12 = vld [vmem:[%s6505_s5 + $0x1c0] sm:$0xff] }
 0x5c8   : > { %v2808_v59 = vpop.f32.mrf.mxu2  ;;  %v2910_v50 = vpop.f32.mrf.mxu3 }
 0x5c9   : > { %v2809_v54 = vadd.f32 %v2808_v59, %v2119_v58  ;;  %v2911_v56 = vadd.f32 %v2910_v50, %v2153_v61 }
 0x5cb   : > { %3033 = vst.msk [vmem:[%s5619_s27 + $0x280] sm:$0xff] %vm2952_vm6, %v2809_v54  ;;  %v2631_v26 = vpop.f32.mrf.mxu0  ;;  %v2721_v20 = vpop.f32.mrf.mxu1 }
 0x5cc   : > { %3067 = vst.msk [vmem:[%s5619_s27 + $0x390] sm:$0xff] %vm2952_vm6, %v2911_v56  ;;  %v2632_v30 = vadd.f32 %v2631_v26, %v2060_v43  ;;  %v2722_v49 = vadd.f32 %v2721_v20, %v2090_v24  ;;  %v2126_v26 = vld [vmem:[%s6505_s5 + $0x2b8] sm:$0xff]  ;;  %v2160_v20 = vld [vmem:[%s6505_s5 + $0x3c8] sm:$0xff] }
 0x5ce   : > { %2974 = vst.msk [vmem:[%s5619_s27 + $0xa8] sm:$0xff] %vm2952_vm6, %v2632_v30  ;;  %v2066_v30 = vld [vmem:[%s6505_s5 + $0xd8] sm:$0xff] }
 0x5cf   : > { %3004 = vst.msk [vmem:[%s5619_s27 + $0x198] sm:$0xff] %vm2952_vm6, %v2722_v49  ;;  %v2096_v49 = vld [vmem:[%s6505_s5 + $0x1c8] sm:$0xff] }
 0x5d0   : > { %v2811_v29 = vpop.f32.mrf.mxu2  ;;  %v2913_v39 = vpop.f32.mrf.mxu3 }
 0x5d1   : > { %v2812_v4 = vadd.f32 %v2811_v29, %v2120_v45  ;;  %v2914_v55 = vadd.f32 %v2913_v39, %v2154_v13 }
 0x5d3   : > { %3034 = vst.msk [vmem:[%s5619_s27 + $0x288] sm:$0xff] %vm2952_vm6, %v2812_v4  ;;  %v2634_v16 = vpop.f32.mrf.mxu0  ;;  %v2724_v21 = vpop.f32.mrf.mxu1 }
 0x5d4   : > { %3068 = vst.msk [vmem:[%s5619_s27 + $0x398] sm:$0xff] %vm2952_vm6, %v2914_v55  ;;  %v2635_v14 = vadd.f32 %v2634_v16, %v2061_v33  ;;  %v2725_v7 = vadd.f32 %v2724_v21, %v2091_v47  ;;  %v2127_v16 = vld [vmem:[%s6505_s5 + $0x2c0] sm:$0xff]  ;;  %v2161_v21 = vld [vmem:[%s6505_s5 + $0x3d0] sm:$0xff] }
 0x5d6   : > { %2975 = vst.msk [vmem:[%s5619_s27 + $0xb0] sm:$0xff] %vm2952_vm6, %v2635_v14  ;;  %v2067_v14 = vld [vmem:[%s6505_s5 + $0xe0] sm:$0xff] }
 0x5d7   : > { %3005 = vst.msk [vmem:[%s5619_s27 + $0x1a0] sm:$0xff] %vm2952_vm6, %v2725_v7  ;;  %v2097_v7 = vld [vmem:[%s6505_s5 + $0x1d0] sm:$0xff] }
 0x5d8   : > { %v2814_v35 = vpop.f32.mrf.mxu2  ;;  %v2916_v52 = vpop.f32.mrf.mxu3 }
 0x5d9   : > { %v2815_v22 = vadd.f32 %v2814_v35, %v2121_v1  ;;  %v2917_v53 = vadd.f32 %v2916_v52, %v2155_v6 }
 0x5db   : > { %3035 = vst.msk [vmem:[%s5619_s27 + $0x290] sm:$0xff] %vm2952_vm6, %v2815_v22  ;;  %v2637_v32 = vpop.f32.mrf.mxu0  ;;  %v2727_v2 = vpop.f32.mrf.mxu1 }
 0x5dc   : > { %3069 = vst.msk [vmem:[%s5619_s27 + $0x3a0] sm:$0xff] %vm2952_vm6, %v2917_v53  ;;  %v2638_v0 = vadd.f32 %v2637_v32, %v2062_v9  ;;  %v2728_v48 = vadd.f32 %v2727_v2, %v2092_v27  ;;  %v2128_v32 = vld [vmem:[%s6505_s5 + $0x2c8] sm:$0xff]  ;;  %v2162_v2 = vld [vmem:[%s6505_s5 + $0x3d8] sm:$0xff] }
 0x5de   : > { %2976 = vst.msk [vmem:[%s5619_s27 + $0xb8] sm:$0xff] %vm2952_vm6, %v2638_v0  ;;  %v2068_v0 = vld [vmem:[%s6505_s5 + $0xe8] sm:$0xff] }
 0x5df   : > { %3006 = vst.msk [vmem:[%s5619_s27 + $0x1a8] sm:$0xff] %vm2952_vm6, %v2728_v48  ;;  %v2098_v48 = vld [vmem:[%s6505_s5 + $0x1d8] sm:$0xff] }
 0x5e0   : > { %v2817_v38 = vpop.f32.mrf.mxu2  ;;  %v2919_v17 = vpop.f32.mrf.mxu3 }
 0x5e1   : > { %v2818_v28 = vadd.f32 %v2817_v38, %v2122_v5  ;;  %v2920_v51 = vadd.f32 %v2919_v17, %v2156_v8 }
 0x5e3   : > { %3036 = vst.msk [vmem:[%s5619_s27 + $0x298] sm:$0xff] %vm2952_vm6, %v2818_v28  ;;  %v2640_v11 = vpop.f32.mrf.mxu0  ;;  %v2730_v41 = vpop.f32.mrf.mxu1 }
 0x5e4   : > { %3070 = vst.msk [vmem:[%s5619_s27 + $0x3a8] sm:$0xff] %vm2952_vm6, %v2920_v51  ;;  %v2641_v37 = vadd.f32 %v2640_v11, %v2063_v40  ;;  %v2731_v63 = vadd.f32 %v2730_v41, %v2093_v23  ;;  %v2129_v11 = vld [vmem:[%s6505_s5 + $0x2d0] sm:$0xff]  ;;  %v2163_v41 = vld [vmem:[%s6505_s5 + $0x3e0] sm:$0xff] }
 0x5e6   : > { %2977 = vst.msk [vmem:[%s5619_s27 + $0xc0] sm:$0xff] %vm2952_vm6, %v2641_v37 }
 0x5e7   : > { %3007 = vst.msk [vmem:[%s5619_s27 + $0x1b0] sm:$0xff] %vm2952_vm6, %v2731_v63 }
 0x5e8   : > { %v2820_v62 = vpop.f32.mrf.mxu2  ;;  %v2922_v60 = vpop.f32.mrf.mxu3 }
 0x5e9   : > { %v2821_v25 = vadd.f32 %v2820_v62, %v2123_v46  ;;  %v2923_v44 = vadd.f32 %v2922_v60, %v2157_v31 }
 0x5eb   : > { %3037 = vst.msk [vmem:[%s5619_s27 + $0x2a0] sm:$0xff] %vm2952_vm6, %v2821_v25  ;;  %v2643_v59 = vpop.f32.mrf.mxu0  ;;  %v2733_v50 = vpop.f32.mrf.mxu1 }
 0x5ec   : > { %3071 = vst.msk [vmem:[%s5619_s27 + $0x3b0] sm:$0xff] %vm2952_vm6, %v2923_v44  ;;  %v2644_v54 = vadd.f32 %v2643_v59, %v2064_v34  ;;  %v2734_v56 = vadd.f32 %v2733_v50, %v2094_v19  ;;  %v2130_v34 = vld [vmem:[%s6505_s5 + $0x2d8] sm:$0xff]  ;;  %v2164_v19 = vld [vmem:[%s6505_s5 + $0x3e8] sm:$0xff]  ;;  %v2131_v59 = vld [vmem:[%s6505_s5 + $0x2e0] sm:$0xff] }
 0x5ed   : > { %v2165_v50 = vld [vmem:[%s6505_s5 + $0x3f0] sm:$0xff] }
 0x5ee   : > { %2978 = vst.msk [vmem:[%s5619_s27 + $0xc8] sm:$0xff] %vm2952_vm6, %v2644_v54 }
 0x5ef   : > { %3008 = vst.msk [vmem:[%s5619_s27 + $0x1b8] sm:$0xff] %vm2952_vm6, %v2734_v56 }
 0x5f0   : > { %v2823_v58 = vpop.f32.mrf.mxu2  ;;  %v2925_v61 = vpop.f32.mrf.mxu3 }
 0x5f1   : > { %v2824_v10 = vadd.f32 %v2823_v58, %v2124_v3  ;;  %v2926_v57 = vadd.f32 %v2925_v61, %v2158_v18 }
 0x5f3   : > { %3038 = vst.msk [vmem:[%s5619_s27 + $0x2a8] sm:$0xff] %vm2952_vm6, %v2824_v10  ;;  %v2646_v29 = vpop.f32.mrf.mxu0  ;;  %v2736_v39 = vpop.f32.mrf.mxu1 }
 0x5f4   : > { %3072 = vst.msk [vmem:[%s5619_s27 + $0x3b8] sm:$0xff] %vm2952_vm6, %v2926_v57  ;;  %v2647_v4 = vadd.f32 %v2646_v29, %v2065_v15  ;;  %v2737_v55 = vadd.f32 %v2736_v39, %v2095_v12  ;;  %v2132_v15 = vld [vmem:[%s6505_s5 + $0x2e8] sm:$0xff]  ;;  %v2166_v12 = vld [vmem:[%s6505_s5 + $0x3f8] sm:$0xff] }
 0x5f6   : > { %2979 = vst.msk [vmem:[%s5619_s27 + $0xd0] sm:$0xff] %vm2952_vm6, %v2647_v4 }
 0x5f7   : > { %3009 = vst.msk [vmem:[%s5619_s27 + $0x1c0] sm:$0xff] %vm2952_vm6, %v2737_v55 }
 0x5f8   : > { %v2826_v45 = vpop.f32.mrf.mxu2  ;;  %v2928_v13 = vpop.f32.mrf.mxu3 }
 0x5f9   : > { %v2827_v43 = vadd.f32 %v2826_v45, %v2125_v36  ;;  %v2929_v24 = vadd.f32 %v2928_v13, %v2159_v42 }
 0x5fb   : > { %3039 = vst.msk [vmem:[%s5619_s27 + $0x2b0] sm:$0xff] %vm2952_vm6, %v2827_v43  ;;  %v2649_v35 = vpop.f32.mrf.mxu0  ;;  %v2739_v52 = vpop.f32.mrf.mxu1 }
 0x5fc   : > { %3073 = vst.msk [vmem:[%s5619_s27 + $0x3c0] sm:$0xff] %vm2952_vm6, %v2929_v24  ;;  %v2650_v22 = vadd.f32 %v2649_v35, %v2066_v30  ;;  %v2740_v53 = vadd.f32 %v2739_v52, %v2096_v49 }
 0x5fe   : > { %2980 = vst.msk [vmem:[%s5619_s27 + $0xd8] sm:$0xff] %vm2952_vm6, %v2650_v22 }
 0x5ff   : > { %3010 = vst.msk [vmem:[%s5619_s27 + $0x1c8] sm:$0xff] %vm2952_vm6, %v2740_v53 }
 0x600   : > { %v2829_v1 = vpop.f32.mrf.mxu2  ;;  %v2931_v6 = vpop.f32.mrf.mxu3 }
 0x601   : > { %v2830_v33 = vadd.f32 %v2829_v1, %v2126_v26  ;;  %v2932_v47 = vadd.f32 %v2931_v6, %v2160_v20 }
 0x603   : > { %3040 = vst.msk [vmem:[%s5619_s27 + $0x2b8] sm:$0xff] %vm2952_vm6, %v2830_v33  ;;  %v2652_v38 = vpop.f32.mrf.mxu0  ;;  %v2742_v17 = vpop.f32.mrf.mxu1 }
 0x604   : > { %3074 = vst.msk [vmem:[%s5619_s27 + $0x3c8] sm:$0xff] %vm2952_vm6, %v2932_v47  ;;  %v2653_v28 = vadd.f32 %v2652_v38, %v2067_v14  ;;  %v2743_v51 = vadd.f32 %v2742_v17, %v2097_v7 }
 0x606   : > { %2981 = vst.msk [vmem:[%s5619_s27 + $0xe0] sm:$0xff] %vm2952_vm6, %v2653_v28 }
 0x607   : > { %3011 = vst.msk [vmem:[%s5619_s27 + $0x1d0] sm:$0xff] %vm2952_vm6, %v2743_v51 }
 0x608   : > { %v2832_v5 = vpop.f32.mrf.mxu2  ;;  %v2934_v8 = vpop.f32.mrf.mxu3 }
 0x609   : > { %v2833_v9 = vadd.f32 %v2832_v5, %v2127_v16  ;;  %v2935_v27 = vadd.f32 %v2934_v8, %v2161_v21 }
 0x60b   : > { %3041 = vst.msk [vmem:[%s5619_s27 + $0x2c0] sm:$0xff] %vm2952_vm6, %v2833_v9  ;;  %v2655_v62 = vpop.f32.mrf.mxu0  ;;  %v2745_v60 = vpop.f32.mrf.mxu1 }
 0x60c   : > { %3075 = vst.msk [vmem:[%s5619_s27 + $0x3d0] sm:$0xff] %vm2952_vm6, %v2935_v27  ;;  %v2656_v25 = vadd.f32 %v2655_v62, %v2068_v0  ;;  %v2746_v44 = vadd.f32 %v2745_v60, %v2098_v48 }
 0x60e   : > { %2982 = vst.msk [vmem:[%s5619_s27 + $0xe8] sm:$0xff] %vm2952_vm6, %v2656_v25 }
 0x60f   : > { %3012 = vst.msk [vmem:[%s5619_s27 + $0x1d8] sm:$0xff] %vm2952_vm6, %v2746_v44 }
 0x610   : > { %v2835_v46 = vpop.f32.mrf.mxu2  ;;  %v2937_v31 = vpop.f32.mrf.mxu3 }
 0x611   : > { %v2836_v40 = vadd.f32 %v2835_v46, %v2128_v32  ;;  %v2938_v23 = vadd.f32 %v2937_v31, %v2162_v2 }
 0x613   : > { %3042 = vst.msk [vmem:[%s5619_s27 + $0x2c8] sm:$0xff] %vm2952_vm6, %v2836_v40 }
 0x614   : > { %3076 = vst.msk [vmem:[%s5619_s27 + $0x3d8] sm:$0xff] %vm2952_vm6, %v2938_v23 }
 0x618   : > { %v2838_v37 = vpop.f32.mrf.mxu2  ;;  %v2940_v63 = vpop.f32.mrf.mxu3 }
 0x619   : > { %v2839_v3 = vadd.f32 %v2838_v37, %v2129_v11  ;;  %v2941_v18 = vadd.f32 %v2940_v63, %v2163_v41 }
 0x61b   : > { %3043 = vst.msk [vmem:[%s5619_s27 + $0x2d0] sm:$0xff] %vm2952_vm6, %v2839_v3 }
 0x61c   : > { %3077 = vst.msk [vmem:[%s5619_s27 + $0x3e0] sm:$0xff] %vm2952_vm6, %v2941_v18 }
 0x620   : > { %v2841_v58 = vpop.f32.mrf.mxu2  ;;  %v2943_v61 = vpop.f32.mrf.mxu3 }
 0x621   : > { %v2842_v10 = vadd.f32 %v2841_v58, %v2130_v34  ;;  %v2944_v57 = vadd.f32 %v2943_v61, %v2164_v19 }
 0x623   : > { %3044 = vst.msk [vmem:[%s5619_s27 + $0x2d8] sm:$0xff] %vm2952_vm6, %v2842_v10 }
 0x624   : > { %3078 = vst.msk [vmem:[%s5619_s27 + $0x3e8] sm:$0xff] %vm2952_vm6, %v2944_v57 }
 0x628   : > { %v2844_v54 = vpop.f32.mrf.mxu2  ;;  %v2946_v56 = vpop.f32.mrf.mxu3 }
 0x629   : > { %v2845_v36 = vadd.f32 %v2844_v54, %v2131_v59  ;;  %v2947_v42 = vadd.f32 %v2946_v56, %v2165_v50 }
 0x62b   : > { %3045 = vst.msk [vmem:[%s5619_s27 + $0x2e0] sm:$0xff] %vm2952_vm6, %v2845_v36 }
 0x62c   : > { %3079 = vst.msk [vmem:[%s5619_s27 + $0x3f0] sm:$0xff] %vm2952_vm6, %v2947_v42 }
 0x630   : > { %v2847_v45 = vpop.f32.mrf.mxu2  ;;  %v2949_v13 = vpop.f32.mrf.mxu3 }
 0x631   : > { %v2848_v43 = vadd.f32 %v2847_v45, %v2132_v15  ;;  %v2950_v24 = vadd.f32 %v2949_v13, %v2166_v12 }
 0x633   : > { %3046 = vst.msk [vmem:[%s5619_s27 + $0x2e8] sm:$0xff] %vm2952_vm6, %v2848_v43 }
 0x634   : > { %3080 = vst.msk [vmem:[%s5619_s27 + $0x3f8] sm:$0xff] %vm2952_vm6, %v2950_v24 }
 0x635 PF: > { %s16_s21 = sadd.s32 1, %s3836_s21  }
 0x636   : > { %p13_p4 = scmp.ge.s32.totalorder %s16_s21, 4  }
 0x638   :  { %15 = sbr.rel (!%p13_p4) target bundleno = 1 (0x1), region = 77 }

</bundles_post_ra>
